<compile_context>
chip_gen: v5e
topology: v5e:2x2
jax: 0.10.0
libtpu: 0.0.40
codegen_flags: <defaults>
</compile_context>

<pallas_src>
from functools import partial

import jax
import jax.numpy as jnp
from jax.experimental import pallas as pl
from jax.experimental.pallas import tpu as pltpu

NUM_NODE = 2
C_IN = 512     # backbone feature channels
C_MID = 128    # head channels


# ----------------------------------------------------------------------------
# Fused kernel: audio head (once per image) + visual head + AV similarity,
# tiled over the spatial (HW) axis.  grid = (N, HW//T_HW).
# ----------------------------------------------------------------------------
def fused_head_kernel(img_ref, aud_ref, wv1_ref, bv1_ref, wv2_ref, bv2_ref,
                      w1_ref, b1_ref, w2_ref, b2_ref, wav_ref,
                      v_ref, a_ref, av_ref, a_sc):
    t = pl.program_id(1)

    # ---------------- audio branch: once per image (hoisted out of HW loop) --
    @pl.when(t == 0)
    def _():
        # aud_ref: (1, hw, 512); AdaptiveMaxPool2d((1,1)) == max over spatial.
        pooled = jnp.max(aud_ref[0], axis=0, keepdims=True)               # (1, 512)
        # Both nodes' first Linear fused into one (512, node*128) matmul.
        h_a = jnp.dot(pooled.astype(jnp.bfloat16), w1_ref[...],
                      preferred_element_type=jnp.float32) + b1_ref[...]   # (1, 256)
        h_a = jnp.maximum(h_a, 0.0)                                       # ReLU
        # Second Linears as a single block-diagonal (256,256) matmul.
        a = jnp.dot(h_a.astype(jnp.bfloat16), w2_ref[...],
                    preferred_element_type=jnp.float32) + b2_ref[...]     # (1, 256)
        a_nodes = a.reshape(NUM_NODE, C_MID)                              # (node, 128)
        a_ref[0] = a_nodes
        # Fold conv_av scalar into `a` once; keep bf16 copy for the AV matmul.
        a_sc[...] = (wav_ref[0, 0] * a_nodes).astype(jnp.bfloat16)

    # ---------------- visual branch on this HW tile (1x1 conv == matmul) -----
    x = img_ref[0]                                                        # (512, T) bf16
    hm = jnp.dot(wv1_ref[...], x,
                 preferred_element_type=jnp.float32) + bv1_ref[...]       # (128, T)
    hm = jnp.maximum(hm, 0.0)                                             # ReLU
    v = jnp.dot(wv2_ref[...], hm.astype(jnp.bfloat16),
                preferred_element_type=jnp.float32) + bv2_ref[...]        # (128, T)
    v_ref[0] = v

    # ---------------- audio-visual similarity + sigmoid ----------------------
    s = jnp.dot(a_sc[...], v.astype(jnp.bfloat16),
                preferred_element_type=jnp.float32)                       # (node, T)
    av_ref[0] = jax.nn.sigmoid(s)


# ----------------------------------------------------------------------------
# Wrapper
# ----------------------------------------------------------------------------
@partial(jax.jit, static_argnames=("t_hw",))
def mix_aud_model_feat_forward(img_feat, aud_feat, kp, t_hw=512):
    """img_feat: (N,512,H,W) NCHW f32, aud_feat: (N,512,h,w) NCHW f32."""
    N, Ci, H, W = img_feat.shape
    _, _, h, w = aud_feat.shape
    HW, hw = H * W, h * w

    # Spatial tile: multiple of 128 (lane-dense stores), <= padded HW.
    if HW < t_hw:
        t_hw = pl.cdiv(HW, 128) * 128
    hw_pad = pl.cdiv(HW, t_hw) * t_hw
    n_t = hw_pad // t_hw

    # Big visual tensor: free reshape, stays NCHW; pad spatial, cast to bf16.
    img_flat = img_feat.reshape(N, Ci, HW)
    if hw_pad != HW:
        img_flat = jnp.pad(img_flat, ((0, 0), (0, 0), (0, hw_pad - HW)))
    img_flat = img_flat.astype(jnp.bfloat16)

    # Audio tensor is tiny; one small transpose so the pooled vector comes out
    # as a lane-dense (1, 512) row inside the kernel.
    aud_flat = jnp.transpose(aud_feat, (0, 2, 3, 1)).reshape(N, hw, Ci)

    v_flat, a_nodes, av_flat = pl.pallas_call(
        fused_head_kernel,
        out_shape=(
            jax.ShapeDtypeStruct((N, C_MID, hw_pad), jnp.float32),
            jax.ShapeDtypeStruct((N, NUM_NODE, C_MID), jnp.float32),
            jax.ShapeDtypeStruct((N, NUM_NODE, hw_pad), jnp.float32),
        ),
        grid=(N, n_t),
        in_specs=[
            pl.BlockSpec((1, Ci, t_hw), lambda n, t: (n, 0, t)),           # img tile
            pl.BlockSpec((1, hw, Ci), lambda n, t: (n, 0, 0)),             # aud (per n)
            pl.BlockSpec((C_MID, Ci), lambda n, t: (0, 0)),                # conv_v_1 W
            pl.BlockSpec((C_MID, 1), lambda n, t: (0, 0)),                 # conv_v_1 b
            pl.BlockSpec((C_MID, C_MID), lambda n, t: (0, 0)),             # conv_v_2 W
            pl.BlockSpec((C_MID, 1), lambda n, t: (0, 0)),                 # conv_v_2 b
            pl.BlockSpec((Ci, NUM_NODE * C_MID), lambda n, t: (0, 0)),     # fc W1 (fused)
            pl.BlockSpec((1, NUM_NODE * C_MID), lambda n, t: (0, 0)),      # fc b1 (fused)
            pl.BlockSpec((NUM_NODE * C_MID, NUM_NODE * C_MID),
                         lambda n, t: (0, 0)),                             # fc W2 (blockdiag)
            pl.BlockSpec((1, NUM_NODE * C_MID), lambda n, t: (0, 0)),      # fc b2 (fused)
            pl.BlockSpec(memory_space=pltpu.MemorySpace.SMEM),             # conv_av scalar
        ],
        out_specs=(
            pl.BlockSpec((1, C_MID, t_hw), lambda n, t: (n, 0, t)),
            pl.BlockSpec((1, NUM_NODE, C_MID), lambda n, t: (n, 0, 0)),
            pl.BlockSpec((1, NUM_NODE, t_hw), lambda n, t: (n, 0, t)),
        ),
        scratch_shapes=[pltpu.VMEM((NUM_NODE, C_MID), jnp.bfloat16)],
        compiler_params=pltpu.CompilerParams(
            dimension_semantics=("parallel", "arbitrary")),
    )(img_flat, aud_flat,
      kp["wv1"], kp["bv1"], kp["wv2"], kp["bv2"],
      kp["fc_w1"], kp["fc_b1"], kp["fc_w2"], kp["fc_b2"],
      kp["wav"])

    v_map = v_flat[:, :, :HW].reshape(N, C_MID, H, W)      # NCHW, crop pad
    av_crop = av_flat[:, :, :HW]
    av_map = av_crop.reshape(N, NUM_NODE, H, W)
    av_pool = jnp.max(av_crop, axis=-1)                    # (N, num_node)
    return v_map, a_nodes, av_map, av_pool


# ----------------------------------------------------------------------------
# Parameters: created in PyTorch (out, in) layout, then converted once to the
# kernel's matmul layout / dtypes (checkpoint-loading path is explicit).
# ----------------------------------------------------------------------------
def init_torch_params(key):
    ks = jax.random.split(key, 4)

    def w(k, fan_in, shape):
        return jax.random.normal(k, shape, jnp.float32) / jnp.sqrt(fan_in)

    return {
        "conv_v_1.weight": w(ks[0], C_IN, (C_MID, C_IN, 1, 1)),
        "conv_v_1.bias": jnp.zeros((C_MID,), jnp.float32),
        "conv_v_2.weight": w(ks[1], C_MID, (C_MID, C_MID, 1, 1)),
        "conv_v_2.bias": jnp.zeros((C_MID,), jnp.float32),
        "fc_a.0.weight": w(ks[2], C_IN, (NUM_NODE, C_MID, C_IN)),   # Linear(512,128)
        "fc_a.0.bias": jnp.zeros((NUM_NODE, C_MID), jnp.float32),
        "fc_a.2.weight": w(ks[3], C_MID, (NUM_NODE, C_MID, C_MID)), # Linear(128,128)
        "fc_a.2.bias": jnp.zeros((NUM_NODE, C_MID), jnp.float32),
        "conv_av.weight": jnp.full((1, 1, 1, 1), 0.5, jnp.float32), # bias=False
    }


def prepare_kernel_params(tp):
    """One-time (outside forward) conversion PyTorch (out,in) -> kernel layout."""
    # fc_a first layers fused along the output axis: (512, node*128)
    fc_w1 = jnp.concatenate(
        [tp["fc_a.0.weight"][i].T for i in range(NUM_NODE)], axis=1)
    fc_b1 = tp["fc_a.0.bias"].reshape(1, NUM_NODE * C_MID)
    # fc_a second layers as one block-diagonal matrix; off-diagonal blocks are
    # explicitly zero so node outputs cannot cross-contaminate.
    fc_w2 = jnp.zeros((NUM_NODE * C_MID, NUM_NODE * C_MID), jnp.float32)
    for i in range(NUM_NODE):
        fc_w2 = fc_w2.at[i * C_MID:(i + 1) * C_MID,
                         i * C_MID:(i + 1) * C_MID].set(tp["fc_a.2.weight"][i].T)
    fc_b2 = tp["fc_a.2.bias"].reshape(1, NUM_NODE * C_MID)
    return {
        "wv1": tp["conv_v_1.weight"].reshape(C_MID, C_IN).astype(jnp.bfloat16),
        "bv1": tp["conv_v_1.bias"].reshape(C_MID, 1),
        "wv2": tp["conv_v_2.weight"].reshape(C_MID, C_MID).astype(jnp.bfloat16),
        "bv2": tp["conv_v_2.bias"].reshape(C_MID, 1),
        "fc_w1": fc_w1.astype(jnp.bfloat16),
        "fc_b1": fc_b1,
        "fc_w2": fc_w2.astype(jnp.bfloat16),
        "fc_b2": fc_b2,
        "wav": tp["conv_av.weight"].reshape(1, 1),
    }


# ----------------------------------------------------------------------------
# Pure-JAX f32 reference for the correctness check.
# ----------------------------------------------------------------------------
def reference_forward(img_feat, aud_feat, tp):
    N, _, H, W = img_feat.shape
    pooled = jnp.max(aud_feat, axis=(2, 3))                               # (N, 512)
    a_nodes = []
    for i in range(NUM_NODE):
        hh = jax.nn.relu(pooled @ tp["fc_a.0.weight"][i].T + tp["fc_a.0.bias"][i])
        a_nodes.append(hh @ tp["fc_a.2.weight"][i].T + tp["fc_a.2.bias"][i])
    a_nodes = jnp.stack(a_nodes, axis=1)                                  # (N, node, 128)

    wv1 = tp["conv_v_1.weight"].reshape(C_MID, C_IN)
    wv2 = tp["conv_v_2.weight"].reshape(C_MID, C_MID)
    x = img_feat.reshape(N, C_IN, H * W)
    hmap = jax.nn.relu(jnp.einsum("oc,ncp->nop", wv1, x)
                       + tp["conv_v_1.bias"][None, :, None])
    v = (jnp.einsum("oc,ncp->nop", wv2, hmap)
         + tp["conv_v_2.bias"][None, :, None])                            # (N,128,HW)
    s = jnp.einsum("nkc,ncp->nkp", a_nodes, v)
    av = jax.nn.sigmoid(tp["conv_av.weight"].reshape(()) * s)
    av_pool = jnp.max(av, axis=-1)
    return (v.reshape(N, C_MID, H, W), a_nodes,
            av.reshape(N, NUM_NODE, H, W), av_pool)


def _close(x, y, tol=5e-2):
    # Loose check: catches layout/transposition bugs, tolerant of bf16 operands.
    return bool(jnp.max(jnp.abs(x - y)) <= tol * (1.0 + jnp.max(jnp.abs(y))))


if __name__ == "__main__":
    key = jax.random.PRNGKey(0)
    k_img, k_aud, k_par = jax.random.split(key, 3)

    # Small backbone-output-shaped features (NCHW). H*W = 1024 with T_HW = 512
    # exercises the spatial tiling (2 tiles per image) while staying small.
    N, H, W, h, w = 2, 32, 32, 4, 4
    img_feat = jax.random.normal(k_img, (N, C_IN, H, W), jnp.float32)
    aud_feat = jax.random.normal(k_aud, (N, C_IN, h, w), jnp.float32)

    torch_params = init_torch_params(k_par)
    kparams = prepare_kernel_params(torch_params)

    v_map, a_nodes, av_map, av_pool = mix_aud_model_feat_forward(
        img_feat, aud_feat, kparams)
    jax.block_until_ready((v_map, a_nodes, av_map, av_pool))

    assert v_map.shape == (N, C_MID, H, W)
    assert a_nodes.shape == (N, NUM_NODE, C_MID)
    assert av_map.shape == (N, NUM_NODE, H, W)
    assert av_pool.shape == (N, NUM_NODE)

    v_r, a_r, av_r, avp_r = reference_forward(img_feat, aud_feat, torch_params)
    assert _close(v_map, v_r), "v mismatch"
    assert _close(a_nodes, a_r), "a_nodes mismatch"
    assert _close(av_map, av_r), "av mismatch"
    assert _close(av_pool, avp_r), "av_pool mismatch"

    print("KERNEL_OK")
</pallas_src>

<mosaic_0001>
module attributes {stable_mosaic.version = 11 : i64} {
  func.func @fused_head_kernel(%arg0: i32, %arg1: i32, %arg2: memref<1x512x512xbf16, #tpu.memory_space<vmem>>, %arg3: memref<1x16x512xf32, #tpu.memory_space<vmem>>, %arg4: memref<128x512xbf16, #tpu.memory_space<vmem>>, %arg5: memref<128x1xf32, #tpu.memory_space<vmem>>, %arg6: memref<128x128xbf16, #tpu.memory_space<vmem>>, %arg7: memref<128x1xf32, #tpu.memory_space<vmem>>, %arg8: memref<512x256xbf16, #tpu.memory_space<vmem>>, %arg9: memref<1x256xf32, #tpu.memory_space<vmem>>, %arg10: memref<256x256xbf16, #tpu.memory_space<vmem>>, %arg11: memref<1x256xf32, #tpu.memory_space<vmem>>, %arg12: memref<1x1xf32, #tpu.memory_space<smem>>, %arg13: memref<1x128x512xf32, #tpu.memory_space<vmem>>, %arg14: memref<1x2x128xf32, #tpu.memory_space<vmem>>, %arg15: memref<1x2x512xf32, #tpu.memory_space<vmem>>, %arg16: memref<2x128xbf16, #tpu.memory_space<vmem>>) attributes {dimension_semantics = [#tpu.dimension_semantics<parallel>, #tpu.dimension_semantics<arbitrary>], iteration_bounds = array<i64: 2, 2>, scalar_prefetch = 0 : i64, scratch_operands = 1 : i64, tpu.core_type = #tpu.core_type<tc>, window_params = [{transform_indices = @transform_0, window_bounds = array<i64: 1, 512, 512>}, {transform_indices = @transform_1, window_bounds = array<i64: 1, 16, 512>}, {pipeline_mode = #tpu.pipeline_mode<synchronous>, transform_indices = @transform_2, window_bounds = array<i64: 128, 512>}, {pipeline_mode = #tpu.pipeline_mode<synchronous>, transform_indices = @transform_3, window_bounds = array<i64: 128, 1>}, {pipeline_mode = #tpu.pipeline_mode<synchronous>, transform_indices = @transform_4, window_bounds = array<i64: 128, 128>}, {pipeline_mode = #tpu.pipeline_mode<synchronous>, transform_indices = @transform_5, window_bounds = array<i64: 128, 1>}, {pipeline_mode = #tpu.pipeline_mode<synchronous>, transform_indices = @transform_6, window_bounds = array<i64: 512, 256>}, {pipeline_mode = #tpu.pipeline_mode<synchronous>, transform_indices = @transform_7, window_bounds = array<i64: 1, 256>}, {pipeline_mode = #tpu.pipeline_mode<synchronous>, transform_indices = @transform_8, window_bounds = array<i64: 256, 256>}, {pipeline_mode = #tpu.pipeline_mode<synchronous>, transform_indices = @transform_9, window_bounds = array<i64: 1, 256>}, {transform_indices = @transform_10, window_bounds = array<i64: 1, 1>}, {transform_indices = @transform_11, window_bounds = array<i64: 1, 128, 512>}, {transform_indices = @transform_12, window_bounds = array<i64: 1, 2, 128>}, {transform_indices = @transform_13, window_bounds = array<i64: 1, 2, 512>}]} {
    %c0_i32 = arith.constant 0 : i32
    %0 = arith.cmpi eq, %arg1, %c0_i32 : i32
    %1 = arith.extui %0 : i1 to i32
    %c0_i32_0 = arith.constant 0 : i32
    %2 = arith.cmpi ne, %1, %c0_i32_0 : i32
    scf.if %2 {
      %c0_23 = arith.constant 0 : index
      %c0_24 = arith.constant 0 : index
      %c0_25 = arith.constant 0 : index
      %32 = vector.load %arg3[%c0_23, %c0_24, %c0_25] : memref<1x16x512xf32, #tpu.memory_space<vmem>>, vector<1x16x512xf32>
      %33 = vector.shape_cast %32 : vector<1x16x512xf32> to vector<16x512xf32>
      %cst_26 = arith.constant dense<0xFF800000> : vector<512xf32>
      %34 = vector.multi_reduction <maximumf>, %33, %cst_26 [0] : vector<16x512xf32> to vector<512xf32>
      %35 = vector.shape_cast %34 : vector<512xf32> to vector<1x512xf32>
      %36 = arith.truncf %35 : vector<1x512xf32> to vector<1x512xbf16>
      %c0_27 = arith.constant 0 : index
      %c0_28 = arith.constant 0 : index
      %37 = vector.load %arg8[%c0_27, %c0_28] : memref<512x256xbf16, #tpu.memory_space<vmem>>, vector<512x256xbf16>
      %cst_29 = arith.constant dense<0.000000e+00> : vector<1x256xf32>
      %38 = tpu.matmul %36, %37, %cst_29 {dimension_numbers = #tpu.dot_dimension_numbers<[1], [0], [0], [1], [0, 0, 1, 1], [], []>} : vector<1x512xbf16>, vector<512x256xbf16>, vector<1x256xf32> -> vector<1x256xf32>
      %c0_30 = arith.constant 0 : index
      %c0_31 = arith.constant 0 : index
      %39 = vector.load %arg9[%c0_30, %c0_31] : memref<1x256xf32, #tpu.memory_space<vmem>>, vector<1x256xf32>
      %40 = arith.addf %38, %39 : vector<1x256xf32>
      %cst_32 = arith.constant 0.000000e+00 : f32
      %41 = vector.broadcast %cst_32 : f32 to vector<1x256xf32>
      %42 = arith.maximumf %40, %41 : vector<1x256xf32>
      %43 = arith.truncf %42 : vector<1x256xf32> to vector<1x256xbf16>
      %c0_33 = arith.constant 0 : index
      %c0_34 = arith.constant 0 : index
      %44 = vector.load %arg10[%c0_33, %c0_34] : memref<256x256xbf16, #tpu.memory_space<vmem>>, vector<256x256xbf16>
      %cst_35 = arith.constant dense<0.000000e+00> : vector<1x256xf32>
      %45 = tpu.matmul %43, %44, %cst_35 {dimension_numbers = #tpu.dot_dimension_numbers<[1], [0], [0], [1], [0, 0, 1, 1], [], []>} : vector<1x256xbf16>, vector<256x256xbf16>, vector<1x256xf32> -> vector<1x256xf32>
      %c0_36 = arith.constant 0 : index
      %c0_37 = arith.constant 0 : index
      %46 = vector.load %arg11[%c0_36, %c0_37] : memref<1x256xf32, #tpu.memory_space<vmem>>, vector<1x256xf32>
      %47 = arith.addf %45, %46 : vector<1x256xf32>
      %48 = vector.shape_cast %47 : vector<1x256xf32> to vector<2x128xf32>
      %c0_38 = arith.constant 0 : index
      %c0_39 = arith.constant 0 : index
      %c0_40 = arith.constant 0 : index
      %49 = vector.load %arg14[%c0_38, %c0_39, %c0_40] : memref<1x2x128xf32, #tpu.memory_space<vmem>>, vector<1x2x128xf32>
      %50 = vector.shape_cast %49 : vector<1x2x128xf32> to vector<2x128xf32>
      %51 = vector.shape_cast %48 : vector<2x128xf32> to vector<1x2x128xf32>
      tpu.vector_store %arg14[%c0_38, %c0_39, %c0_40], %51 {strides = array<i32>} : memref<1x2x128xf32, #tpu.memory_space<vmem>>, vector<1x2x128xf32>,
      %c0_41 = arith.constant 0 : index
      %c0_42 = arith.constant 0 : index
      %52 = memref.load %arg12[%c0_41, %c0_42] : memref<1x1xf32, #tpu.memory_space<smem>>
      %53 = vector.broadcast %52 : f32 to vector<2x128xf32>
      %54 = arith.mulf %53, %48 : vector<2x128xf32>
      %55 = arith.truncf %54 : vector<2x128xf32> to vector<2x128xbf16>
      %c0_43 = arith.constant 0 : index
      %c0_44 = arith.constant 0 : index
      %56 = vector.load %arg16[%c0_43, %c0_44] : memref<2x128xbf16, #tpu.memory_space<vmem>>, vector<2x128xbf16>
      tpu.vector_store %arg16[%c0_43, %c0_44], %55 {strides = array<i32>} : memref<2x128xbf16, #tpu.memory_space<vmem>>, vector<2x128xbf16>,
    } else {
    }
    %c0 = arith.constant 0 : index
    %c0_1 = arith.constant 0 : index
    %c0_2 = arith.constant 0 : index
    %3 = vector.load %arg2[%c0, %c0_1, %c0_2] : memref<1x512x512xbf16, #tpu.memory_space<vmem>>, vector<1x512x512xbf16>
    %4 = vector.shape_cast %3 : vector<1x512x512xbf16> to vector<512x512xbf16>
    %c0_3 = arith.constant 0 : index
    %c0_4 = arith.constant 0 : index
    %5 = vector.load %arg4[%c0_3, %c0_4] : memref<128x512xbf16, #tpu.memory_space<vmem>>, vector<128x512xbf16>
    %cst = arith.constant dense<0.000000e+00> : vector<128x512xf32>
    %6 = tpu.matmul %5, %4, %cst {dimension_numbers = #tpu.dot_dimension_numbers<[1], [0], [0], [1], [0, 0, 1, 1], [], []>} : vector<128x512xbf16>, vector<512x512xbf16>, vector<128x512xf32> -> vector<128x512xf32>
    %c0_5 = arith.constant 0 : index
    %c0_6 = arith.constant 0 : index
    %7 = vector.load %arg5[%c0_5, %c0_6] : memref<128x1xf32, #tpu.memory_space<vmem>>, vector<128x1xf32>
    %8 = vector.broadcast %7 : vector<128x1xf32> to vector<128x512xf32>
    %9 = arith.addf %6, %8 : vector<128x512xf32>
    %cst_7 = arith.constant 0.000000e+00 : f32
    %10 = vector.broadcast %cst_7 : f32 to vector<128x512xf32>
    %11 = arith.maximumf %9, %10 : vector<128x512xf32>
    %c0_8 = arith.constant 0 : index
    %c0_9 = arith.constant 0 : index
    %12 = vector.load %arg6[%c0_8, %c0_9] : memref<128x128xbf16, #tpu.memory_space<vmem>>, vector<128x128xbf16>
    %13 = arith.truncf %11 : vector<128x512xf32> to vector<128x512xbf16>
    %cst_10 = arith.constant dense<0.000000e+00> : vector<128x512xf32>
    %14 = tpu.matmul %12, %13, %cst_10 {dimension_numbers = #tpu.dot_dimension_numbers<[1], [0], [0], [1], [0, 0, 1, 1], [], []>} : vector<128x128xbf16>, vector<128x512xbf16>, vector<128x512xf32> -> vector<128x512xf32>
    %c0_11 = arith.constant 0 : index
    %c0_12 = arith.constant 0 : index
    %15 = vector.load %arg7[%c0_11, %c0_12] : memref<128x1xf32, #tpu.memory_space<vmem>>, vector<128x1xf32>
    %16 = vector.broadcast %15 : vector<128x1xf32> to vector<128x512xf32>
    %17 = arith.addf %14, %16 : vector<128x512xf32>
    %c0_13 = arith.constant 0 : index
    %c0_14 = arith.constant 0 : index
    %c0_15 = arith.constant 0 : index
    %18 = vector.load %arg13[%c0_13, %c0_14, %c0_15] : memref<1x128x512xf32, #tpu.memory_space<vmem>>, vector<1x128x512xf32>
    %19 = vector.shape_cast %18 : vector<1x128x512xf32> to vector<128x512xf32>
    %20 = vector.shape_cast %17 : vector<128x512xf32> to vector<1x128x512xf32>
    tpu.vector_store %arg13[%c0_13, %c0_14, %c0_15], %20 {strides = array<i32>} : memref<1x128x512xf32, #tpu.memory_space<vmem>>, vector<1x128x512xf32>,
    %c0_16 = arith.constant 0 : index
    %c0_17 = arith.constant 0 : index
    %21 = vector.load %arg16[%c0_16, %c0_17] : memref<2x128xbf16, #tpu.memory_space<vmem>>, vector<2x128xbf16>
    %22 = arith.truncf %17 : vector<128x512xf32> to vector<128x512xbf16>
    %cst_18 = arith.constant dense<0.000000e+00> : vector<2x512xf32>
    %23 = tpu.matmul %21, %22, %cst_18 {dimension_numbers = #tpu.dot_dimension_numbers<[1], [0], [0], [1], [0, 0, 1, 1], [], []>} : vector<2x128xbf16>, vector<128x512xbf16>, vector<2x512xf32> -> vector<2x512xf32>
    %24 = arith.negf %23 : vector<2x512xf32>
    %25 = math.exp %24 : vector<2x512xf32>
    %cst_19 = arith.constant 1.000000e+00 : f32
    %26 = vector.broadcast %cst_19 : f32 to vector<2x512xf32>
    %27 = arith.addf %26, %25 : vector<2x512xf32>
    %28 = arith.divf %26, %27 : vector<2x512xf32>
    %c0_20 = arith.constant 0 : index
    %c0_21 = arith.constant 0 : index
    %c0_22 = arith.constant 0 : index
    %29 = vector.load %arg15[%c0_20, %c0_21, %c0_22] : memref<1x2x512xf32, #tpu.memory_space<vmem>>, vector<1x2x512xf32>
    %30 = vector.shape_cast %29 : vector<1x2x512xf32> to vector<2x512xf32>
    %31 = vector.shape_cast %28 : vector<2x512xf32> to vector<1x2x512xf32>
    tpu.vector_store %arg15[%c0_20, %c0_21, %c0_22], %31 {strides = array<i32>} : memref<1x2x512xf32, #tpu.memory_space<vmem>>, vector<1x2x512xf32>,
    return
  }
  func.func @transform_0(%arg0: i32, %arg1: i32) -> (i32, i32, i32) {
    %c0_i32 = arith.constant 0 : i32
    %c0_i32_0 = arith.constant 0 : i32
    return %arg0, %c0_i32, %arg1 : i32, i32, i32
  }
  func.func @transform_1(%arg0: i32, %arg1: i32) -> (i32, i32, i32) {
    %c0_i32 = arith.constant 0 : i32
    %c0_i32_0 = arith.constant 0 : i32
    %c0_i32_1 = arith.constant 0 : i32
    return %arg0, %c0_i32, %c0_i32_0 : i32, i32, i32
  }
  func.func @transform_2(%arg0: i32, %arg1: i32) -> (i32, i32) {
    %c0_i32 = arith.constant 0 : i32
    %c0_i32_0 = arith.constant 0 : i32
    %c0_i32_1 = arith.constant 0 : i32
    return %c0_i32, %c0_i32_0 : i32, i32
  }
  func.func @transform_3(%arg0: i32, %arg1: i32) -> (i32, i32) {
    %c0_i32 = arith.constant 0 : i32
    %c0_i32_0 = arith.constant 0 : i32
    %c0_i32_1 = arith.constant 0 : i32
    return %c0_i32, %c0_i32_0 : i32, i32
  }
  func.func @transform_4(%arg0: i32, %arg1: i32) -> (i32, i32) {
    %c0_i32 = arith.constant 0 : i32
    %c0_i32_0 = arith.constant 0 : i32
    %c0_i32_1 = arith.constant 0 : i32
    return %c0_i32, %c0_i32_0 : i32, i32
  }
  func.func @transform_5(%arg0: i32, %arg1: i32) -> (i32, i32) {
    %c0_i32 = arith.constant 0 : i32
    %c0_i32_0 = arith.constant 0 : i32
    %c0_i32_1 = arith.constant 0 : i32
    return %c0_i32, %c0_i32_0 : i32, i32
  }
  func.func @transform_6(%arg0: i32, %arg1: i32) -> (i32, i32) {
    %c0_i32 = arith.constant 0 : i32
    %c0_i32_0 = arith.constant 0 : i32
    %c0_i32_1 = arith.constant 0 : i32
    return %c0_i32, %c0_i32_0 : i32, i32
  }
  func.func @transform_7(%arg0: i32, %arg1: i32) -> (i32, i32) {
    %c0_i32 = arith.constant 0 : i32
    %c0_i32_0 = arith.constant 0 : i32
    %c0_i32_1 = arith.constant 0 : i32
    return %c0_i32, %c0_i32_0 : i32, i32
  }
  func.func @transform_8(%arg0: i32, %arg1: i32) -> (i32, i32) {
    %c0_i32 = arith.constant 0 : i32
    %c0_i32_0 = arith.constant 0 : i32
    %c0_i32_1 = arith.constant 0 : i32
    return %c0_i32, %c0_i32_0 : i32, i32
  }
  func.func @transform_9(%arg0: i32, %arg1: i32) -> (i32, i32) {
    %c0_i32 = arith.constant 0 : i32
    %c0_i32_0 = arith.constant 0 : i32
    %c0_i32_1 = arith.constant 0 : i32
    return %c0_i32, %c0_i32_0 : i32, i32
  }
  func.func @transform_10(%arg0: i32, %arg1: i32) -> (i32, i32) {
    %c0_i32 = arith.constant 0 : i32
    %c0_i32_0 = arith.constant 0 : i32
    %c0_i32_1 = arith.constant 0 : i32
    return %c0_i32, %c0_i32_0 : i32, i32
  }
  func.func @transform_11(%arg0: i32, %arg1: i32) -> (i32, i32, i32) {
    %c0_i32 = arith.constant 0 : i32
    %c0_i32_0 = arith.constant 0 : i32
    return %arg0, %c0_i32, %arg1 : i32, i32, i32
  }
  func.func @transform_12(%arg0: i32, %arg1: i32) -> (i32, i32, i32) {
    %c0_i32 = arith.constant 0 : i32
    %c0_i32_0 = arith.constant 0 : i32
    %c0_i32_1 = arith.constant 0 : i32
    return %arg0, %c0_i32, %c0_i32_0 : i32, i32, i32
  }
  func.func @transform_13(%arg0: i32, %arg1: i32) -> (i32, i32, i32) {
    %c0_i32 = arith.constant 0 : i32
    %c0_i32_0 = arith.constant 0 : i32
    return %arg0, %c0_i32, %arg1 : i32, i32, i32
  }
}

</mosaic_0001>

<bundles_post_ra>
// kernel: mix_aud_model_feat_forward.1
= control target key start
LH: loop header
LB: loop body
LE: loop exit
PB: predicated region body
PF: predicated region fallthrough
CT: control target
= control target key end

     0   :  { %s8710_s0 = inlined_call_operand.vmem [shape: bf16[2,512,1024], index: 0, kind: input, shape index: {}]   ;;  %s8711_s1 = inlined_call_operand.vmem [shape: f32[2,16,512], index: 1, kind: input, shape index: {}]   ;;  %s8712_s2 = inlined_call_operand.vmem [shape: bf16[128,512], index: 2, kind: input, shape index: {}]   ;;  %s8713_s3 = inlined_call_operand.vmem [shape: f32[128,1], index: 3, kind: input, shape index: {}]   ;;  %s8714_s4 = inlined_call_operand.vmem [shape: bf16[128,128], index: 4, kind: input, shape index: {}]   ;;  %s8715_s5 = inlined_call_operand.vmem [shape: f32[128,1], index: 5, kind: input, shape index: {}]   ;;  %s8716_s6 = inlined_call_operand.vmem [shape: bf16[512,256], index: 6, kind: input, shape index: {}]   ;;  %s8717_s7 = inlined_call_operand.vmem [shape: f32[1,256], index: 7, kind: input, shape index: {}]   ;;  %s8718_s8 = inlined_call_operand.vmem [shape: bf16[256,256], index: 8, kind: input, shape index: {}]   ;;  %s8719_s9 = inlined_call_operand.vmem [shape: f32[1,256], index: 9, kind: input, shape index: {}]   ;;  %s8720_s10 = inlined_call_operand.<no memory space> [shape: f32[1,1], index: 10, kind: input, shape index: {}]   ;;  %s8721_s11 = inlined_call_operand.vmem [shape: f32[2,128,1024], index: 11, kind: output, shape index: {0}]   ;;  %s8722_s12 = inlined_call_operand.hbm [shape: f32[2,2,128], index: 12, kind: output, shape index: {1}]   ;;  %s8723_s13 = inlined_call_operand.vmem [shape: f32[2,2,1024], index: 13, kind: output, shape index: {2}]  }
   0x1   :  { %8807 = sst [smem:[#allocation53_spill]] %s8710_s0 }
   0x2   :  { %8808 = sst [smem:[#allocation54_spill]] %s8712_s2 }
   0x3   :  { %8809 = sst [smem:[#allocation55_spill]] %s8714_s4 }
   0x4   :  { %8810 = sst [smem:[#allocation56_spill]] %s8715_s5 }
   0x5   :  { %8811 = sst [smem:[#allocation57_spill]] %s8721_s11 }
   0x6   :  { %8812 = sst [smem:[#allocation58_spill]] %s8722_s12 }
   0x7   :  { %19 = sst [smem:[#allocation3]] %s8720_s10 }
   0x8   :  { %20 = vsyncpa [#allocation7], 0 }
   0x9   :  { %22 = vsyncpa [#allocation7 + $0x1], 0  ;;  %s6116_s27 = smov 0   ;;  %s6118_s28 = smov 0  }
   0xa   :  { %s6120_s29 = smov 0   ;;  %s6122_s30 = smov 0  }
   0xb   :  { %s6124_s14 = smov 0   ;;  %s6126_s15 = smov 0  }
   0xc   :  { %s6128_s16 = smov 0   ;;  %s6130_s17 = smov 0  }
   0xd   :  { %s6132_s18 = smov 0   ;;  %s6134_s10 = smov 0  }
   0xe LB: > { %8813 = sst [smem:[#allocation9_spill]] %s6003_s27  ;;  %s4469_s19 = sadd.s32 4294967295, %s6039_s10   ;;  %s6039_s10 = sphi %s6134_s10, %s28_s10   ;;  %s6035_s18 = sphi %s6132_s18, %s8971_s18   ;;  %s6031_s17 = sphi %s6130_s17, %s8970_s17   ;;  %s6027_s16 = sphi %s6128_s16, %s8969_s16   ;;  %s6023_s15 = sphi %s6126_s15, %s8968_s15   ;;  %s6019_s14 = sphi %s6124_s14, %s8967_s14   ;;  %s6015_s30 = sphi %s6122_s30, %s8966_s30   ;;  %s6011_s29 = sphi %s6120_s29, %s8974_s29   ;;  %s6007_s28 = sphi %s6118_s28, %s8973_s28   ;;  %s6003_s27 = sphi %s6116_s27, %s8972_s27  }
   0xf   : > { %8814 = sst [smem:[#allocation10_spill]] %s6011_s29  ;;  %s4470_s20 = sadd.s32 4294967294, %s6039_s10  }
  0x10   : > { %8815 = sst [smem:[#allocation11_spill]] %s6019_s14  ;;  %s37_s21 = sadd.s32 1, %s6031_s17 }
  0x11   : > { %8816 = sst [smem:[#allocation12_spill]] %s6031_s17  ;;  %s40_s22 = sadd.s32 1, %s6035_s18 }
  0x12   : > { %8817 = sst [smem:[#allocation13_spill]] %s6035_s18  ;;  %p38_p0 = scmp.ge.s32.totalorder %s37_s21, 2 }
  0x13   : > { %8818 = sst [smem:[#allocation14_spill]] %s6039_s10  ;;  %s49_s23 = sadd.s32 1, %s6019_s14 }
  0x14   : > { %p56_p1 = scmp.ne.s32.totalorder %s6019_s14, %s6015_s30  ;;  %p57_p2 = scmp.eq.s32.totalorder %s6039_s10, 0 }
  0x15   : > { %s8976_s21 = smov (%p38_p0, %s37_s21), 0  ;;  %s8978_s22 = smov (!%p38_p0, %s40_s22), %s6035_s18 }
  0x16   : > { %8819 = sst [smem:[#allocation15_spill]] %s8976_s21  ;;  %s45_s24 = ssub.s32 %s6031_s17, %s8976_s21 }
  0x17   : > { %p6179_p3 = por %p57_p2, %p56_p1  ;;  %p42_p4 = scmp.ge.s32.totalorder %s8978_s22, 2 }
  0x18   : > { %p303_p5 = scmp.eq.s32.totalorder %s4469_s19, 3  ;;  %s318_s26 = sadd.s32 1, %s6011_s29 }
  0x19   : > { %p328_p6 = scmp.ne.s32.totalorder %s6011_s29, %s6007_s28  ;;  %s8980_s22 = smov (%p42_p4, %s8978_s22), 0 }
  0x1a   : > { %8821 = sst [smem:[#allocation16_spill]] %s8980_s22  ;;  %p6188_p7 = por %p303_p5, %p56_p1 }
  0x1b   : > { %p6192_p8 = por %p328_p6, %p303_p5  ;;  %s44_s21 = ssub.s32 %s6035_s18, %s8980_s22 }
  0x1c   : > { %p334_p9 = scmp.ne.s32.totalorder %s6007_s28, %s6003_s27  ;;  %s46_s4 = sor.u32 %s45_s24, %s44_s21 }
  0x1d   : > { %p316_p10 = scmp.eq.s32.totalorder %s44_s21, 0  ;;  %p47_p11 = scmp.eq.s32.totalorder %s46_s4, 0 }
  0x1e   : > { %p335_p12 = scmp.eq.s32.totalorder %s4470_s20, 3  ;;  %p4472_p0 = scmp.ge.s32.totalorder %s6039_s10, 4 }
  0x1f   : > { %s6201_s19 = scalar_select %p316_p10, %s6011_s29, %s318_s26  }
  0x20   : > { %s6204_s5 = scalar_select %p47_p11, %s6019_s14, %s49_s23  }
  0x21   : > { %8824 = sst [smem:[#allocation17_spill]] %s6201_s19  ;;  %p6206_p13 = por %p335_p12, %p334_p9 }
  0x22   : > { %8825 = sst [smem:[#allocation18_spill]] %s6204_s5  ;;  %406 = sbr.rel (%p4472_p0) target bundleno = 177 (0xb1), region = 52 }
  0x23   : > { %s8826_s2 = scalar_select %p6206_p13, 1, 0 }
  0x25   : > { %8827 = sst [smem:[#allocation19_spill]] %s8826_s2 }
  0x27   : > { %409 = sbr.rel (!%p6179_p3) target bundleno = 177 (0xb1), region = 56  ;;  %s411_s21 = sand.u32 (%p6179_p3), 1, %s6019_s14  }
  0x28   : > { %s4474_s4 = sshll.u32 (%p6179_p3), %s6031_s17, 2  ;;  %s4473_s20 = sshll.u32 (%p6179_p3), %s411_s21, 10 }
  0x29   : > { %s4475_s24 = sshll.u32 (%p6179_p3), %s6035_s18, 9  ;;  %s8828_s0 = sld [smem:[#allocation53_spill]] (%p6179_p3) }
  0x2a   : > { %s416_s26 = sadd.s32 (%p6179_p3), %s4475_s24, %s4474_s4  ;;  %s6224_s25 = scalar_lea.vmem (%p6179_p3), [#allocation4], %s4473_s20 }
  0x2b   : > { %s4476_s23 = sshll.u32 (%p6179_p3), %s416_s26, 2 }
  0x2f   : > { %s6219_s19 = scalar_lea.vmem %s8828_s0, %s4476_s23 }
  0x30   : > { %v431_v0 = vld [vmem:[%s6219_s19] sm:$0xff]  ;;  %v433_v1 = vld [vmem:[%s6219_s19 + $0x8] sm:$0xff] }
  0x31   : > { %v435_v2 = vld [vmem:[%s6219_s19 + $0x20] sm:$0xff]  ;;  %432 = vst [vmem:[%s6224_s25] sm:$0xff] %v431_v0  ;;  %v437_v3 = vld [vmem:[%s6219_s19 + $0x28] sm:$0xff] }
  0x32   : > { %434 = vst [vmem:[%s6224_s25 + $0x8] sm:$0xff] %v433_v1  ;;  %v439_v4 = vld [vmem:[%s6219_s19 + $0x40] sm:$0xff]  ;;  %v441_v5 = vld [vmem:[%s6219_s19 + $0x48] sm:$0xff] }
  0x33   : > { %436 = vst [vmem:[%s6224_s25 + $0x10] sm:$0xff] %v435_v2  ;;  %v443_v6 = vld [vmem:[%s6219_s19 + $0x60] sm:$0xff]  ;;  %v445_v7 = vld [vmem:[%s6219_s19 + $0x68] sm:$0xff] }
  0x34   : > { %438 = vst [vmem:[%s6224_s25 + $0x18] sm:$0xff] %v437_v3  ;;  %v447_v8 = vld [vmem:[%s6219_s19 + $0x80] sm:$0xff]  ;;  %v449_v9 = vld [vmem:[%s6219_s19 + $0x88] sm:$0xff] }
  0x35   : > { %440 = vst [vmem:[%s6224_s25 + $0x20] sm:$0xff] %v439_v4  ;;  %v451_v10 = vld [vmem:[%s6219_s19 + $0xa0] sm:$0xff]  ;;  %v453_v11 = vld [vmem:[%s6219_s19 + $0xa8] sm:$0xff] }
  0x36   : > { %442 = vst [vmem:[%s6224_s25 + $0x28] sm:$0xff] %v441_v5  ;;  %v455_v12 = vld [vmem:[%s6219_s19 + $0xc0] sm:$0xff]  ;;  %v457_v13 = vld [vmem:[%s6219_s19 + $0xc8] sm:$0xff] }
  0x37   : > { %444 = vst [vmem:[%s6224_s25 + $0x30] sm:$0xff] %v443_v6  ;;  %v459_v14 = vld [vmem:[%s6219_s19 + $0xe0] sm:$0xff]  ;;  %v461_v15 = vld [vmem:[%s6219_s19 + $0xe8] sm:$0xff] }
  0x38   : > { %446 = vst [vmem:[%s6224_s25 + $0x38] sm:$0xff] %v445_v7  ;;  %v463_v16 = vld [vmem:[%s6219_s19 + $0x100] sm:$0xff]  ;;  %v465_v17 = vld [vmem:[%s6219_s19 + $0x108] sm:$0xff] }
  0x39   : > { %448 = vst [vmem:[%s6224_s25 + $0x40] sm:$0xff] %v447_v8  ;;  %v467_v18 = vld [vmem:[%s6219_s19 + $0x120] sm:$0xff]  ;;  %v469_v19 = vld [vmem:[%s6219_s19 + $0x128] sm:$0xff] }
  0x3a   : > { %450 = vst [vmem:[%s6224_s25 + $0x48] sm:$0xff] %v449_v9  ;;  %v471_v20 = vld [vmem:[%s6219_s19 + $0x140] sm:$0xff]  ;;  %v473_v21 = vld [vmem:[%s6219_s19 + $0x148] sm:$0xff] }
  0x3b   : > { %452 = vst [vmem:[%s6224_s25 + $0x50] sm:$0xff] %v451_v10  ;;  %v475_v22 = vld [vmem:[%s6219_s19 + $0x160] sm:$0xff]  ;;  %v477_v23 = vld [vmem:[%s6219_s19 + $0x168] sm:$0xff] }
  0x3c   : > { %454 = vst [vmem:[%s6224_s25 + $0x58] sm:$0xff] %v453_v11  ;;  %v479_v24 = vld [vmem:[%s6219_s19 + $0x180] sm:$0xff]  ;;  %v481_v25 = vld [vmem:[%s6219_s19 + $0x188] sm:$0xff] }
  0x3d   : > { %456 = vst [vmem:[%s6224_s25 + $0x60] sm:$0xff] %v455_v12  ;;  %v483_v26 = vld [vmem:[%s6219_s19 + $0x1a0] sm:$0xff]  ;;  %v485_v27 = vld [vmem:[%s6219_s19 + $0x1a8] sm:$0xff] }
  0x3e   : > { %458 = vst [vmem:[%s6224_s25 + $0x68] sm:$0xff] %v457_v13  ;;  %v487_v28 = vld [vmem:[%s6219_s19 + $0x1c0] sm:$0xff]  ;;  %v489_v29 = vld [vmem:[%s6219_s19 + $0x1c8] sm:$0xff] }
  0x3f   : > { %460 = vst [vmem:[%s6224_s25 + $0x70] sm:$0xff] %v459_v14  ;;  %v491_v30 = vld [vmem:[%s6219_s19 + $0x1e0] sm:$0xff]  ;;  %v493_v31 = vld [vmem:[%s6219_s19 + $0x1e8] sm:$0xff] }
  0x40   : > { %462 = vst [vmem:[%s6224_s25 + $0x78] sm:$0xff] %v461_v15  ;;  %v495_v32 = vld [vmem:[%s6219_s19 + $0x200] sm:$0xff]  ;;  %v497_v33 = vld [vmem:[%s6219_s19 + $0x208] sm:$0xff] }
  0x41   : > { %464 = vst [vmem:[%s6224_s25 + $0x80] sm:$0xff] %v463_v16  ;;  %v499_v34 = vld [vmem:[%s6219_s19 + $0x220] sm:$0xff]  ;;  %v501_v35 = vld [vmem:[%s6219_s19 + $0x228] sm:$0xff] }
  0x42   : > { %466 = vst [vmem:[%s6224_s25 + $0x88] sm:$0xff] %v465_v17  ;;  %v503_v36 = vld [vmem:[%s6219_s19 + $0x240] sm:$0xff]  ;;  %v505_v37 = vld [vmem:[%s6219_s19 + $0x248] sm:$0xff] }
  0x43   : > { %468 = vst [vmem:[%s6224_s25 + $0x90] sm:$0xff] %v467_v18  ;;  %v507_v38 = vld [vmem:[%s6219_s19 + $0x260] sm:$0xff]  ;;  %v509_v39 = vld [vmem:[%s6219_s19 + $0x268] sm:$0xff] }
  0x44   : > { %470 = vst [vmem:[%s6224_s25 + $0x98] sm:$0xff] %v469_v19  ;;  %v511_v40 = vld [vmem:[%s6219_s19 + $0x280] sm:$0xff]  ;;  %v513_v41 = vld [vmem:[%s6219_s19 + $0x288] sm:$0xff] }
  0x45   : > { %472 = vst [vmem:[%s6224_s25 + $0xa0] sm:$0xff] %v471_v20  ;;  %v515_v42 = vld [vmem:[%s6219_s19 + $0x2a0] sm:$0xff]  ;;  %v517_v43 = vld [vmem:[%s6219_s19 + $0x2a8] sm:$0xff] }
  0x46   : > { %474 = vst [vmem:[%s6224_s25 + $0xa8] sm:$0xff] %v473_v21  ;;  %v519_v44 = vld [vmem:[%s6219_s19 + $0x2c0] sm:$0xff]  ;;  %v521_v45 = vld [vmem:[%s6219_s19 + $0x2c8] sm:$0xff] }
  0x47   : > { %476 = vst [vmem:[%s6224_s25 + $0xb0] sm:$0xff] %v475_v22  ;;  %v523_v46 = vld [vmem:[%s6219_s19 + $0x2e0] sm:$0xff]  ;;  %v525_v47 = vld [vmem:[%s6219_s19 + $0x2e8] sm:$0xff] }
  0x48   : > { %478 = vst [vmem:[%s6224_s25 + $0xb8] sm:$0xff] %v477_v23  ;;  %v527_v48 = vld [vmem:[%s6219_s19 + $0x300] sm:$0xff]  ;;  %v529_v49 = vld [vmem:[%s6219_s19 + $0x308] sm:$0xff] }
  0x49   : > { %480 = vst [vmem:[%s6224_s25 + $0xc0] sm:$0xff] %v479_v24  ;;  %v531_v50 = vld [vmem:[%s6219_s19 + $0x320] sm:$0xff]  ;;  %v533_v51 = vld [vmem:[%s6219_s19 + $0x328] sm:$0xff] }
  0x4a   : > { %482 = vst [vmem:[%s6224_s25 + $0xc8] sm:$0xff] %v481_v25  ;;  %v535_v52 = vld [vmem:[%s6219_s19 + $0x340] sm:$0xff]  ;;  %v537_v53 = vld [vmem:[%s6219_s19 + $0x348] sm:$0xff] }
  0x4b   : > { %484 = vst [vmem:[%s6224_s25 + $0xd0] sm:$0xff] %v483_v26  ;;  %v539_v54 = vld [vmem:[%s6219_s19 + $0x360] sm:$0xff]  ;;  %v541_v55 = vld [vmem:[%s6219_s19 + $0x368] sm:$0xff] }
  0x4c   : > { %486 = vst [vmem:[%s6224_s25 + $0xd8] sm:$0xff] %v485_v27  ;;  %v543_v56 = vld [vmem:[%s6219_s19 + $0x380] sm:$0xff]  ;;  %v545_v57 = vld [vmem:[%s6219_s19 + $0x388] sm:$0xff] }
  0x4d   : > { %488 = vst [vmem:[%s6224_s25 + $0xe0] sm:$0xff] %v487_v28  ;;  %v547_v58 = vld [vmem:[%s6219_s19 + $0x3a0] sm:$0xff]  ;;  %v549_v59 = vld [vmem:[%s6219_s19 + $0x3a8] sm:$0xff] }
  0x4e   : > { %490 = vst [vmem:[%s6224_s25 + $0xe8] sm:$0xff] %v489_v29  ;;  %v551_v60 = vld [vmem:[%s6219_s19 + $0x3c0] sm:$0xff]  ;;  %v553_v61 = vld [vmem:[%s6219_s19 + $0x3c8] sm:$0xff] }
  0x4f   : > { %492 = vst [vmem:[%s6224_s25 + $0xf0] sm:$0xff] %v491_v30  ;;  %v555_v62 = vld [vmem:[%s6219_s19 + $0x3e0] sm:$0xff]  ;;  %v557_v63 = vld [vmem:[%s6219_s19 + $0x3e8] sm:$0xff] }
  0x50   : > { %494 = vst [vmem:[%s6224_s25 + $0xf8] sm:$0xff] %v493_v31  ;;  %v559_v0 = vld [vmem:[%s6219_s19 + $0x400] sm:$0xff]  ;;  %v561_v1 = vld [vmem:[%s6219_s19 + $0x408] sm:$0xff] }
  0x51   : > { %496 = vst [vmem:[%s6224_s25 + $0x100] sm:$0xff] %v495_v32  ;;  %v563_v2 = vld [vmem:[%s6219_s19 + $0x420] sm:$0xff]  ;;  %v565_v3 = vld [vmem:[%s6219_s19 + $0x428] sm:$0xff] }
  0x52   : > { %498 = vst [vmem:[%s6224_s25 + $0x108] sm:$0xff] %v497_v33  ;;  %v567_v4 = vld [vmem:[%s6219_s19 + $0x440] sm:$0xff]  ;;  %v569_v5 = vld [vmem:[%s6219_s19 + $0x448] sm:$0xff] }
  0x53   : > { %500 = vst [vmem:[%s6224_s25 + $0x110] sm:$0xff] %v499_v34  ;;  %v571_v6 = vld [vmem:[%s6219_s19 + $0x460] sm:$0xff]  ;;  %v573_v7 = vld [vmem:[%s6219_s19 + $0x468] sm:$0xff] }
  0x54   : > { %502 = vst [vmem:[%s6224_s25 + $0x118] sm:$0xff] %v501_v35  ;;  %v575_v8 = vld [vmem:[%s6219_s19 + $0x480] sm:$0xff]  ;;  %v577_v9 = vld [vmem:[%s6219_s19 + $0x488] sm:$0xff] }
  0x55   : > { %504 = vst [vmem:[%s6224_s25 + $0x120] sm:$0xff] %v503_v36  ;;  %v579_v10 = vld [vmem:[%s6219_s19 + $0x4a0] sm:$0xff]  ;;  %v581_v11 = vld [vmem:[%s6219_s19 + $0x4a8] sm:$0xff] }
  0x56   : > { %506 = vst [vmem:[%s6224_s25 + $0x128] sm:$0xff] %v505_v37  ;;  %v583_v12 = vld [vmem:[%s6219_s19 + $0x4c0] sm:$0xff]  ;;  %v585_v13 = vld [vmem:[%s6219_s19 + $0x4c8] sm:$0xff] }
  0x57   : > { %508 = vst [vmem:[%s6224_s25 + $0x130] sm:$0xff] %v507_v38  ;;  %v587_v14 = vld [vmem:[%s6219_s19 + $0x4e0] sm:$0xff]  ;;  %v589_v15 = vld [vmem:[%s6219_s19 + $0x4e8] sm:$0xff] }
  0x58   : > { %510 = vst [vmem:[%s6224_s25 + $0x138] sm:$0xff] %v509_v39  ;;  %v591_v16 = vld [vmem:[%s6219_s19 + $0x500] sm:$0xff]  ;;  %v593_v17 = vld [vmem:[%s6219_s19 + $0x508] sm:$0xff] }
  0x59   : > { %512 = vst [vmem:[%s6224_s25 + $0x140] sm:$0xff] %v511_v40  ;;  %v595_v18 = vld [vmem:[%s6219_s19 + $0x520] sm:$0xff]  ;;  %v597_v19 = vld [vmem:[%s6219_s19 + $0x528] sm:$0xff] }
  0x5a   : > { %514 = vst [vmem:[%s6224_s25 + $0x148] sm:$0xff] %v513_v41  ;;  %v599_v20 = vld [vmem:[%s6219_s19 + $0x540] sm:$0xff]  ;;  %v601_v21 = vld [vmem:[%s6219_s19 + $0x548] sm:$0xff] }
  0x5b   : > { %516 = vst [vmem:[%s6224_s25 + $0x150] sm:$0xff] %v515_v42  ;;  %v603_v22 = vld [vmem:[%s6219_s19 + $0x560] sm:$0xff]  ;;  %v605_v23 = vld [vmem:[%s6219_s19 + $0x568] sm:$0xff] }
  0x5c   : > { %518 = vst [vmem:[%s6224_s25 + $0x158] sm:$0xff] %v517_v43  ;;  %v607_v24 = vld [vmem:[%s6219_s19 + $0x580] sm:$0xff]  ;;  %v609_v25 = vld [vmem:[%s6219_s19 + $0x588] sm:$0xff] }
  0x5d   : > { %520 = vst [vmem:[%s6224_s25 + $0x160] sm:$0xff] %v519_v44  ;;  %v611_v26 = vld [vmem:[%s6219_s19 + $0x5a0] sm:$0xff]  ;;  %v613_v27 = vld [vmem:[%s6219_s19 + $0x5a8] sm:$0xff] }
  0x5e   : > { %522 = vst [vmem:[%s6224_s25 + $0x168] sm:$0xff] %v521_v45  ;;  %v615_v28 = vld [vmem:[%s6219_s19 + $0x5c0] sm:$0xff]  ;;  %v617_v29 = vld [vmem:[%s6219_s19 + $0x5c8] sm:$0xff] }
  0x5f   : > { %524 = vst [vmem:[%s6224_s25 + $0x170] sm:$0xff] %v523_v46  ;;  %v619_v30 = vld [vmem:[%s6219_s19 + $0x5e0] sm:$0xff]  ;;  %v621_v31 = vld [vmem:[%s6219_s19 + $0x5e8] sm:$0xff] }
  0x60   : > { %526 = vst [vmem:[%s6224_s25 + $0x178] sm:$0xff] %v525_v47  ;;  %v623_v32 = vld [vmem:[%s6219_s19 + $0x600] sm:$0xff]  ;;  %v625_v33 = vld [vmem:[%s6219_s19 + $0x608] sm:$0xff] }
  0x61   : > { %528 = vst [vmem:[%s6224_s25 + $0x180] sm:$0xff] %v527_v48  ;;  %v627_v34 = vld [vmem:[%s6219_s19 + $0x620] sm:$0xff]  ;;  %v629_v35 = vld [vmem:[%s6219_s19 + $0x628] sm:$0xff] }
  0x62   : > { %530 = vst [vmem:[%s6224_s25 + $0x188] sm:$0xff] %v529_v49  ;;  %v631_v36 = vld [vmem:[%s6219_s19 + $0x640] sm:$0xff]  ;;  %v633_v37 = vld [vmem:[%s6219_s19 + $0x648] sm:$0xff] }
  0x63   : > { %532 = vst [vmem:[%s6224_s25 + $0x190] sm:$0xff] %v531_v50  ;;  %v635_v38 = vld [vmem:[%s6219_s19 + $0x660] sm:$0xff]  ;;  %v637_v39 = vld [vmem:[%s6219_s19 + $0x668] sm:$0xff] }
  0x64   : > { %534 = vst [vmem:[%s6224_s25 + $0x198] sm:$0xff] %v533_v51  ;;  %v639_v40 = vld [vmem:[%s6219_s19 + $0x680] sm:$0xff]  ;;  %v641_v41 = vld [vmem:[%s6219_s19 + $0x688] sm:$0xff] }
  0x65   : > { %536 = vst [vmem:[%s6224_s25 + $0x1a0] sm:$0xff] %v535_v52  ;;  %v643_v42 = vld [vmem:[%s6219_s19 + $0x6a0] sm:$0xff]  ;;  %v645_v43 = vld [vmem:[%s6219_s19 + $0x6a8] sm:$0xff] }
  0x66   : > { %538 = vst [vmem:[%s6224_s25 + $0x1a8] sm:$0xff] %v537_v53  ;;  %v647_v44 = vld [vmem:[%s6219_s19 + $0x6c0] sm:$0xff]  ;;  %v649_v45 = vld [vmem:[%s6219_s19 + $0x6c8] sm:$0xff] }
  0x67   : > { %540 = vst [vmem:[%s6224_s25 + $0x1b0] sm:$0xff] %v539_v54  ;;  %v651_v46 = vld [vmem:[%s6219_s19 + $0x6e0] sm:$0xff]  ;;  %v653_v47 = vld [vmem:[%s6219_s19 + $0x6e8] sm:$0xff] }
  0x68   : > { %542 = vst [vmem:[%s6224_s25 + $0x1b8] sm:$0xff] %v541_v55  ;;  %v655_v48 = vld [vmem:[%s6219_s19 + $0x700] sm:$0xff]  ;;  %v657_v49 = vld [vmem:[%s6219_s19 + $0x708] sm:$0xff] }
  0x69   : > { %544 = vst [vmem:[%s6224_s25 + $0x1c0] sm:$0xff] %v543_v56  ;;  %v659_v50 = vld [vmem:[%s6219_s19 + $0x720] sm:$0xff]  ;;  %v661_v51 = vld [vmem:[%s6219_s19 + $0x728] sm:$0xff] }
  0x6a   : > { %546 = vst [vmem:[%s6224_s25 + $0x1c8] sm:$0xff] %v545_v57  ;;  %v663_v52 = vld [vmem:[%s6219_s19 + $0x740] sm:$0xff]  ;;  %v665_v53 = vld [vmem:[%s6219_s19 + $0x748] sm:$0xff] }
  0x6b   : > { %548 = vst [vmem:[%s6224_s25 + $0x1d0] sm:$0xff] %v547_v58  ;;  %v667_v54 = vld [vmem:[%s6219_s19 + $0x760] sm:$0xff]  ;;  %v669_v55 = vld [vmem:[%s6219_s19 + $0x768] sm:$0xff] }
  0x6c   : > { %550 = vst [vmem:[%s6224_s25 + $0x1d8] sm:$0xff] %v549_v59  ;;  %v671_v56 = vld [vmem:[%s6219_s19 + $0x780] sm:$0xff]  ;;  %v673_v57 = vld [vmem:[%s6219_s19 + $0x788] sm:$0xff] }
  0x6d   : > { %552 = vst [vmem:[%s6224_s25 + $0x1e0] sm:$0xff] %v551_v60  ;;  %v675_v58 = vld [vmem:[%s6219_s19 + $0x7a0] sm:$0xff]  ;;  %v677_v59 = vld [vmem:[%s6219_s19 + $0x7a8] sm:$0xff] }
  0x6e   : > { %554 = vst [vmem:[%s6224_s25 + $0x1e8] sm:$0xff] %v553_v61  ;;  %v679_v60 = vld [vmem:[%s6219_s19 + $0x7c0] sm:$0xff]  ;;  %v681_v61 = vld [vmem:[%s6219_s19 + $0x7c8] sm:$0xff] }
  0x6f   : > { %556 = vst [vmem:[%s6224_s25 + $0x1f0] sm:$0xff] %v555_v62  ;;  %v683_v62 = vld [vmem:[%s6219_s19 + $0x7e0] sm:$0xff] }
  0x70   : > { %558 = vst [vmem:[%s6224_s25 + $0x1f8] sm:$0xff] %v557_v63  ;;  %v685_v63 = vld [vmem:[%s6219_s19 + $0x7e8] sm:$0xff] }
  0x71   : > { %560 = vst [vmem:[%s6224_s25 + $0x200] sm:$0xff] %v559_v0 }
  0x72   : > { %562 = vst [vmem:[%s6224_s25 + $0x208] sm:$0xff] %v561_v1 }
  0x73   : > { %564 = vst [vmem:[%s6224_s25 + $0x210] sm:$0xff] %v563_v2 }
  0x74   : > { %566 = vst [vmem:[%s6224_s25 + $0x218] sm:$0xff] %v565_v3 }
  0x75   : > { %568 = vst [vmem:[%s6224_s25 + $0x220] sm:$0xff] %v567_v4 }
  0x76   : > { %570 = vst [vmem:[%s6224_s25 + $0x228] sm:$0xff] %v569_v5 }
  0x77   : > { %572 = vst [vmem:[%s6224_s25 + $0x230] sm:$0xff] %v571_v6 }
  0x78   : > { %574 = vst [vmem:[%s6224_s25 + $0x238] sm:$0xff] %v573_v7 }
  0x79   : > { %576 = vst [vmem:[%s6224_s25 + $0x240] sm:$0xff] %v575_v8 }
  0x7a   : > { %578 = vst [vmem:[%s6224_s25 + $0x248] sm:$0xff] %v577_v9 }
  0x7b   : > { %580 = vst [vmem:[%s6224_s25 + $0x250] sm:$0xff] %v579_v10 }
  0x7c   : > { %582 = vst [vmem:[%s6224_s25 + $0x258] sm:$0xff] %v581_v11 }
  0x7d   : > { %584 = vst [vmem:[%s6224_s25 + $0x260] sm:$0xff] %v583_v12 }
  0x7e   : > { %586 = vst [vmem:[%s6224_s25 + $0x268] sm:$0xff] %v585_v13 }
  0x7f   : > { %588 = vst [vmem:[%s6224_s25 + $0x270] sm:$0xff] %v587_v14 }
  0x80   : > { %590 = vst [vmem:[%s6224_s25 + $0x278] sm:$0xff] %v589_v15 }
  0x81   : > { %592 = vst [vmem:[%s6224_s25 + $0x280] sm:$0xff] %v591_v16 }
  0x82   : > { %594 = vst [vmem:[%s6224_s25 + $0x288] sm:$0xff] %v593_v17 }
  0x83   : > { %596 = vst [vmem:[%s6224_s25 + $0x290] sm:$0xff] %v595_v18 }
  0x84   : > { %598 = vst [vmem:[%s6224_s25 + $0x298] sm:$0xff] %v597_v19 }
  0x85   : > { %600 = vst [vmem:[%s6224_s25 + $0x2a0] sm:$0xff] %v599_v20 }
  0x86   : > { %602 = vst [vmem:[%s6224_s25 + $0x2a8] sm:$0xff] %v601_v21 }
  0x87   : > { %604 = vst [vmem:[%s6224_s25 + $0x2b0] sm:$0xff] %v603_v22 }
  0x88   : > { %606 = vst [vmem:[%s6224_s25 + $0x2b8] sm:$0xff] %v605_v23 }
  0x89   : > { %608 = vst [vmem:[%s6224_s25 + $0x2c0] sm:$0xff] %v607_v24 }
  0x8a   : > { %610 = vst [vmem:[%s6224_s25 + $0x2c8] sm:$0xff] %v609_v25 }
  0x8b   : > { %612 = vst [vmem:[%s6224_s25 + $0x2d0] sm:$0xff] %v611_v26 }
  0x8c   : > { %614 = vst [vmem:[%s6224_s25 + $0x2d8] sm:$0xff] %v613_v27 }
  0x8d   : > { %616 = vst [vmem:[%s6224_s25 + $0x2e0] sm:$0xff] %v615_v28 }
  0x8e   : > { %618 = vst [vmem:[%s6224_s25 + $0x2e8] sm:$0xff] %v617_v29 }
  0x8f   : > { %620 = vst [vmem:[%s6224_s25 + $0x2f0] sm:$0xff] %v619_v30 }
  0x90   : > { %622 = vst [vmem:[%s6224_s25 + $0x2f8] sm:$0xff] %v621_v31 }
  0x91   : > { %624 = vst [vmem:[%s6224_s25 + $0x300] sm:$0xff] %v623_v32 }
  0x92   : > { %626 = vst [vmem:[%s6224_s25 + $0x308] sm:$0xff] %v625_v33 }
  0x93   : > { %628 = vst [vmem:[%s6224_s25 + $0x310] sm:$0xff] %v627_v34 }
  0x94   : > { %630 = vst [vmem:[%s6224_s25 + $0x318] sm:$0xff] %v629_v35 }
  0x95   : > { %632 = vst [vmem:[%s6224_s25 + $0x320] sm:$0xff] %v631_v36 }
  0x96   : > { %634 = vst [vmem:[%s6224_s25 + $0x328] sm:$0xff] %v633_v37 }
  0x97   : > { %636 = vst [vmem:[%s6224_s25 + $0x330] sm:$0xff] %v635_v38 }
  0x98   : > { %638 = vst [vmem:[%s6224_s25 + $0x338] sm:$0xff] %v637_v39 }
  0x99   : > { %640 = vst [vmem:[%s6224_s25 + $0x340] sm:$0xff] %v639_v40 }
  0x9a   : > { %642 = vst [vmem:[%s6224_s25 + $0x348] sm:$0xff] %v641_v41 }
  0x9b   : > { %644 = vst [vmem:[%s6224_s25 + $0x350] sm:$0xff] %v643_v42 }
  0x9c   : > { %646 = vst [vmem:[%s6224_s25 + $0x358] sm:$0xff] %v645_v43 }
  0x9d   : > { %648 = vst [vmem:[%s6224_s25 + $0x360] sm:$0xff] %v647_v44 }
  0x9e   : > { %650 = vst [vmem:[%s6224_s25 + $0x368] sm:$0xff] %v649_v45 }
  0x9f   : > { %652 = vst [vmem:[%s6224_s25 + $0x370] sm:$0xff] %v651_v46 }
  0xa0   : > { %654 = vst [vmem:[%s6224_s25 + $0x378] sm:$0xff] %v653_v47 }
  0xa1   : > { %656 = vst [vmem:[%s6224_s25 + $0x380] sm:$0xff] %v655_v48 }
  0xa2   : > { %658 = vst [vmem:[%s6224_s25 + $0x388] sm:$0xff] %v657_v49 }
  0xa3   : > { %660 = vst [vmem:[%s6224_s25 + $0x390] sm:$0xff] %v659_v50 }
  0xa4   : > { %662 = vst [vmem:[%s6224_s25 + $0x398] sm:$0xff] %v661_v51 }
  0xa5   : > { %664 = vst [vmem:[%s6224_s25 + $0x3a0] sm:$0xff] %v663_v52 }
  0xa6   : > { %666 = vst [vmem:[%s6224_s25 + $0x3a8] sm:$0xff] %v665_v53 }
  0xa7   : > { %668 = vst [vmem:[%s6224_s25 + $0x3b0] sm:$0xff] %v667_v54 }
  0xa8   : > { %670 = vst [vmem:[%s6224_s25 + $0x3b8] sm:$0xff] %v669_v55 }
  0xa9   : > { %672 = vst [vmem:[%s6224_s25 + $0x3c0] sm:$0xff] %v671_v56 }
  0xaa   : > { %674 = vst [vmem:[%s6224_s25 + $0x3c8] sm:$0xff] %v673_v57 }
  0xab   : > { %676 = vst [vmem:[%s6224_s25 + $0x3d0] sm:$0xff] %v675_v58 }
  0xac   : > { %678 = vst [vmem:[%s6224_s25 + $0x3d8] sm:$0xff] %v677_v59 }
  0xad   : > { %680 = vst [vmem:[%s6224_s25 + $0x3e0] sm:$0xff] %v679_v60 }
  0xae   : > { %682 = vst [vmem:[%s6224_s25 + $0x3e8] sm:$0xff] %v681_v61 }
  0xaf   : > { %684 = vst [vmem:[%s6224_s25 + $0x3f0] sm:$0xff] %v683_v62 }
  0xb0   : > { %686 = vst [vmem:[%s6224_s25 + $0x3f8] sm:$0xff] %v685_v63 }
  0xb1 PF: > { %p4477_p1 = scmp.ge.s32.totalorder %s6039_s10, 1  ;;  %p699_p2 = scmp.lt.s32.totalorder %s6039_s10, 5 }
  0xb3   : > { %p700_p3 = pnand %p4477_p1, %p699_p2 }
  0xb5   : > { %703 = sbr.rel (%p700_p3) target bundleno = 1806 (0x70e), region = 83 }
  0xba   : > { %s706_s5 = sand.u32 1, %s6015_s30   ;;  %s8734_s22 = sand.u32 1, %s6007_s28  }
  0xbb   : > { %s4478_s19 = sshll.u32 %s706_s5, 10  ;;  %s4479_s21 = sshll.u32 %s706_s5, 9 }
  0xbc   : > { %s4480_s4 = sshll.u32 %s8734_s22, 1  ;;  %p768_p4 = scmp.lt.s32.totalorder %s6027_s16, 1 }
  0xbd   : > { %s6487_s20 = sshll.u32 %s6023_s15, 2  ;;  %s6502_s2 = scalar_lea.vmem [#allocation4], %s4478_s19 }
  0xbe   : > { %s769_s24 = scalar_select %p768_p4, %s6027_s16, 1 }
  0xbf   : > { %p777_p5 = scmp.lt.s32.totalorder %s6487_s20, 7  ;;  %s6504_s27 = scalar_lea.vmem [#allocation5], %s4479_s21 }
  0xc0   : > { %s5556_s26 = sshll.u32 %s769_s24, 6  ;;  %s4484_s18 = sshll.u32 %s769_s24, 3 }
  0xc1   : > { %s6494_s0 = scalar_lea.vmem %s8711_s1, %s5556_s26  ;;  %s6506_s10 = scalar_lea.vmem [#allocation6], %s4480_s4 }
  0xc2   : > { %s778_s30 = scalar_select %p777_p5, %s6487_s20, 7 }
  0xc3   : > { %p4486_p6 = scmp.ne.s32.totalorder %s6023_s15, 0 }
  0xc4   : > { %s780_s17 = sadd.s32 %s4484_s18, %s778_s30  ;;  %s1589_s4 = sld [smem:[#allocation3]] (!%p4486_p6) }
  0xc5   : > { %s4485_s14 = sshll.u32 %s780_s17, 1  ;;  %787 = sbr.rel (%p4486_p6) target bundleno = 554 (0x22a), region = 91 }
  0xc6   : > { %s6500_s22 = scalar_lea.vmem %s8723_s13, %s4485_s14 }
  0xca   : > { %v4545_v0 = vld [vmem:[%s8716_s6 + $0x70] sm:$0xf]  ;;  %v5572_v1 = vld [vmem:[%s8716_s6 + $0x74] sm:$0xf0]  ;;  %v4537_v11 = vld [vmem:[%s8716_s6 + $0x60] sm:$0xf] }
  0xcb   : > { %v4609_v2 = vld [vmem:[%s8716_s6 + $0xf0] sm:$0xf]  ;;  %v4546_v3 = vor.u32 %v5572_v1, %v4545_v0  ;;  %v5588_v4 = vld [vmem:[%s8716_s6 + $0xf4] sm:$0xf0]  ;;  %v5570_v13 = vld [vmem:[%s8716_s6 + $0x64] sm:$0xf0] }
  0xcc   : > { %v4673_v5 = vld [vmem:[%s8716_s6 + $0x170] sm:$0xf]  ;;  %v5604_v6 = vld [vmem:[%s8716_s6 + $0x174] sm:$0xf0]  ;;  %v4610_v7 = vor.u32 %v5588_v4, %v4609_v2  ;;  %v4601_v14 = vld [vmem:[%s8716_s6 + $0xe0] sm:$0xf]  ;;  %v4538_v16 = vor.u32 %v5570_v13, %v4537_v11 }
  0xcd   : > { %v4674_v8 = vor.u32 %v5604_v6, %v4673_v5  ;;  %v4737_v9 = vld [vmem:[%s8716_s6 + $0x1f0] sm:$0xf]  ;;  %v5620_v10 = vld [vmem:[%s8716_s6 + $0x1f4] sm:$0xf0]  ;;  %1218 = vmatpush.bf16.msra.mxu0 %v4546_v3  ;;  %v5586_v15 = vld [vmem:[%s8716_s6 + $0xe4] sm:$0xf0] }
  0xce   : > { %v4738_v12 = vor.u32 %v5620_v10, %v4737_v9  ;;  %1231 = vmatpush.bf16.msra.mxu1 %v4610_v7  ;;  %v4602_v17 = vor.u32 %v5586_v15, %v4601_v14  ;;  %v4665_v18 = vld [vmem:[%s8716_s6 + $0x160] sm:$0xf]  ;;  %v5602_v19 = vld [vmem:[%s8716_s6 + $0x164] sm:$0xf0]  ;;  %v4529_v23 = vld [vmem:[%s8716_s6 + $0x50] sm:$0xf] }
  0xcf   : > { %1244 = vmatpush.bf16.msra.mxu2 %v4674_v8  ;;  %v4729_v20 = vld [vmem:[%s8716_s6 + $0x1e0] sm:$0xf]  ;;  %v4666_v21 = vor.u32 %v5602_v19, %v4665_v18  ;;  %v5618_v22 = vld [vmem:[%s8716_s6 + $0x1e4] sm:$0xf0]  ;;  %v5568_v24 = vld [vmem:[%s8716_s6 + $0x54] sm:$0xf0] }
  0xd0   : > { %1257 = vmatpush.bf16.msra.mxu3 %v4738_v12  ;;  %v4730_v25 = vor.u32 %v5618_v22, %v4729_v20  ;;  %v4593_v26 = vld [vmem:[%s8716_s6 + $0xd0] sm:$0xf]  ;;  %v5584_v27 = vld [vmem:[%s8716_s6 + $0xd4] sm:$0xf0]  ;;  %v4530_v29 = vor.u32 %v5568_v24, %v4529_v23  ;;  %v4521_v35 = vld [vmem:[%s8716_s6 + $0x40] sm:$0xf] }
  0xd1   : > { %v4657_v28 = vld [vmem:[%s8716_s6 + $0x150] sm:$0xf]  ;;  %1219 = vmatpush.bf16.msra.mxu0 %v4538_v16  ;;  %v5600_v30 = vld [vmem:[%s8716_s6 + $0x154] sm:$0xf0]  ;;  %v4594_v33 = vor.u32 %v5584_v27, %v4593_v26  ;;  %v5566_v36 = vld [vmem:[%s8716_s6 + $0x44] sm:$0xf0] }
  0xd2   : > { %v4721_v31 = vld [vmem:[%s8716_s6 + $0x1d0] sm:$0xf]  ;;  %v5616_v32 = vld [vmem:[%s8716_s6 + $0x1d4] sm:$0xf0]  ;;  %1232 = vmatpush.bf16.msra.mxu1 %v4602_v17  ;;  %v4658_v34 = vor.u32 %v5600_v30, %v4657_v28  ;;  %v4585_v37 = vld [vmem:[%s8716_s6 + $0xc0] sm:$0xf]  ;;  %v4522_v44 = vor.u32 %v5566_v36, %v4521_v35 }
  0xd3   : > { %1245 = vmatpush.bf16.msra.mxu2 %v4666_v21  ;;  %v4722_v38 = vor.u32 %v5616_v32, %v4721_v31  ;;  %v5582_v39 = vld [vmem:[%s8716_s6 + $0xc4] sm:$0xf0]  ;;  %v4649_v40 = vld [vmem:[%s8716_s6 + $0x140] sm:$0xf]  ;;  %v4513_v47 = vld [vmem:[%s8716_s6 + $0x30] sm:$0xf] }
  0xd4   : > { %1258 = vmatpush.bf16.msra.mxu3 %v4730_v25  ;;  %v5598_v41 = vld [vmem:[%s8716_s6 + $0x144] sm:$0xf0]  ;;  %v4713_v42 = vld [vmem:[%s8716_s6 + $0x1c0] sm:$0xf]  ;;  %v4586_v45 = vor.u32 %v5582_v39, %v4585_v37  ;;  %v5564_v48 = vld [vmem:[%s8716_s6 + $0x34] sm:$0xf0] }
  0xd5   : > { %v5614_v43 = vld [vmem:[%s8716_s6 + $0x1c4] sm:$0xf0]  ;;  %1220 = vmatpush.bf16.msra.mxu0 %v4530_v29  ;;  %v4650_v46 = vor.u32 %v5598_v41, %v4649_v40  ;;  %v4577_v49 = vld [vmem:[%s8716_s6 + $0xb0] sm:$0xf]  ;;  %v5580_v51 = vld [vmem:[%s8716_s6 + $0xb4] sm:$0xf0]  ;;  %v4514_v56 = vor.u32 %v5564_v48, %v4513_v47 }
  0xd6   : > { %1233 = vmatpush.bf16.msra.mxu1 %v4594_v33  ;;  %v4714_v50 = vor.u32 %v5614_v43, %v4713_v42  ;;  %v4641_v52 = vld [vmem:[%s8716_s6 + $0x130] sm:$0xf]  ;;  %v5596_v53 = vld [vmem:[%s8716_s6 + $0x134] sm:$0xf0]  ;;  %v4578_v57 = vor.u32 %v5580_v51, %v4577_v49  ;;  %v4505_v59 = vld [vmem:[%s8716_s6 + $0x20] sm:$0xf] }
  0xd7   : > { %1246 = vmatpush.bf16.msra.mxu2 %v4658_v34  ;;  %v4705_v54 = vld [vmem:[%s8716_s6 + $0x1b0] sm:$0xf]  ;;  %v5612_v55 = vld [vmem:[%s8716_s6 + $0x1b4] sm:$0xf0]  ;;  %v4642_v58 = vor.u32 %v5596_v53, %v4641_v52  ;;  %v5562_v60 = vld [vmem:[%s8716_s6 + $0x24] sm:$0xf0] }
  0xd8   : > { %1259 = vmatpush.bf16.msra.mxu3 %v4722_v38  ;;  %v4569_v61 = vld [vmem:[%s8716_s6 + $0xa0] sm:$0xf]  ;;  %v4706_v62 = vor.u32 %v5612_v55, %v4705_v54  ;;  %v5578_v63 = vld [vmem:[%s8716_s6 + $0xa4] sm:$0xf0]  ;;  %v4506_v4 = vor.u32 %v5562_v60, %v4505_v59  ;;  %v4497_v5 = vld [vmem:[%s8716_s6 + $0x10] sm:$0xf] }
  0xd9   : > { %1221 = vmatpush.bf16.msra.mxu0 %v4522_v44  ;;  %v4633_v0 = vld [vmem:[%s8716_s6 + $0x120] sm:$0xf]  ;;  %v5594_v1 = vld [vmem:[%s8716_s6 + $0x124] sm:$0xf0]  ;;  %v4570_v6 = vor.u32 %v5578_v63, %v4569_v61  ;;  %v5560_v8 = vld [vmem:[%s8716_s6 + $0x14] sm:$0xf0] }
  0xda   : > { %1234 = vmatpush.bf16.msra.mxu1 %v4586_v45  ;;  %v4697_v2 = vld [vmem:[%s8716_s6 + $0x1a0] sm:$0xf]  ;;  %v5610_v3 = vld [vmem:[%s8716_s6 + $0x1a4] sm:$0xf0]  ;;  %v4634_v7 = vor.u32 %v5594_v1, %v4633_v0  ;;  %v4561_v9 = vld [vmem:[%s8716_s6 + $0x90] sm:$0xf]  ;;  %v4498_v18 = vor.u32 %v5560_v8, %v4497_v5 }
  0xdb   : > { %1247 = vmatpush.bf16.msra.mxu2 %v4650_v46  ;;  %v5576_v10 = vld [vmem:[%s8716_s6 + $0x94] sm:$0xf0]  ;;  %v4698_v11 = vor.u32 %v5610_v3, %v4697_v2  ;;  %v4625_v12 = vld [vmem:[%s8716_s6 + $0x110] sm:$0xf]  ;;  %v4489_v16 = vld [vmem:[%s8716_s6] sm:$0xf] }
  0xdc   : > { %1260 = vmatpush.bf16.msra.mxu3 %v4714_v50  ;;  %v5592_v13 = vld [vmem:[%s8716_s6 + $0x114] sm:$0xf0]  ;;  %v4689_v14 = vld [vmem:[%s8716_s6 + $0x190] sm:$0xf]  ;;  %v5558_v17 = vld [vmem:[%s8716_s6 + $0x4] sm:$0xf0]  ;;  %v4562_v23 = vor.u32 %v5576_v10, %v4561_v9 }
  0xdd   : > { %1222 = vmatpush.bf16.msra.mxu0 %v4514_v56  ;;  %v5608_v15 = vld [vmem:[%s8716_s6 + $0x194] sm:$0xf0]  ;;  %v4553_v19 = vld [vmem:[%s8716_s6 + $0x80] sm:$0xf]  ;;  %v5574_v20 = vld [vmem:[%s8716_s6 + $0x84] sm:$0xf0]  ;;  %v4626_v24 = vor.u32 %v5592_v13, %v4625_v12  ;;  %v4490_v35 = vor.u32 %v5558_v17, %v4489_v16 }
  0xde   : > { %1235 = vmatpush.bf16.msra.mxu1 %v4578_v57  ;;  %v4617_v21 = vld [vmem:[%s8716_s6 + $0x100] sm:$0xf]  ;;  %v5590_v22 = vld [vmem:[%s8716_s6 + $0x104] sm:$0xf0]  ;;  %v5571_v27 = vld [vmem:[%s8716_s6 + $0x74] sm:$0xf]  ;;  %v4690_v28 = vor.u32 %v5608_v15, %v4689_v14  ;;  %v4554_v39 = vor.u32 %v5574_v20, %v4553_v19 }
  0xdf   : > { %1248 = vmatpush.bf16.msra.mxu2 %v4642_v58  ;;  %v4681_v25 = vld [vmem:[%s8716_s6 + $0x180] sm:$0xf]  ;;  %v5606_v26 = vld [vmem:[%s8716_s6 + $0x184] sm:$0xf0]  ;;  %v4547_v29 = vld [vmem:[%s8716_s6 + $0x78] sm:$0xf0]  ;;  %v4618_v40 = vor.u32 %v5590_v22, %v4617_v21 }
  0xe0   : > { %1261 = vmatpush.bf16.msra.mxu3 %v4706_v62  ;;  %v5587_v30 = vld [vmem:[%s8716_s6 + $0xf4] sm:$0xf]  ;;  %v4611_v31 = vld [vmem:[%s8716_s6 + $0xf8] sm:$0xf0]  ;;  %v5569_v41 = vld [vmem:[%s8716_s6 + $0x64] sm:$0xf]  ;;  %v4682_v45 = vor.u32 %v5606_v26, %v4681_v25  ;;  %v4550_v46 = vor.u32 %v5571_v27, %v4547_v29 }
  0xe1   : > { %1223 = vmatpush.bf16.msra.mxu0 %v4506_v4  ;;  %v5603_v32 = vld [vmem:[%s8716_s6 + $0x174] sm:$0xf]  ;;  %v4675_v33 = vld [vmem:[%s8716_s6 + $0x178] sm:$0xf0]  ;;  %v4539_v42 = vld [vmem:[%s8716_s6 + $0x68] sm:$0xf0]  ;;  %v4614_v50 = vor.u32 %v5587_v30, %v4611_v31 }
  0xe2   : > { %1236 = vmatpush.bf16.msra.mxu1 %v4570_v6  ;;  %v790_v34 = vld [vmem:[%s6494_s0 + $0x10] sm:$0xff]  ;;  %v4739_v37 = vld [vmem:[%s8716_s6 + $0x1f8] sm:$0xf0]  ;;  %v5585_v43 = vld [vmem:[%s8716_s6 + $0xe4] sm:$0xf]  ;;  %v4678_v51 = vor.u32 %v5603_v32, %v4675_v33  ;;  %v4542_v3 = vor.u32 %v5569_v41, %v4539_v42  ;;  %vm1579_vm0 = vcmask 1043456  }
  0xe3   : > { %1249 = vmatpush.bf16.msra.mxu2 %v4634_v7  ;;  %v5619_v36 = vld [vmem:[%s8716_s6 + $0x1f4] sm:$0xf]  ;;  %v4603_v47 = vld [vmem:[%s8716_s6 + $0xe8] sm:$0xf0]  ;;  %v5601_v48 = vld [vmem:[%s8716_s6 + $0x164] sm:$0xf] }
  0xe4   : > { %1262 = vmatpush.bf16.msra.mxu3 %v4698_v11  ;;  %v794_v38 = vld [vmem:[%s6494_s0 + $0x30] sm:$0xff]  ;;  %v4667_v49 = vld [vmem:[%s8716_s6 + $0x168] sm:$0xf0]  ;;  %v788_v53 = vld [vmem:[%s6494_s0] sm:$0xff]  ;;  %v4742_v56 = vor.u32 %v5619_v36, %v4739_v37  ;;  %v4606_v4 = vor.u32 %v5585_v43, %v4603_v47 }
  0xe5   : > { %1224 = vmatpush.bf16.msra.mxu0 %v4498_v18  ;;  %v810_v44 = vmax.f32 %v790_v34, %v794_v38  ;;  %v792_v54 = vld [vmem:[%s6494_s0 + $0x20] sm:$0xff]  ;;  %v791_v55 = vld [vmem:[%s6494_s0 + $0x18] sm:$0xff]  ;;  %v789_v59 = vld [vmem:[%s6494_s0 + $0x8] sm:$0xff]  ;;  %v4670_v8 = vor.u32 %v5601_v48, %v4667_v49 }
  0xe6   : > { %1237 = vmatpush.bf16.msra.mxu1 %v4562_v23  ;;  %v796_v57 = vmax.f32 %v788_v53, %v792_v54  ;;  %v795_v58 = vld [vmem:[%s6494_s0 + $0x38] sm:$0xff]  ;;  %v793_v60 = vld [vmem:[%s6494_s0 + $0x28] sm:$0xff]  ;;  %v5617_v61 = vld [vmem:[%s8716_s6 + $0x1e4] sm:$0xf] }
  0xe7   : > { %1250 = vmatpush.bf16.msra.mxu2 %v4626_v24  ;;  %v811_v52 = vrot.slane %v810_v44, 4  ;;  %v4731_v62 = vld [vmem:[%s8716_s6 + $0x1e8] sm:$0xf0]  ;;  %v5567_v0 = vld [vmem:[%s8716_s6 + $0x54] sm:$0xf]  ;;  %v817_v1 = vmax.f32 %v791_v55, %v795_v58  ;;  %v803_v2 = vmax.f32 %v789_v59, %v793_v60 }
  0xe8   : > { %1263 = vmatpush.bf16.msra.mxu3 %v4690_v28  ;;  %v4531_v5 = vld [vmem:[%s8716_s6 + $0x58] sm:$0xf0]  ;;  %v5583_v6 = vld [vmem:[%s8716_s6 + $0xd4] sm:$0xf]  ;;  %v797_v7 = vrot.slane %v796_v57, 4  ;;  %v4734_v13 = vor.u32 %v5617_v61, %v4731_v62 }
  0xe9   : > { %1225 = vmatpush.bf16.msra.mxu0 %v4490_v35  ;;  %v812_v63 = vmax.f32 %v810_v44, %v811_v52  ;;  %v4595_v10 = vld [vmem:[%s8716_s6 + $0xd8] sm:$0xf0]  ;;  %v818_v11 = vrot.slane %v817_v1, 4  ;;  %v804_v12 = vrot.slane %v803_v2, 4  ;;  %v5599_v14 = vld [vmem:[%s8716_s6 + $0x154] sm:$0xf]  ;;  %v4534_v23 = vor.u32 %v5567_v0, %v4531_v5 }
  0xea   : > { %1238 = vmatpush.bf16.msra.mxu1 %v4554_v39  ;;  %v4659_v15 = vld [vmem:[%s8716_s6 + $0x158] sm:$0xf0]  ;;  %v798_v16 = vmax.f32 %v796_v57, %v797_v7  ;;  %v5615_v18 = vld [vmem:[%s8716_s6 + $0x1d4] sm:$0xf]  ;;  %v5565_v22 = vld [vmem:[%s8716_s6 + $0x44] sm:$0xf]  ;;  %v4598_v24 = vor.u32 %v5583_v6, %v4595_v10 }
  0xeb   : > { %1251 = vmatpush.bf16.msra.mxu2 %v4618_v40  ;;  %v813_v9 = vrot.slane %v812_v63, 2  ;;  %v4723_v19 = vld [vmem:[%s8716_s6 + $0x1d8] sm:$0xf0]  ;;  %v819_v20 = vmax.f32 %v817_v1, %v818_v11  ;;  %v805_v21 = vmax.f32 %v803_v2, %v804_v12  ;;  %v4523_v26 = vld [vmem:[%s8716_s6 + $0x48] sm:$0xf0]  ;;  %v4662_v29 = vor.u32 %v5599_v14, %v4659_v15 }
  0xec   : > { %1264 = vmatpush.bf16.msra.mxu3 %v4682_v45  ;;  %v799_v25 = vrot.slane %v798_v16, 2  ;;  %v5581_v27 = vld [vmem:[%s8716_s6 + $0xc4] sm:$0xf]  ;;  %v4587_v32 = vld [vmem:[%s8716_s6 + $0xc8] sm:$0xf0]  ;;  %v4726_v33 = vor.u32 %v5615_v18, %v4723_v19  ;;  %v4526_v43 = vor.u32 %v5565_v22, %v4523_v26 }
  0xed   : > { %1270 = vmatpush.bf16.msrb.mxu0 %v4550_v46  ;;  %v814_v17 = vmax.f32 %v812_v63, %v813_v9  ;;  %v820_v30 = vrot.slane %v819_v20, 2  ;;  %v806_v31 = vrot.slane %v805_v21, 2  ;;  %v5597_v35 = vld [vmem:[%s8716_s6 + $0x144] sm:$0xf]  ;;  %v4651_v36 = vld [vmem:[%s8716_s6 + $0x148] sm:$0xf0]  ;;  %v4590_v44 = vor.u32 %v5581_v27, %v4587_v32 }
  0xee   : > { %1283 = vmatpush.bf16.msrb.mxu1 %v4614_v50  ;;  %v800_v34 = vmax.f32 %v798_v16, %v799_v25  ;;  %v5613_v40 = vld [vmem:[%s8716_s6 + $0x1c4] sm:$0xf]  ;;  %v4715_v41 = vld [vmem:[%s8716_s6 + $0x1c8] sm:$0xf0]  ;;  %v5563_v45 = vld [vmem:[%s8716_s6 + $0x34] sm:$0xf]  ;;  %v4654_v50 = vor.u32 %v5597_v35, %v4651_v36 }
  0xef   : > { %1296 = vmatpush.bf16.msrb.mxu2 %v4678_v51  ;;  %v815_v28 = vrot.slane %v814_v17, 1  ;;  %v821_v38 = vmax.f32 %v819_v20, %v820_v30  ;;  %v807_v39 = vmax.f32 %v805_v21, %v806_v31  ;;  %v4515_v46 = vld [vmem:[%s8716_s6 + $0x38] sm:$0xf0]  ;;  %v5579_v51 = vld [vmem:[%s8716_s6 + $0xb4] sm:$0xf]  ;;  %v4718_v54 = vor.u32 %v5613_v40, %v4715_v41 }
  0xf0   : > { %1309 = vmatpush.bf16.msrb.mxu3 %v4742_v56  ;;  %v801_v42 = vrot.slane %v800_v34, 1  ;;  %v4579_v52 = vld [vmem:[%s8716_s6 + $0xb8] sm:$0xf0]  ;;  %v5595_v55 = vld [vmem:[%s8716_s6 + $0x134] sm:$0xf]  ;;  %v4518_v62 = vor.u32 %v5563_v45, %v4515_v46 }
  0xf1   : > { %1271 = vmatpush.bf16.msrb.mxu0 %v4542_v3  ;;  %v816_v37 = vmax.f32 %v814_v17, %v815_v28  ;;  %v822_v48 = vrot.slane %v821_v38, 1  ;;  %v808_v49 = vrot.slane %v807_v39, 1  ;;  %v4643_v56 = vld [vmem:[%s8716_s6 + $0x138] sm:$0xf0]  ;;  %v5611_v59 = vld [vmem:[%s8716_s6 + $0x1b4] sm:$0xf]  ;;  %v4582_v63 = vor.u32 %v5579_v51, %v4579_v52 }
  0xf2   : > { %1284 = vmatpush.bf16.msrb.mxu1 %v4606_v4  ;;  %v802_v53 = vmax.f32 %v800_v34, %v801_v42  ;;  %v4707_v60 = vld [vmem:[%s8716_s6 + $0x1b8] sm:$0xf0]  ;;  %v4646_v2 = vor.u32 %v5595_v55, %v4643_v56  ;;  %v5561_v3 = vld [vmem:[%s8716_s6 + $0x24] sm:$0xf]  ;;  %v4507_v4 = vld [vmem:[%s8716_s6 + $0x28] sm:$0xf0] }
  0xf3   : > { %1297 = vmatpush.bf16.msrb.mxu2 %v4670_v8  ;;  %v6811_v47 = vpack.c.bf16 %v816_v37, %v816_v37  ;;  %v823_v57 = vmax.f32 %v821_v38, %v822_v48  ;;  %v809_v58 = vmax.f32 %v807_v39, %v808_v49  ;;  %v5577_v5 = vld [vmem:[%s8716_s6 + $0xa4] sm:$0xf]  ;;  %v4710_v6 = vor.u32 %v5611_v59, %v4707_v60  ;;  %v4571_v7 = vld [vmem:[%s8716_s6 + $0xa8] sm:$0xf0]  ;;  %v5559_v15 = vld [vmem:[%s8716_s6 + $0x14] sm:$0xf] }
  0xf4   : > { %1310 = vmatpush.bf16.msrb.mxu3 %v4734_v13  ;;  %v6832_v61 = vpack.c.bf16 %v802_v53, %v802_v53  ;;  %v5593_v8 = vld [vmem:[%s8716_s6 + $0x124] sm:$0xf]  ;;  %v4635_v9 = vld [vmem:[%s8716_s6 + $0x128] sm:$0xf0]  ;;  %v4510_v12 = vor.u32 %v5561_v3, %v4507_v4  ;;  %v4574_v13 = vor.u32 %v5577_v5, %v4571_v7  ;;  %v4499_v16 = vld [vmem:[%s8716_s6 + $0x18] sm:$0xf0] }
  0xf5   : > { %1272 = vmatpush.bf16.msrb.mxu0 %v4534_v23  ;;  %1252 = vmatmul.bf16.vlgmr.msra.gmra.mxu2 %v6811_v47  ;;  %v6834_v0 = vpack.c.bf16 %v823_v57, %v823_v57  ;;  %v6836_v1 = vpack.c.bf16 %v809_v58, %v809_v58  ;;  %v5609_v10 = vld [vmem:[%s8716_s6 + $0x1a4] sm:$0xf]  ;;  %v4699_v11 = vld [vmem:[%s8716_s6 + $0x1a8] sm:$0xf0]  ;;  %v4638_v14 = vor.u32 %v5593_v8, %v4635_v9  ;;  %v5575_v17 = vld [vmem:[%s8716_s6 + $0x94] sm:$0xf] }
  0xf6   : > { %1285 = vmatpush.bf16.msrb.mxu1 %v4598_v24  ;;  %1226 = vmatmul.bf16.vlgmr.msra.gmra.mxu0 %v6832_v61  ;;  %v4702_v18 = vor.u32 %v5609_v10, %v4699_v11  ;;  %v4563_v19 = vld [vmem:[%s8716_s6 + $0x98] sm:$0xf0]  ;;  %v5591_v20 = vld [vmem:[%s8716_s6 + $0x114] sm:$0xf]  ;;  %v4502_v24 = vor.u32 %v5559_v15, %v4499_v16  ;;  %v5557_v25 = vld [vmem:[%s8716_s6 + $0x4] sm:$0xf] }
  0xf7   : > { %1298 = vmatpush.bf16.msrb.mxu2 %v4662_v29  ;;  %1265 = vmatmul.bf16.vlgmr.msra.gmra.mxu3 %v6834_v0  ;;  %v4627_v21 = vld [vmem:[%s8716_s6 + $0x118] sm:$0xf0]  ;;  %v5607_v22 = vld [vmem:[%s8716_s6 + $0x194] sm:$0xf]  ;;  %v4566_v26 = vor.u32 %v5575_v17, %v4563_v19  ;;  %v4491_v28 = vld [vmem:[%s8716_s6 + $0x8] sm:$0xf0] }
  0xf8   : > { %1311 = vmatpush.bf16.msrb.mxu3 %v4726_v33  ;;  %1239 = vmatmul.bf16.vlgmr.msra.gmra.mxu1 %v6836_v1  ;;  %v4691_v23 = vld [vmem:[%s8716_s6 + $0x198] sm:$0xf0]  ;;  %v4630_v27 = vor.u32 %v5591_v20, %v4627_v21  ;;  %v5573_v29 = vld [vmem:[%s8716_s6 + $0x84] sm:$0xf]  ;;  %v4555_v30 = vld [vmem:[%s8716_s6 + $0x88] sm:$0xf0]  ;;  %v4494_v38 = vor.u32 %v5557_v25, %v4491_v28 }
  0xf9   : > { %1273 = vmatpush.bf16.msrb.mxu0 %v4526_v43  ;;  %v4694_v31 = vor.u32 %v5607_v22, %v4691_v23  ;;  %v5589_v32 = vld [vmem:[%s8716_s6 + $0x104] sm:$0xf]  ;;  %v4619_v33 = vld [vmem:[%s8716_s6 + $0x108] sm:$0xf0]  ;;  %v4801_v36 = vld [vmem:[%s8718_s8 + $0x70] sm:$0xf]  ;;  %v4558_v41 = vor.u32 %v5573_v29, %v4555_v30 }
  0xfa   : > { %1286 = vmatpush.bf16.msrb.mxu1 %v4590_v44  ;;  %v5605_v34 = vld [vmem:[%s8716_s6 + $0x184] sm:$0xf]  ;;  %v4683_v35 = vld [vmem:[%s8716_s6 + $0x188] sm:$0xf0]  ;;  %v5636_v37 = vld [vmem:[%s8718_s8 + $0x74] sm:$0xf0]  ;;  %v4622_v42 = vor.u32 %v5589_v32, %v4619_v33 }
  0xfb   : > { %1299 = vmatpush.bf16.msrb.mxu2 %v4654_v50  ;;  %v5635_v39 = vld [vmem:[%s8718_s8 + $0x74] sm:$0xf]  ;;  %v4803_v40 = vld [vmem:[%s8718_s8 + $0x78] sm:$0xf0]  ;;  %v4686_v43 = vor.u32 %v5605_v34, %v4683_v35  ;;  %v4802_v44 = vor.u32 %v5636_v37, %v4801_v36  ;;  %v4793_v46 = vld [vmem:[%s8718_s8 + $0x60] sm:$0xf] }
  0xfc   : > { %1312 = vmatpush.bf16.msrb.mxu3 %v4718_v54  ;;  %v4806_v45 = vor.u32 %v5635_v39, %v4803_v40  ;;  %v5634_v48 = vld [vmem:[%s8718_s8 + $0x64] sm:$0xf0]  ;;  %v5633_v49 = vld [vmem:[%s8718_s8 + $0x64] sm:$0xf]  ;;  %v4795_v50 = vld [vmem:[%s8718_s8 + $0x68] sm:$0xf0] }
  0xfd   : > { %1274 = vmatpush.bf16.msrb.mxu0 %v4518_v62  ;;  %v4794_v51 = vor.u32 %v5634_v48, %v4793_v46  ;;  %v4798_v52 = vor.u32 %v5633_v49, %v4795_v50  ;;  %v4785_v53 = vld [vmem:[%s8718_s8 + $0x50] sm:$0xf]  ;;  %v5632_v54 = vld [vmem:[%s8718_s8 + $0x54] sm:$0xf0]  ;;  %v5631_v55 = vld [vmem:[%s8718_s8 + $0x54] sm:$0xf] }
  0xfe   : > { %1287 = vmatpush.bf16.msrb.mxu1 %v4582_v63  ;;  %v4787_v56 = vld [vmem:[%s8718_s8 + $0x58] sm:$0xf0]  ;;  %v4786_v57 = vor.u32 %v5632_v54, %v4785_v53  ;;  %v4777_v59 = vld [vmem:[%s8718_s8 + $0x40] sm:$0xf]  ;;  %v5629_v60 = vld [vmem:[%s8718_s8 + $0x44] sm:$0xf] }
  0xff   : > { %1300 = vmatpush.bf16.msrb.mxu2 %v4646_v2  ;;  %v4790_v58 = vor.u32 %v5631_v55, %v4787_v56  ;;  %v5627_v2 = vld [vmem:[%s8718_s8 + $0x34] sm:$0xf]  ;;  %v4771_v3 = vld [vmem:[%s8718_s8 + $0x38] sm:$0xf0]  ;;  %v5626_v7 = vld [vmem:[%s8718_s8 + $0x24] sm:$0xf0] }
 0x100   : > { %1313 = vmatpush.bf16.msrb.mxu3 %v4710_v6  ;;  %v4774_v5 = vor.u32 %v5627_v2, %v4771_v3  ;;  %v4761_v6 = vld [vmem:[%s8718_s8 + $0x20] sm:$0xf]  ;;  %v5625_v8 = vld [vmem:[%s8718_s8 + $0x24] sm:$0xf]  ;;  %v4763_v10 = vld [vmem:[%s8718_s8 + $0x28] sm:$0xf0] }
 0x101   : > { %1275 = vmatpush.bf16.msrb.mxu0 %v4510_v12  ;;  %v4762_v9 = vor.u32 %v5626_v7, %v4761_v6  ;;  %v4766_v11 = vor.u32 %v5625_v8, %v4763_v10  ;;  %v4753_v12 = vld [vmem:[%s8718_s8 + $0x10] sm:$0xf]  ;;  %v5652_v16 = vld [vmem:[%s8718_s8 + $0xf4] sm:$0xf0]  ;;  %v5623_v17 = vld [vmem:[%s8718_s8 + $0x14] sm:$0xf] }
 0x102   : > { %1288 = vmatpush.bf16.msrb.mxu1 %v4574_v13  ;;  %v5624_v13 = vld [vmem:[%s8718_s8 + $0x14] sm:$0xf0]  ;;  %v5651_v21 = vld [vmem:[%s8718_s8 + $0xf4] sm:$0xf]  ;;  %v4867_v22 = vld [vmem:[%s8718_s8 + $0xf8] sm:$0xf0] }
 0x103   : > { %1301 = vmatpush.bf16.msrb.mxu2 %v4638_v14  ;;  %v4865_v14 = vld [vmem:[%s8718_s8 + $0xf0] sm:$0xf]  ;;  %v4754_v15 = vor.u32 %v5624_v13, %v4753_v12  ;;  %v4870_v23 = vor.u32 %v5651_v21, %v4867_v22  ;;  %v5622_v25 = vld [vmem:[%s8718_s8 + $0x4] sm:$0xf0]  ;;  %v5621_v29 = vld [vmem:[%s8718_s8 + $0x4] sm:$0xf] }
 0x104   : > { %1314 = vmatpush.bf16.msrb.mxu3 %v4702_v18  ;;  %v4755_v18 = vld [vmem:[%s8718_s8 + $0x18] sm:$0xf0]  ;;  %v4866_v19 = vor.u32 %v5652_v16, %v4865_v14  ;;  %v5650_v28 = vld [vmem:[%s8718_s8 + $0xe4] sm:$0xf0]  ;;  %v4747_v30 = vld [vmem:[%s8718_s8 + $0x8] sm:$0xf0] }
 0x105   : > { %1276 = vmatpush.bf16.msrb.mxu0 %v4502_v24  ;;  %v4758_v20 = vor.u32 %v5623_v17, %v4755_v18  ;;  %v4745_v24 = vld [vmem:[%s8718_s8] sm:$0xf]  ;;  %v4750_v32 = vor.u32 %v5621_v29, %v4747_v30  ;;  %v5649_v33 = vld [vmem:[%s8718_s8 + $0xe4] sm:$0xf]  ;;  %v4859_v34 = vld [vmem:[%s8718_s8 + $0xe8] sm:$0xf0] }
 0x106   : > { %1289 = vmatpush.bf16.msrb.mxu1 %v4566_v26  ;;  %v4857_v26 = vld [vmem:[%s8718_s8 + $0xe0] sm:$0xf]  ;;  %v4862_v35 = vor.u32 %v5649_v33, %v4859_v34  ;;  %v4849_v36 = vld [vmem:[%s8718_s8 + $0xd0] sm:$0xf]  ;;  %v5648_v37 = vld [vmem:[%s8718_s8 + $0xd4] sm:$0xf0] }
 0x107   : > { %1302 = vmatpush.bf16.msrb.mxu2 %v4630_v27  ;;  %v4746_v27 = vor.u32 %v5622_v25, %v4745_v24  ;;  %v4850_v39 = vor.u32 %v5648_v37, %v4849_v36  ;;  %v4851_v40 = vld [vmem:[%s8718_s8 + $0xd8] sm:$0xf0]  ;;  %v4843_v46 = vld [vmem:[%s8718_s8 + $0xc8] sm:$0xf0]  ;;  %v4833_v49 = vld [vmem:[%s8718_s8 + $0xb0] sm:$0xf] }
 0x108   : > { %1315 = vmatpush.bf16.msrb.mxu3 %v4694_v31  ;;  %v4858_v31 = vor.u32 %v5650_v28, %v4857_v26  ;;  %v5644_v50 = vld [vmem:[%s8718_s8 + $0xb4] sm:$0xf0]  ;;  %v4835_v53 = vld [vmem:[%s8718_s8 + $0xb8] sm:$0xf0]  ;;  %v4825_v54 = vld [vmem:[%s8718_s8 + $0xa0] sm:$0xf] }
 0x109   : > { %1277 = vmatpush.bf16.msrb.mxu0 %v4494_v38  ;;  %v5647_v38 = vld [vmem:[%s8718_s8 + $0xd4] sm:$0xf]  ;;  %v5642_v55 = vld [vmem:[%s8718_s8 + $0xa4] sm:$0xf0]  ;;  %v4819_v2 = vld [vmem:[%s8718_s8 + $0x98] sm:$0xf0] }
 0x10a   : > { %1290 = vmatpush.bf16.msrb.mxu1 %v4558_v41  ;;  %v4854_v41 = vor.u32 %v5647_v38, %v4851_v40  ;;  %v5637_v6 = vld [vmem:[%s8718_s8 + $0x84] sm:$0xf] }
 0x10b   : > { %1303 = vmatpush.bf16.msrb.mxu2 %v4622_v42  ;;  %v4841_v42 = vld [vmem:[%s8718_s8 + $0xc0] sm:$0xf] }
 0x10c   : > { %1316 = vmatpush.bf16.msrb.mxu3 %v4686_v43  ;;  %1278 = vmatmul.bf16.vlgmr.msrb.gmra.mxu0 %v6832_v61  ;;  %v4779_v61 = vld [vmem:[%s8718_s8 + $0x48] sm:$0xf0]  ;;  %v5646_v43 = vld [vmem:[%s8718_s8 + $0xc4] sm:$0xf0] }
 0x10d   : > { %1524 = vmatpush.bf16.msra.mxu0 %v4802_v44  ;;  %1291 = vmatmul.bf16.vlgmr.msrb.gmra.mxu1 %v6836_v1  ;;  %v4782_v63 = vor.u32 %v5629_v60, %v4779_v61  ;;  %v5628_v1 = vld [vmem:[%s8718_s8 + $0x34] sm:$0xf0]  ;;  %v5645_v44 = vld [vmem:[%s8718_s8 + $0xc4] sm:$0xf]  ;;  %v892_v60 = vld [vmem:[%s8717_s7] sm:$0x3] }
 0x10e   : > { %1304 = vmatmul.bf16.vlgmr.msrb.gmra.mxu2 %v6811_v47  ;;  %v5630_v47 = vld [vmem:[%s8718_s8 + $0x44] sm:$0xf0]  ;;  %1537 = vmatpush.bf16.msra.mxu1 %v4866_v19  ;;  %v4846_v48 = vor.u32 %v5645_v44, %v4843_v46  ;;  %v4817_v61 = vld [vmem:[%s8718_s8 + $0x90] sm:$0xf] }
 0x10f   : > { %1550 = vmatpush.bf16.msra.mxu2 %v4806_v45  ;;  %1317 = vmatmul.bf16.vlgmr.msrb.gmra.mxu3 %v6834_v0  ;;  %v4778_v62 = vor.u32 %v5630_v47, %v4777_v59  ;;  %v4769_v0 = vld [vmem:[%s8718_s8 + $0x30] sm:$0xf]  ;;  %v4842_v45 = vor.u32 %v5646_v43, %v4841_v42  ;;  %v4826_v59 = vor.u32 %v5642_v55, %v4825_v54  ;;  %v1358_v42 = vld [vmem:[%s8719_s9] sm:$0x3] }
 0x110   : > { %v4770_v4 = vor.u32 %v5628_v1, %v4769_v0  ;;  %1563 = vmatpush.bf16.msra.mxu3 %v4870_v23  ;;  %v1214_v0 = vperm.slane %v892_v60, 0  ;;  %v1215_v23 = vperm.slane %v892_v60, 1  ;;  %v1520_v43 = vperm.slane %v1358_v42, 0 }
 0x111   : > { %1525 = vmatpush.bf16.msra.mxu0 %v4794_v51  ;;  %v5643_v51 = vld [vmem:[%s8718_s8 + $0xb4] sm:$0xf] }
 0x112   : > { %1538 = vmatpush.bf16.msra.mxu1 %v4858_v31  ;;  %v4838_v56 = vor.u32 %v5643_v51, %v4835_v53 }
 0x113   : > { %1551 = vmatpush.bf16.msra.mxu2 %v4798_v52  ;;  %v4834_v52 = vor.u32 %v5644_v50, %v4833_v49  ;;  %v6041_v50 = vmov 1935823168  }
 0x114   : > { %1564 = vmatpush.bf16.msra.mxu3 %v4862_v35  ;;  %v1583_v51 = vunpack.c.l.s4 %v6041_v50 }
 0x115   : > { %1526 = vmatpush.bf16.msra.mxu0 %v4786_v57  ;;  %v5641_v57 = vld [vmem:[%s8718_s8 + $0xa4] sm:$0xf] }
 0x116   : > { %1539 = vmatpush.bf16.msra.mxu1 %v4850_v39  ;;  %v1584_v55 = vunpack.c.0.s8 %v1583_v51 }
 0x117   : > { %1552 = vmatpush.bf16.msra.mxu2 %v4790_v58  ;;  %v4827_v58 = vld [vmem:[%s8718_s8 + $0xa8] sm:$0xf0] }
 0x118   : > { %1565 = vmatpush.bf16.msra.mxu3 %v4854_v41  ;;  %v4830_v47 = vor.u32 %v5641_v57, %v4827_v58 }
 0x119   : > { %1527 = vmatpush.bf16.msra.mxu0 %v4778_v62  ;;  %v5640_v62 = vld [vmem:[%s8718_s8 + $0x94] sm:$0xf0] }
 0x11a   : > { %1540 = vmatpush.bf16.msra.mxu1 %v4842_v45  ;;  %v4818_v1 = vor.u32 %v5640_v62, %v4817_v61 }
 0x11b   : > { %1553 = vmatpush.bf16.msra.mxu2 %v4782_v63  ;;  %v5639_v63 = vld [vmem:[%s8718_s8 + $0x94] sm:$0xf] }
 0x11c   : > { %1566 = vmatpush.bf16.msra.mxu3 %v4846_v48  ;;  %v4822_v3 = vor.u32 %v5639_v63, %v4819_v2  ;;  %v1521_v48 = vperm.slane %v1358_v42, 1 }
 0x11d   : > { %1528 = vmatpush.bf16.msra.mxu0 %v4770_v4  ;;  %v4809_v4 = vld [vmem:[%s8718_s8 + $0x80] sm:$0xf] }
 0x11e   : > { %1541 = vmatpush.bf16.msra.mxu1 %v4834_v52 }
 0x11f   : > { %1554 = vmatpush.bf16.msra.mxu2 %v4774_v5  ;;  %v5638_v5 = vld [vmem:[%s8718_s8 + $0x84] sm:$0xf0] }
 0x120   : > { %1567 = vmatpush.bf16.msra.mxu3 %v4838_v56  ;;  %v4810_v8 = vor.u32 %v5638_v5, %v4809_v4 }
 0x121   : > { %1529 = vmatpush.bf16.msra.mxu0 %v4762_v9  ;;  %v4811_v9 = vld [vmem:[%s8718_s8 + $0x88] sm:$0xf0] }
 0x122   : > { %1542 = vmatpush.bf16.msra.mxu1 %v4826_v59  ;;  %v4814_v12 = vor.u32 %v5637_v6, %v4811_v9  ;;  %v1590_v59 = vstv %s1589_s4 }
 0x123   : > { %1555 = vmatpush.bf16.msra.mxu2 %v4766_v11 }
 0x124   : > { %1568 = vmatpush.bf16.msra.mxu3 %v4830_v47 }
 0x125   : > { %1530 = vmatpush.bf16.msra.mxu0 %v4754_v15 }
 0x126   : > { %1543 = vmatpush.bf16.msra.mxu1 %v4818_v1 }
 0x127   : > { %1556 = vmatpush.bf16.msra.mxu2 %v4758_v20 }
 0x128   : > { %1569 = vmatpush.bf16.msra.mxu3 %v4822_v3 }
 0x129   : > { %1531 = vmatpush.bf16.msra.mxu0 %v4746_v27 }
 0x12a   : > { %1544 = vmatpush.bf16.msra.mxu1 %v4810_v8 }
 0x12b   : > { %1557 = vmatpush.bf16.msra.mxu2 %v4750_v32 }
 0x12c   : > { %1570 = vmatpush.bf16.msra.mxu3 %v4814_v12 }
 0x173   : > { %v1227_v7 = vpop.f32.mrf.mxu0 }
 0x174   : > { %v1228_v10 = vadd.f32 %v1227_v7, %v1214_v0 }
 0x175   : > { %v1240_v11 = vpop.f32.mrf.mxu1 }
 0x176   : > { %v1241_v13 = vadd.f32 %v1240_v11, %v1228_v10 }
 0x178   : > { %v1253_v14 = vpop.f32.mrf.mxu2 }
 0x179   : > { %v1254_v15 = vadd.f32 %v1253_v14, %v1241_v13 }
 0x17a   : > { %v1266_v16 = vpop.f32.mrf.mxu3 }
 0x17b   : > { %v1267_v17 = vadd.f32 %v1266_v16, %v1254_v15  ;;  %v1229_v18 = vpop.f32.mrf.mxu0 }
 0x17d   : > { %v1242_v19 = vpop.f32.mrf.mxu1  ;;  %v1322_v20 = vmax.f32 %v1267_v17, 0.0 }
 0x17f   : > { %v1324_v22 = vpack.c.bf16 %v1322_v20, %v1322_v20 }
 0x180   : > { %v1255_v21 = vpop.f32.mrf.mxu2 }
 0x181   : > { %1532 = vmatmul.bf16.vlgmr.msra.gmra.mxu0 %v1324_v22  ;;  %1558 = vmatmul.bf16.vlgmr.msra.gmra.mxu2 %v1324_v22 }
 0x182   : > { %v1268_v24 = vpop.f32.mrf.mxu3 }
 0x189   : > { %v1279_v25 = vpop.f32.mrf.mxu0 }
 0x18a   : > { %v1280_v26 = vadd.f32 %v1279_v25, %v1215_v23  ;;  %v1292_v27 = vpop.f32.mrf.mxu1 }
 0x18c   : > { %v1293_v28 = vadd.f32 %v1292_v27, %v1280_v26 }
 0x191   : > { %v1305_v29 = vpop.f32.mrf.mxu2  ;;  %v1281_v32 = vpop.f32.mrf.mxu0 }
 0x192   : > { %v1306_v30 = vadd.f32 %v1305_v29, %v1293_v28  ;;  %v1318_v31 = vpop.f32.mrf.mxu3  ;;  %v1294_v33 = vpop.f32.mrf.mxu1 }
 0x194   : > { %v1319_v34 = vadd.f32 %v1318_v31, %v1306_v30 }
 0x196   : > { %v1323_v35 = vmax.f32 %v1319_v34, 0.0 }
 0x198   : > { %v1325_v36 = vpack.c.bf16 %v1323_v35, %v1323_v35 }
 0x199   : > { %v1307_v37 = vpop.f32.mrf.mxu2 }
 0x19a   : > { %v1320_v38 = vpop.f32.mrf.mxu3  ;;  %1545 = vmatmul.bf16.vlgmr.msra.gmra.mxu1 %v1325_v36  ;;  %1571 = vmatmul.bf16.vlgmr.msra.gmra.mxu3 %v1325_v36 }
 0x1fe   : > { %v1533_v39 = vpop.f32.mrf.mxu0 }
 0x1ff   : > { %v1534_v45 = vadd.f32 %v1533_v39, %v1520_v43 }
 0x204   : > { %v1559_v40 = vpop.f32.mrf.mxu2 }
 0x205   : > { %v1560_v52 = vadd.f32 %v1559_v40, %v1521_v48 }
 0x206   : > { %v1535_v41 = vpop.f32.mrf.mxu0 }
 0x20c   : > { %v1561_v44 = vpop.f32.mrf.mxu2 }
 0x217   : > { %v1546_v46 = vpop.f32.mrf.mxu1 }
 0x218   : > { %v1547_v49 = vadd.f32 %v1546_v46, %v1534_v45 }
 0x21a   : > { %1586 = vst [vmem:[%s6506_s10] ss:$2 sm:$0x1] %v1547_v49 }
 0x21d   : > { %v1572_v53 = vpop.f32.mrf.mxu3 }
 0x21e   : > { %v1573_v54 = vadd.f32 %v1572_v53, %v1560_v52 }
 0x21f   : > { %v1548_v56 = vpop.f32.mrf.mxu1 }
 0x220   : > { %v1578_v57 = vrot.slane %v1573_v54, 4  ;;  %4871 = vst [vmem:[%s6506_s10 + $0x1] ss:$2 sm:$0x1] %v1573_v54 }
 0x222   : > { %v1580_v58 = vsel %vm1579_vm0, %v1547_v49, %v1578_v57 }
 0x223   : > { %v1585_v47 = vperm.slane %v1580_v58, %v1584_v55 }
 0x225   : > { %v1591_v60 = vmul.f32 %v1590_v59, %v1585_v47  ;;  %v1574_v61 = vpop.f32.mrf.mxu3 }
 0x227   : > { %v1592_v62 = vpack.c.bf16 %v1591_v60, %v1591_v60 }
 0x229   : > { %1593 = vst [vmem:[#allocation2] sm:$0x1] %v1592_v62 }
 0x22a PF: > { %v5114_v63 = vld [vmem:[%s6502_s2 + $0xe0] sm:$0xf]  ;;  %v5683_v0 = vld [vmem:[%s6502_s2 + $0xec] sm:$0xf0]  ;;  %v6042_v38 = vmov 0   ;;  %v1769_v59 = vld [vmem:[%s8713_s3 + $0x78] sm:$0xff] }
 0x22b   : > { %v5242_v1 = vld [vmem:[%s6502_s2 + $0x1e0] sm:$0xf]  ;;  %v5115_v2 = vor.u32 %v5683_v0, %v5114_v63  ;;  %v5715_v3 = vld [vmem:[%s6502_s2 + $0x1ec] sm:$0xf0]  ;;  %5910 = vset.pattern.permute.xlu0 %v6042_v38  ;;  %5911 = vset.pattern.permute.xlu1 %v6042_v38  ;;  %s8829_s21 = sld [smem:[#allocation54_spill]]  ;;  %s8957_s24 = sand.u32 1, %s6007_s28  }
 0x22c   : > { %v5370_v4 = vld [vmem:[%s6502_s2 + $0x2e0] sm:$0xf]  ;;  %v5747_v5 = vld [vmem:[%s6502_s2 + $0x2ec] sm:$0xf0]  ;;  %v5243_v6 = vor.u32 %v5715_v3, %v5242_v1  ;;  %5912 = vset.pattern.permute.xlu2 %v6042_v38  ;;  %s8893_s18 = sld [smem:[#allocation56_spill]]  ;;  %s8521_s25 = scalar_lea.sflag [#allocation7], %s8957_s24 }
 0x22d   : > { %v5371_v7 = vor.u32 %v5747_v5, %v5370_v4  ;;  %v5498_v8 = vld [vmem:[%s6502_s2 + $0x3e0] sm:$0xf]  ;;  %v5779_v9 = vld [vmem:[%s6502_s2 + $0x3ec] sm:$0xf0]  ;;  %2650 = vmatpush.bf16.msra.mxu0 %v5115_v2  ;;  %s8918_s4 = sld [smem:[#allocation55_spill]]  ;;  %s5551_s30 = sshll.u32 (%p6188_p7), %s6027_s16, 7 }
 0x22e   : > { %v5098_v10 = vld [vmem:[%s6502_s2 + $0xc0] sm:$0xf]  ;;  %v5499_v11 = vor.u32 %v5779_v9, %v5498_v8  ;;  %v5679_v12 = vld [vmem:[%s6502_s2 + $0xcc] sm:$0xf0]  ;;  %2699 = vmatpush.bf16.msra.mxu1 %v5243_v6  ;;  %s4149_s5 = sadd.s32 (%p6188_p7), %s5551_s30, %s6487_s20  ;;  %s8958_s12 = sld [smem:[#allocation57_spill]] (%p6188_p7) }
 0x22f   : > { %v5226_v13 = vld [vmem:[%s6502_s2 + $0x1c0] sm:$0xf]  ;;  %v5711_v14 = vld [vmem:[%s6502_s2 + $0x1cc] sm:$0xf0]  ;;  %2748 = vmatpush.bf16.msra.mxu2 %v5371_v7  ;;  %v5099_v15 = vor.u32 %v5679_v12, %v5098_v10 }
 0x230   : > { %v5227_v16 = vor.u32 %v5711_v14, %v5226_v13  ;;  %v5354_v17 = vld [vmem:[%s6502_s2 + $0x2c0] sm:$0xf]  ;;  %v5743_v18 = vld [vmem:[%s6502_s2 + $0x2cc] sm:$0xf0]  ;;  %2797 = vmatpush.bf16.msra.mxu3 %v5499_v11 }
 0x231   : > { %v5482_v19 = vld [vmem:[%s6502_s2 + $0x3c0] sm:$0xf]  ;;  %v5355_v20 = vor.u32 %v5743_v18, %v5354_v17  ;;  %v5775_v21 = vld [vmem:[%s6502_s2 + $0x3cc] sm:$0xf0]  ;;  %2651 = vmatpush.bf16.msra.mxu0 %v5099_v15 }
 0x232   : > { %v5082_v22 = vld [vmem:[%s6502_s2 + $0xa0] sm:$0xf]  ;;  %v5675_v23 = vld [vmem:[%s6502_s2 + $0xac] sm:$0xf0]  ;;  %v5483_v24 = vor.u32 %v5775_v21, %v5482_v19  ;;  %2700 = vmatpush.bf16.msra.mxu1 %v5227_v16  ;;  %s8894_s19 = smov %s8893_s18 }
 0x233   : > { %v5210_v25 = vld [vmem:[%s6502_s2 + $0x1a0] sm:$0xf]  ;;  %v5707_v26 = vld [vmem:[%s6502_s2 + $0x1ac] sm:$0xf0]  ;;  %v5083_v28 = vor.u32 %v5675_v23, %v5082_v22  ;;  %2749 = vmatpush.bf16.msra.mxu2 %v5355_v20 }
 0x234   : > { %v5338_v27 = vld [vmem:[%s6502_s2 + $0x2a0] sm:$0xf]  ;;  %v5739_v29 = vld [vmem:[%s6502_s2 + $0x2ac] sm:$0xf0]  ;;  %v5211_v32 = vor.u32 %v5707_v26, %v5210_v25  ;;  %2798 = vmatpush.bf16.msra.mxu3 %v5483_v24 }
 0x235   : > { %v5466_v30 = vld [vmem:[%s6502_s2 + $0x3a0] sm:$0xf]  ;;  %v5771_v31 = vld [vmem:[%s6502_s2 + $0x3ac] sm:$0xf0]  ;;  %v5339_v33 = vor.u32 %v5739_v29, %v5338_v27  ;;  %2652 = vmatpush.bf16.msra.mxu0 %v5083_v28 }
 0x236   : > { %v1768_v34 = vld [vmem:[%s8713_s3 + $0x70] sm:$0xff]  ;;  %v5066_v35 = vld [vmem:[%s6502_s2 + $0x80] sm:$0xf]  ;;  %v5467_v37 = vor.u32 %v5771_v31, %v5466_v30  ;;  %2701 = vmatpush.bf16.msra.mxu1 %v5211_v32 }
 0x237   : > { %v5671_v36 = vld [vmem:[%s6502_s2 + $0x8c] sm:$0xf0]  ;;  %v5194_v39 = vld [vmem:[%s6502_s2 + $0x180] sm:$0xf]  ;;  %1842 = vperm.xlu0 %5910, %v1768_v34   ;;  %2750 = vmatpush.bf16.msra.mxu2 %v5339_v33 }
 0x238   : > { %v5703_v40 = vld [vmem:[%s6502_s2 + $0x18c] sm:$0xf0]  ;;  %v5322_v41 = vld [vmem:[%s6502_s2 + $0x280] sm:$0xf]  ;;  %v5067_v45 = vor.u32 %v5671_v36, %v5066_v35  ;;  %2799 = vmatpush.bf16.msra.mxu3 %v5467_v37 }
 0x239   : > { %v5735_v42 = vld [vmem:[%s6502_s2 + $0x28c] sm:$0xf0]  ;;  %v5450_v43 = vld [vmem:[%s6502_s2 + $0x380] sm:$0xf]  ;;  %v5195_v46 = vor.u32 %v5703_v40, %v5194_v39  ;;  %v4882_v40 = vld [vmem:[%s8829_s21 + $0x8] sm:$0xf] }
 0x23a   : > { %v5767_v44 = vld [vmem:[%s6502_s2 + $0x38c] sm:$0xf0]  ;;  %v5323_v48 = vor.u32 %v5735_v42, %v5322_v41  ;;  %v5050_v49 = vld [vmem:[%s6502_s2 + $0x60] sm:$0xf]  ;;  %2653 = vmatpush.bf16.msra.mxu0 %v5067_v45  ;;  %v5784_v41 = vld [vmem:[%s8829_s21 + $0x14] sm:$0xf0] }
 0x23b   : > { %v5667_v50 = vld [vmem:[%s6502_s2 + $0x6c] sm:$0xf0]  ;;  %v5178_v51 = vld [vmem:[%s6502_s2 + $0x160] sm:$0xf]  ;;  %v5451_v52 = vor.u32 %v5767_v44, %v5450_v43  ;;  %2702 = vmatpush.bf16.msra.mxu1 %v5195_v46  ;;  %v5782_v43 = vld [vmem:[%s8829_s21 + $0xc] sm:$0xf] }
 0x23c   : > { %v5699_v53 = vld [vmem:[%s6502_s2 + $0x16c] sm:$0xf0]  ;;  %v5306_v54 = vld [vmem:[%s6502_s2 + $0x260] sm:$0xf]  ;;  %v5051_v58 = vor.u32 %v5667_v50, %v5050_v49  ;;  %2751 = vmatpush.bf16.msra.mxu2 %v5323_v48  ;;  %v4884_v44 = vld [vmem:[%s8829_s21 + $0x18] sm:$0xf0]  ;;  %v7224_v48 = vor.u32 %v5784_v41, %v4882_v40 }
 0x23d   : > { %v5731_v55 = vld [vmem:[%s6502_s2 + $0x26c] sm:$0xf0]  ;;  %v5434_v56 = vld [vmem:[%s6502_s2 + $0x360] sm:$0xf]  ;;  %v5179_v47 = vor.u32 %v5699_v53, %v5178_v51  ;;  %2800 = vmatpush.bf16.msra.mxu3 %v5451_v52  ;;  %v1761_v49 = vld [vmem:[%s8713_s3 + $0x38] sm:$0xff]  ;;  %v7229_v50 = vor.u32 %v5782_v43, %v4884_v44 }
 0x23e   : > { %v5763_v57 = vld [vmem:[%s6502_s2 + $0x36c] sm:$0xf0]  ;;  %v5307_v60 = vor.u32 %v5731_v55, %v5306_v54  ;;  %v5034_v61 = vld [vmem:[%s6502_s2 + $0x40] sm:$0xf]  ;;  %2654 = vmatpush.bf16.msra.mxu0 %v5051_v58  ;;  %v1767_v51 = vld [vmem:[%s8713_s3 + $0x68] sm:$0xff] }
 0x23f   : > { %v5663_v62 = vld [vmem:[%s6502_s2 + $0x4c] sm:$0xf0]  ;;  %v5162_v63 = vld [vmem:[%s6502_s2 + $0x140] sm:$0xf]  ;;  %v5435_v0 = vor.u32 %v5763_v57, %v5434_v56  ;;  %1847 = vperm.xlu0 %5910, %v1769_v59   ;;  %2703 = vmatpush.bf16.msra.mxu1 %v5179_v47  ;;  %v1765_v52 = vld [vmem:[%s8713_s3 + $0x58] sm:$0xff] }
 0x240   : > { %v5695_v1 = vld [vmem:[%s6502_s2 + $0x14c] sm:$0xf0]  ;;  %v5290_v2 = vld [vmem:[%s6502_s2 + $0x240] sm:$0xf]  ;;  %v5035_v6 = vor.u32 %v5663_v62, %v5034_v61  ;;  %2752 = vmatpush.bf16.msra.mxu2 %v5307_v60  ;;  %v1763_v54 = vld [vmem:[%s8713_s3 + $0x48] sm:$0xff] }
 0x241   : > { %v5727_v3 = vld [vmem:[%s6502_s2 + $0x24c] sm:$0xf0]  ;;  %v5418_v4 = vld [vmem:[%s6502_s2 + $0x340] sm:$0xf]  ;;  %v5163_v7 = vor.u32 %v5695_v1, %v5162_v63  ;;  %2801 = vmatpush.bf16.msra.mxu3 %v5435_v0  ;;  %v4898_v47 = vld [vmem:[%s8829_s21 + $0x28] sm:$0xf] }
 0x242   : > { %v5759_v5 = vld [vmem:[%s6502_s2 + $0x34c] sm:$0xf0]  ;;  %v5291_v8 = vor.u32 %v5727_v3, %v5290_v2  ;;  %v5018_v9 = vld [vmem:[%s6502_s2 + $0x20] sm:$0xf]  ;;  %2655 = vmatpush.bf16.msra.mxu0 %v5035_v6  ;;  %v5788_v60 = vld [vmem:[%s8829_s21 + $0x34] sm:$0xf0] }
 0x243   : > { %v5659_v10 = vld [vmem:[%s6502_s2 + $0x2c] sm:$0xf0]  ;;  %v5146_v11 = vld [vmem:[%s6502_s2 + $0x120] sm:$0xf]  ;;  %v5419_v12 = vor.u32 %v5759_v5, %v5418_v4  ;;  %2704 = vmatpush.bf16.msra.mxu1 %v5163_v7  ;;  %v5786_v61 = vld [vmem:[%s8829_s21 + $0x2c] sm:$0xf]  ;;  %v7278_v1 = vor.u32 %v5788_v60, %v4898_v47 }
 0x244   : > { %v5691_v13 = vld [vmem:[%s6502_s2 + $0x12c] sm:$0xf0]  ;;  %v5274_v14 = vld [vmem:[%s6502_s2 + $0x220] sm:$0xf]  ;;  %v5019_v18 = vor.u32 %v5659_v10, %v5018_v9  ;;  %2753 = vmatpush.bf16.msra.mxu2 %v5291_v8  ;;  %v4900_v62 = vld [vmem:[%s8829_s21 + $0x38] sm:$0xf0] }
 0x245   : > { %v5723_v15 = vld [vmem:[%s6502_s2 + $0x22c] sm:$0xf0]  ;;  %v5402_v16 = vld [vmem:[%s6502_s2 + $0x320] sm:$0xf]  ;;  %v5147_v22 = vor.u32 %v5691_v13, %v5146_v11  ;;  %2802 = vmatpush.bf16.msra.mxu3 %v5419_v12  ;;  %8832 = vst [vmem:[#allocation22_spill] sm:$0xff] %v7278_v1  ;;  %v1755_v2 = vld [vmem:[%s8713_s3 + $0x8] sm:$0xff]  ;;  %v7283_v3 = vor.u32 %v5786_v61, %v4900_v62 }
 0x246   : > { %v5755_v17 = vld [vmem:[%s6502_s2 + $0x32c] sm:$0xf0]  ;;  %v1762_v19 = vld [vmem:[%s8713_s3 + $0x40] sm:$0xff]  ;;  %v5275_v23 = vor.u32 %v5723_v15, %v5274_v14  ;;  %2656 = vmatpush.bf16.msra.mxu0 %v5019_v18  ;;  %v1759_v5 = vld [vmem:[%s8713_s3 + $0x28] sm:$0xff] }
 0x247   : > { %v5002_v20 = vld [vmem:[%s6502_s2] sm:$0xf]  ;;  %v5655_v21 = vld [vmem:[%s6502_s2 + $0xc] sm:$0xf0]  ;;  %v5403_v27 = vor.u32 %v5755_v17, %v5402_v16  ;;  %1812 = vperm.xlu0 %5910, %v1762_v19   ;;  %2705 = vmatpush.bf16.msra.mxu1 %v5147_v22  ;;  %8833 = vst [vmem:[#allocation23_spill] sm:$0xff] %v7283_v3  ;;  %v1757_v6 = vld [vmem:[%s8713_s3 + $0x18] sm:$0xff] }
 0x248   : > { %v5130_v24 = vld [vmem:[%s6502_s2 + $0x100] sm:$0xf]  ;;  %v5687_v25 = vld [vmem:[%s6502_s2 + $0x10c] sm:$0xf0]  ;;  %v5003_v33 = vor.u32 %v5655_v21, %v5002_v20  ;;  %2754 = vmatpush.bf16.msra.mxu2 %v5275_v23  ;;  %v4914_v12 = vld [vmem:[%s8829_s21 + $0x48] sm:$0xf] }
 0x249   : > { %v5258_v26 = vld [vmem:[%s6502_s2 + $0x200] sm:$0xf]  ;;  %v5719_v28 = vld [vmem:[%s6502_s2 + $0x20c] sm:$0xf0]  ;;  %v5131_v37 = vor.u32 %v5687_v25, %v5130_v24  ;;  %2803 = vmatpush.bf16.msra.mxu3 %v5403_v27  ;;  %v5792_v13 = vld [vmem:[%s8829_s21 + $0x54] sm:$0xf0] }
 0x24a   : > { %v1766_v29 = vld [vmem:[%s8713_s3 + $0x60] sm:$0xff]  ;;  %v1764_v30 = vld [vmem:[%s8713_s3 + $0x50] sm:$0xff]  ;;  %v5259_v38 = vor.u32 %v5719_v28, %v5258_v26  ;;  %2657 = vmatpush.bf16.msra.mxu0 %v5003_v33  ;;  %v5790_v14 = vld [vmem:[%s8829_s21 + $0x4c] sm:$0xf]  ;;  %v7329_v18 = vor.u32 %v5792_v13, %v4914_v12 }
 0x24b   : > { %v5386_v31 = vld [vmem:[%s6502_s2 + $0x300] sm:$0xf]  ;;  %v5751_v32 = vld [vmem:[%s6502_s2 + $0x30c] sm:$0xf0]  ;;  %1832 = vperm.xlu1 %5911, %v1766_v29   ;;  %1822 = vperm.xlu2 %5912, %v1764_v30   ;;  %v4916_v15 = vld [vmem:[%s8829_s21 + $0x58] sm:$0xf0] }
 0x24c   : > { %v4874_v34 = vld [vmem:[%s8829_s21] sm:$0xf]  ;;  %v5783_v35 = vld [vmem:[%s8829_s21 + $0xc] sm:$0xf0]  ;;  %v5781_v36 = vld [vmem:[%s8829_s21 + $0x4] sm:$0xf]  ;;  %v5387_v42 = vor.u32 %v5751_v32, %v5386_v31  ;;  %2706 = vmatpush.bf16.msra.mxu1 %v5131_v37  ;;  %2755 = vmatpush.bf16.msra.mxu2 %v5259_v38  ;;  %v7331_v19 = vor.u32 %v5790_v14, %v4916_v15 }
 0x24d   : > { %v4876_v39 = vld [vmem:[%s8829_s21 + $0x10] sm:$0xf0]  ;;  %v7220_v45 = vor.u32 %v5783_v35, %v4874_v34  ;;  %v4890_v56 = vld [vmem:[%s8829_s21 + $0x20] sm:$0xf]  ;;  %v5787_v57 = vld [vmem:[%s8829_s21 + $0x2c] sm:$0xf0] }
 0x24e   : > { %v7222_v46 = vor.u32 %v5781_v36, %v4876_v39  ;;  %2804 = vmatpush.bf16.msra.mxu3 %v5387_v42  ;;  %v1756_v53 = vld [vmem:[%s8713_s3 + $0x10] sm:$0xff]  ;;  %v5785_v58 = vld [vmem:[%s8829_s21 + $0x24] sm:$0xf]  ;;  %v7274_v63 = vor.u32 %v5787_v57, %v4890_v56  ;;  %v4906_v8 = vld [vmem:[%s8829_s21 + $0x40] sm:$0xf] }
 0x24f   : > { %2658 = vmatmul.bf16.vlgmr.msra.gmra.mxu0 %v7220_v45  ;;  %1807 = vperm.xlu0 %5910, %v1761_v49   ;;  %v1760_v55 = vld [vmem:[%s8713_s3 + $0x30] sm:$0xff]  ;;  %v1758_v4 = vld [vmem:[%s8713_s3 + $0x20] sm:$0xff]  ;;  %v4930_v24 = vld [vmem:[%s8829_s21 + $0x68] sm:$0xf] }
 0x250   : > { %2707 = vmatmul.bf16.vlgmr.msra.gmra.mxu1 %v7222_v46  ;;  %2756 = vmatmul.bf16.vlgmr.msra.gmra.mxu2 %v7224_v48  ;;  %v4892_v59 = vld [vmem:[%s8829_s21 + $0x30] sm:$0xf0]  ;;  %8830 = vst [vmem:[#allocation20_spill] sm:$0xff] %v7274_v63  ;;  %v1754_v7 = vld [vmem:[%s8713_s3] sm:$0xff]  ;;  %v5791_v9 = vld [vmem:[%s8829_s21 + $0x4c] sm:$0xf0] }
 0x251   : > { %2805 = vmatmul.bf16.vlgmr.msra.gmra.mxu3 %v7229_v50  ;;  %v7276_v0 = vor.u32 %v5785_v58, %v4892_v59  ;;  %v5789_v10 = vld [vmem:[%s8829_s21 + $0x44] sm:$0xf]  ;;  %v4908_v11 = vld [vmem:[%s8829_s21 + $0x50] sm:$0xf0]  ;;  %v7325_v16 = vor.u32 %v5791_v9, %v4906_v8  ;;  %v4922_v20 = vld [vmem:[%s8829_s21 + $0x60] sm:$0xf] }
 0x252   : > { %v7327_v17 = vor.u32 %v5789_v10, %v4908_v11  ;;  %v5795_v21 = vld [vmem:[%s8829_s21 + $0x6c] sm:$0xf0]  ;;  %v5793_v22 = vld [vmem:[%s8829_s21 + $0x64] sm:$0xf]  ;;  %v4924_v23 = vld [vmem:[%s8829_s21 + $0x70] sm:$0xf0] }
 0x253   : > { %1837 = vperm.xlu1 %5911, %v1767_v51   ;;  %1827 = vperm.xlu2 %5912, %v1765_v52   ;;  %8831 = vst [vmem:[#allocation21_spill] sm:$0xff] %v7276_v0  ;;  %v5796_v25 = vld [vmem:[%s8829_s21 + $0x74] sm:$0xf0]  ;;  %v5794_v26 = vld [vmem:[%s8829_s21 + $0x6c] sm:$0xf]  ;;  %v7361_v28 = vor.u32 %v5795_v21, %v4922_v20  ;;  %v7363_v29 = vor.u32 %v5793_v22, %v4924_v23 }
 0x254   : > { %v4932_v27 = vld [vmem:[%s8829_s21 + $0x78] sm:$0xf0]  ;;  %v7365_v30 = vor.u32 %v5796_v25, %v4930_v24  ;;  %v4938_v32 = vld [vmem:[%s8829_s21 + $0x80] sm:$0xf]  ;;  %v5799_v33 = vld [vmem:[%s8829_s21 + $0x8c] sm:$0xf0] }
 0x255   : > { %8834 = vst [vmem:[#allocation24_spill] sm:$0xff] %v7363_v29  ;;  %v7367_v31 = vor.u32 %v5794_v26, %v4932_v27  ;;  %v5797_v34 = vld [vmem:[%s8829_s21 + $0x84] sm:$0xf]  ;;  %v4940_v35 = vld [vmem:[%s8829_s21 + $0x90] sm:$0xf0]  ;;  %v7397_v40 = vor.u32 %v5799_v33, %v4938_v32 }
 0x256   : > { %8835 = vst [vmem:[#allocation25_spill] sm:$0xff] %v7365_v30  ;;  %v4946_v36 = vld [vmem:[%s8829_s21 + $0x88] sm:$0xf]  ;;  %v5800_v37 = vld [vmem:[%s8829_s21 + $0x94] sm:$0xf0]  ;;  %v7399_v41 = vor.u32 %v5797_v34, %v4940_v35 }
 0x257   : > { %1782 = vperm.xlu0 %5910, %v1756_v53   ;;  %8836 = vst [vmem:[#allocation26_spill] sm:$0xff] %v7367_v31  ;;  %v5798_v38 = vld [vmem:[%s8829_s21 + $0x8c] sm:$0xf]  ;;  %v4948_v39 = vld [vmem:[%s8829_s21 + $0x98] sm:$0xf0]  ;;  %v7401_v42 = vor.u32 %v5800_v37, %v4946_v36 }
 0x258   : > { %8837 = vst [vmem:[#allocation27_spill] sm:$0xff] %v7397_v40  ;;  %v7403_v43 = vor.u32 %v5798_v38, %v4948_v39  ;;  %v5681_v44 = vld [vmem:[%s6502_s2 + $0xe4] sm:$0xf]  ;;  %v5116_v49 = vld [vmem:[%s6502_s2 + $0xf0] sm:$0xf0] }
 0x259   : > { %8838 = vst [vmem:[#allocation28_spill] sm:$0xff] %v7399_v41  ;;  %v5713_v51 = vld [vmem:[%s6502_s2 + $0x1e4] sm:$0xf]  ;;  %v5119_v52 = vor.u32 %v5681_v44, %v5116_v49  ;;  %v5244_v53 = vld [vmem:[%s6502_s2 + $0x1f0] sm:$0xf0] }
 0x25a   : > { %8839 = vst [vmem:[#allocation29_spill] sm:$0xff] %v7401_v42  ;;  %v5247_v56 = vor.u32 %v5713_v51, %v5244_v53  ;;  %v5777_v58 = vld [vmem:[%s6502_s2 + $0x3e4] sm:$0xf]  ;;  %v5500_v59 = vld [vmem:[%s6502_s2 + $0x3f0] sm:$0xf0] }
 0x25b   : > { %1817 = vperm.xlu1 %5911, %v1763_v54   ;;  %1802 = vperm.xlu2 %5912, %v1760_v55   ;;  %8840 = vst [vmem:[#allocation30_spill] sm:$0xff] %v7403_v43  ;;  %v5745_v54 = vld [vmem:[%s6502_s2 + $0x2e4] sm:$0xf]  ;;  %v5372_v55 = vld [vmem:[%s6502_s2 + $0x2f0] sm:$0xf0]  ;;  %v5503_v60 = vor.u32 %v5777_v58, %v5500_v59 }
 0x25c   : > { %v5375_v57 = vor.u32 %v5745_v54, %v5372_v55  ;;  %v5677_v47 = vld [vmem:[%s6502_s2 + $0xc4] sm:$0xf]  ;;  %2846 = vmatpush.bf16.msrb.mxu0 %v5119_v52  ;;  %v5100_v61 = vld [vmem:[%s6502_s2 + $0xd0] sm:$0xf0]  ;;  %2895 = vmatpush.bf16.msrb.mxu1 %v5247_v56  ;;  %v4954_v13 = vld [vmem:[%s8829_s21 + $0xa0] sm:$0xf] }
 0x25d   : > { %v5709_v62 = vld [vmem:[%s6502_s2 + $0x1c4] sm:$0xf]  ;;  %2993 = vmatpush.bf16.msrb.mxu3 %v5503_v60  ;;  %v5484_v10 = vld [vmem:[%s6502_s2 + $0x3d0] sm:$0xf0]  ;;  %v5803_v14 = vld [vmem:[%s8829_s21 + $0xac] sm:$0xf0] }
 0x25e   : > { %2944 = vmatpush.bf16.msrb.mxu2 %v5375_v57  ;;  %v5773_v8 = vld [vmem:[%s6502_s2 + $0x3c4] sm:$0xf]  ;;  %v5084_v12 = vld [vmem:[%s6502_s2 + $0xb0] sm:$0xf0]  ;;  %v5802_v37 = vld [vmem:[%s8829_s21 + $0xac] sm:$0xf]  ;;  %v7460_v52 = vor.u32 %v5803_v14, %v4954_v13 }
 0x25f   : > { %2663 = vmatmul.bf16.gmra.mxu0 %v7274_v63  ;;  %1777 = vperm.xlu0 %5910, %v1755_v2   ;;  %v5228_v2 = vld [vmem:[%s6502_s2 + $0x1d0] sm:$0xf0]  ;;  %v5673_v11 = vld [vmem:[%s6502_s2 + $0xa4] sm:$0xf]  ;;  %v5487_v15 = vor.u32 %v5773_v8, %v5484_v10  ;;  %v4964_v38 = vld [vmem:[%s8829_s21 + $0xb8] sm:$0xf0] }
 0x260   : > { %2712 = vmatmul.bf16.gmra.mxu1 %v7276_v0  ;;  %2761 = vmatmul.bf16.gmra.mxu2 %v7278_v1  ;;  %v5705_v20 = vld [vmem:[%s6502_s2 + $0x1a4] sm:$0xf]  ;;  %v5212_v21 = vld [vmem:[%s6502_s2 + $0x1b0] sm:$0xf0]  ;;  %v5087_v23 = vor.u32 %v5673_v11, %v5084_v12  ;;  %8841 = vst [vmem:[#allocation31_spill] sm:$0xff] %v7460_v52 }
 0x261   : > { %2810 = vmatmul.bf16.gmra.mxu3 %v7283_v3  ;;  %v5737_v22 = vld [vmem:[%s6502_s2 + $0x2a4] sm:$0xf]  ;;  %v5340_v24 = vld [vmem:[%s6502_s2 + $0x2b0] sm:$0xf0]  ;;  %v5215_v34 = vor.u32 %v5705_v20, %v5212_v21 }
 0x262   : > { %v5769_v25 = vld [vmem:[%s6502_s2 + $0x3a4] sm:$0xf]  ;;  %v5468_v26 = vld [vmem:[%s6502_s2 + $0x3b0] sm:$0xf0]  ;;  %v5343_v35 = vor.u32 %v5737_v22, %v5340_v24  ;;  %2994 = vmatpush.bf16.msrb.mxu3 %v5487_v15 }
 0x263   : > { %1792 = vperm.xlu1 %5911, %v1758_v4   ;;  %1797 = vperm.xlu2 %5912, %v1759_v5   ;;  %v5103_v4 = vor.u32 %v5677_v47, %v5100_v61  ;;  %v5231_v5 = vor.u32 %v5709_v62, %v5228_v2  ;;  %v5801_v27 = vld [vmem:[%s8829_s21 + $0xa4] sm:$0xf]  ;;  %v4956_v32 = vld [vmem:[%s8829_s21 + $0xb0] sm:$0xf0]  ;;  %v4962_v33 = vld [vmem:[%s8829_s21 + $0xa8] sm:$0xf]  ;;  %v5471_v39 = vor.u32 %v5769_v25, %v5468_v26 }
 0x264   : > { %v5804_v36 = vld [vmem:[%s8829_s21 + $0xb4] sm:$0xf0]  ;;  %v5669_v44 = vld [vmem:[%s6502_s2 + $0x84] sm:$0xf]  ;;  %v7465_v56 = vor.u32 %v5801_v27, %v4956_v32  ;;  %v7471_v47 = vor.u32 %v5802_v37, %v4964_v38 }
 0x265   : > { %2847 = vmatpush.bf16.msrb.mxu0 %v5103_v4  ;;  %2896 = vmatpush.bf16.msrb.mxu1 %v5231_v5  ;;  %v5068_v49 = vld [vmem:[%s6502_s2 + $0x90] sm:$0xf0]  ;;  %v5701_v51 = vld [vmem:[%s6502_s2 + $0x184] sm:$0xf]  ;;  %v7467_v57 = vor.u32 %v5804_v36, %v4962_v33 }
 0x266   : > { %v5196_v53 = vld [vmem:[%s6502_s2 + $0x190] sm:$0xf0]  ;;  %v5733_v54 = vld [vmem:[%s6502_s2 + $0x284] sm:$0xf]  ;;  %8842 = vst [vmem:[#allocation32_spill] sm:$0xff] %v7465_v56  ;;  %2995 = vmatpush.bf16.msrb.mxu3 %v5471_v39  ;;  %v5071_v60 = vor.u32 %v5669_v44, %v5068_v49 }
 0x267   : > { %v5324_v55 = vld [vmem:[%s6502_s2 + $0x290] sm:$0xf0]  ;;  %8843 = vst [vmem:[#allocation33_spill] sm:$0xff] %v7467_v57  ;;  %v5765_v58 = vld [vmem:[%s6502_s2 + $0x384] sm:$0xf]  ;;  %v5199_v61 = vor.u32 %v5701_v51, %v5196_v53 }
 0x268   : > { %v5452_v59 = vld [vmem:[%s6502_s2 + $0x390] sm:$0xf0]  ;;  %8844 = vst [vmem:[#allocation34_spill] sm:$0xff] %v7471_v47  ;;  %v5327_v62 = vor.u32 %v5733_v54, %v5324_v55  ;;  %v5665_v4 = vld [vmem:[%s6502_s2 + $0x64] sm:$0xf] }
 0x269   : > { %2848 = vmatpush.bf16.msrb.mxu0 %v5087_v23  ;;  %2897 = vmatpush.bf16.msrb.mxu1 %v5215_v34  ;;  %v5455_v2 = vor.u32 %v5765_v58, %v5452_v59  ;;  %v5052_v5 = vld [vmem:[%s6502_s2 + $0x70] sm:$0xf0]  ;;  %v5761_v14 = vld [vmem:[%s6502_s2 + $0x364] sm:$0xf]  ;;  %v4970_v34 = vld [vmem:[%s8829_s21 + $0xc0] sm:$0xf] }
 0x26a   : > { %v5180_v8 = vld [vmem:[%s6502_s2 + $0x170] sm:$0xf0]  ;;  %v5661_v20 = vld [vmem:[%s6502_s2 + $0x44] sm:$0xf] }
 0x26b   : > { %1787 = vperm.xlu1 %5911, %v1757_v6   ;;  %1772 = vperm.xlu2 %5912, %v1754_v7   ;;  %v5741_v6 = vld [vmem:[%s6502_s2 + $0x2c4] sm:$0xf]  ;;  %v5356_v7 = vld [vmem:[%s6502_s2 + $0x2d0] sm:$0xf0] }
 0x26c   : > { %v5359_v9 = vor.u32 %v5741_v6, %v5356_v7  ;;  %v5697_v6 = vld [vmem:[%s6502_s2 + $0x164] sm:$0xf]  ;;  %v5055_v7 = vor.u32 %v5665_v4, %v5052_v5  ;;  %v5308_v10 = vld [vmem:[%s6502_s2 + $0x270] sm:$0xf0]  ;;  %2996 = vmatpush.bf16.msrb.mxu3 %v5455_v2  ;;  %v5806_v5 = vld [vmem:[%s8829_s21 + $0xcc] sm:$0xf] }
 0x26d   : > { %2849 = vmatpush.bf16.msrb.mxu0 %v5071_v60  ;;  %2898 = vmatpush.bf16.msrb.mxu1 %v5199_v61  ;;  %v5183_v12 = vor.u32 %v5697_v6, %v5180_v8  ;;  %v5436_v15 = vld [vmem:[%s6502_s2 + $0x370] sm:$0xf0]  ;;  %v5693_v23 = vld [vmem:[%s6502_s2 + $0x144] sm:$0xf]  ;;  %v4980_v6 = vld [vmem:[%s8829_s21 + $0xd8] sm:$0xf0] }
 0x26e   : > { %2945 = vmatpush.bf16.msrb.mxu2 %v5359_v9  ;;  %v5729_v9 = vld [vmem:[%s6502_s2 + $0x264] sm:$0xf]  ;;  %v5439_v21 = vor.u32 %v5761_v14, %v5436_v15  ;;  %v5036_v22 = vld [vmem:[%s6502_s2 + $0x50] sm:$0xf0] }
 0x26f   : > { %2668 = vmatmul.bf16.gmra.mxu0 %v7325_v16  ;;  %v5311_v13 = vor.u32 %v5729_v9, %v5308_v10  ;;  %v5164_v24 = vld [vmem:[%s6502_s2 + $0x150] sm:$0xf0]  ;;  %v5725_v25 = vld [vmem:[%s6502_s2 + $0x244] sm:$0xf]  ;;  %v5039_v32 = vor.u32 %v5661_v20, %v5036_v22 }
 0x270   : > { %2717 = vmatmul.bf16.gmra.mxu1 %v7327_v17  ;;  %2766 = vmatmul.bf16.gmra.mxu2 %v7329_v18  ;;  %v5292_v26 = vld [vmem:[%s6502_s2 + $0x250] sm:$0xf0]  ;;  %v5757_v27 = vld [vmem:[%s6502_s2 + $0x344] sm:$0xf]  ;;  %v5167_v36 = vor.u32 %v5693_v23, %v5164_v24 }
 0x271   : > { %2815 = vmatmul.bf16.gmra.mxu3 %v7331_v19  ;;  %2850 = vmatpush.bf16.msrb.mxu0 %v5055_v7  ;;  %v5420_v33 = vld [vmem:[%s6502_s2 + $0x350] sm:$0xf0]  ;;  %v5295_v37 = vor.u32 %v5725_v25, %v5292_v26  ;;  %v5657_v38 = vld [vmem:[%s6502_s2 + $0x24] sm:$0xf]  ;;  %v7543_v25 = vor.u32 %v5806_v5, %v4980_v6 }
 0x272   : > { %2946 = vmatpush.bf16.msrb.mxu2 %v5343_v35  ;;  %v5807_v35 = vld [vmem:[%s8829_s21 + $0xcc] sm:$0xf0]  ;;  %2899 = vmatpush.bf16.msrb.mxu1 %v5183_v12  ;;  %v5020_v39 = vld [vmem:[%s6502_s2 + $0x30] sm:$0xf0]  ;;  %v5689_v44 = vld [vmem:[%s6502_s2 + $0x124] sm:$0xf]  ;;  %v5423_v49 = vor.u32 %v5757_v27, %v5420_v33 }
 0x273   : > { %2997 = vmatpush.bf16.msrb.mxu3 %v5439_v21  ;;  %v5148_v51 = vld [vmem:[%s6502_s2 + $0x130] sm:$0xf0]  ;;  %v5721_v53 = vld [vmem:[%s6502_s2 + $0x224] sm:$0xf]  ;;  %v5023_v4 = vor.u32 %v5657_v38, %v5020_v39  ;;  %v7529_v9 = vor.u32 %v5807_v35, %v4970_v34  ;;  %8850 = vst [vmem:[#allocation40_spill] sm:$0xff] %v7543_v25 }
 0x274   : > { %v5276_v54 = vld [vmem:[%s6502_s2 + $0x230] sm:$0xf0]  ;;  %v5805_v55 = vld [vmem:[%s8829_s21 + $0xc4] sm:$0xf]  ;;  %v5151_v7 = vor.u32 %v5689_v44, %v5148_v51  ;;  %v4986_v38 = vld [vmem:[%s8829_s21 + $0xe0] sm:$0xf] }
 0x275   : > { %v5753_v58 = vld [vmem:[%s6502_s2 + $0x324] sm:$0xf]  ;;  %v5404_v59 = vld [vmem:[%s6502_s2 + $0x330] sm:$0xf0]  ;;  %2851 = vmatpush.bf16.msrb.mxu0 %v5039_v32  ;;  %v5279_v8 = vor.u32 %v5721_v53, %v5276_v54  ;;  %8847 = vst [vmem:[#allocation37_spill] sm:$0xff] %v7529_v9 }
 0x276   : > { %2947 = vmatpush.bf16.msrb.mxu2 %v5327_v62  ;;  %v4972_v61 = vld [vmem:[%s8829_s21 + $0xd0] sm:$0xf0]  ;;  %v4978_v62 = vld [vmem:[%s8829_s21 + $0xc8] sm:$0xf]  ;;  %v5808_v2 = vld [vmem:[%s8829_s21 + $0xd4] sm:$0xf0]  ;;  %2900 = vmatpush.bf16.msrb.mxu1 %v5167_v36  ;;  %v5407_v10 = vor.u32 %v5753_v58, %v5404_v59 }
 0x277   : > { %2998 = vmatpush.bf16.msrb.mxu3 %v5423_v49  ;;  %v5653_v12 = vld [vmem:[%s6502_s2 + $0x4] sm:$0xf]  ;;  %v7534_v15 = vor.u32 %v5805_v55, %v4972_v61  ;;  %v7536_v20 = vor.u32 %v5808_v2, %v4978_v62  ;;  %v5132_v22 = vld [vmem:[%s6502_s2 + $0x110] sm:$0xf0]  ;;  %v5811_v39 = vld [vmem:[%s8829_s21 + $0xec] sm:$0xf0] }
 0x278   : > { %v5685_v14 = vld [vmem:[%s6502_s2 + $0x104] sm:$0xf]  ;;  %v5260_v24 = vld [vmem:[%s6502_s2 + $0x210] sm:$0xf0]  ;;  %v5810_v55 = vld [vmem:[%s8829_s21 + $0xec] sm:$0xf]  ;;  %v7583_v61 = vor.u32 %v5811_v39, %v4986_v38 }
 0x279   : > { %8848 = vst [vmem:[#allocation38_spill] sm:$0xff] %v7534_v15  ;;  %v5717_v23 = vld [vmem:[%s6502_s2 + $0x204] sm:$0xf]  ;;  %2852 = vmatpush.bf16.msrb.mxu0 %v5023_v4  ;;  %v5388_v32 = vld [vmem:[%s6502_s2 + $0x310] sm:$0xf0]  ;;  %v5135_v33 = vor.u32 %v5685_v14, %v5132_v22 }
 0x27a   : > { %2948 = vmatpush.bf16.msrb.mxu2 %v5311_v13  ;;  %v5004_v13 = vld [vmem:[%s6502_s2 + $0x10] sm:$0xf0]  ;;  %8849 = vst [vmem:[#allocation39_spill] sm:$0xff] %v7536_v20  ;;  %v5749_v27 = vld [vmem:[%s6502_s2 + $0x304] sm:$0xf]  ;;  %2901 = vmatpush.bf16.msrb.mxu1 %v5151_v7  ;;  %v5263_v34 = vor.u32 %v5717_v23, %v5260_v24 }
 0x27b   : > { %v5007_v26 = vor.u32 %v5653_v12, %v5004_v13  ;;  %2999 = vmatpush.bf16.msrb.mxu3 %v5407_v10  ;;  %v5391_v35 = vor.u32 %v5749_v27, %v5388_v32  ;;  %v5809_v44 = vld [vmem:[%s8829_s21 + $0xe4] sm:$0xf]  ;;  %v4988_v51 = vld [vmem:[%s8829_s21 + $0xf0] sm:$0xf0]  ;;  %v4994_v53 = vld [vmem:[%s8829_s21 + $0xe8] sm:$0xf] }
 0x27c   : > { %v5812_v54 = vld [vmem:[%s8829_s21 + $0xf4] sm:$0xf0]  ;;  %v4996_v58 = vld [vmem:[%s8829_s21 + $0xf8] sm:$0xf0]  ;;  %8854 = vst [vmem:[#allocation44_spill] sm:$0xff] %v7583_v61  ;;  %v7585_v62 = vor.u32 %v5809_v44, %v4988_v51 }
 0x27d   : > { %2853 = vmatpush.bf16.msrb.mxu0 %v5007_v26  ;;  %v7587_v2 = vor.u32 %v5812_v54, %v4994_v53  ;;  %v7589_v4 = vor.u32 %v5810_v55, %v4996_v58 }
 0x27e   : > { %2949 = vmatpush.bf16.msrb.mxu2 %v5295_v37  ;;  %2902 = vmatpush.bf16.msrb.mxu1 %v5135_v33  ;;  %8855 = vst [vmem:[#allocation45_spill] sm:$0xff] %v7585_v62 }
 0x27f   : > { %2673 = vmatmul.bf16.gmra.mxu0 %v7361_v28  ;;  %3000 = vmatpush.bf16.msrb.mxu3 %v5391_v35  ;;  %8856 = vst [vmem:[#allocation46_spill] sm:$0xff] %v7587_v2 }
 0x280   : > { %2722 = vmatmul.bf16.gmra.mxu1 %v7363_v29  ;;  %2771 = vmatmul.bf16.gmra.mxu2 %v7365_v30  ;;  %8857 = vst [vmem:[#allocation47_spill] sm:$0xff] %v7589_v4 }
 0x281   : > { %2820 = vmatmul.bf16.gmra.mxu3 %v7367_v31 }
 0x282   : > { %2950 = vmatpush.bf16.msrb.mxu2 %v5279_v8 }
 0x286   : > { %2951 = vmatpush.bf16.msrb.mxu2 %v5263_v34 }
 0x28f   : > { %2678 = vmatmul.bf16.gmra.mxu0 %v7397_v40 }
 0x290   : > { %2727 = vmatmul.bf16.gmra.mxu1 %v7399_v41  ;;  %2776 = vmatmul.bf16.gmra.mxu2 %v7401_v42 }
 0x291   : > { %2825 = vmatmul.bf16.gmra.mxu3 %v7403_v43 }
 0x29f   : > { %2683 = vmatmul.bf16.gmra.mxu0 %v7460_v52 }
 0x2a0   : > { %2732 = vmatmul.bf16.gmra.mxu1 %v7465_v56  ;;  %2781 = vmatmul.bf16.gmra.mxu2 %v7467_v57 }
 0x2a1   : > { %2830 = vmatmul.bf16.gmra.mxu3 %v7471_v47 }
 0x2a5   : > { %v7483_v11 = vpop.permute.xlu2 %1822 }
 0x2a6   : > { %8845 = vst [vmem:[#allocation35_spill] sm:$0xff] %v7483_v11 }
 0x2a9   : > { %v7512_v60 = vpop.permute.xlu0 %1842 }
 0x2aa   : > { %8846 = vst [vmem:[#allocation36_spill] sm:$0xff] %v7512_v60 }
 0x2ad   : > { %v7538_v21 = vpop.permute.xlu2 %1827 }
 0x2af   : > { %2688 = vmatmul.bf16.gmra.mxu0 %v7529_v9 }
 0x2b0   : > { %2737 = vmatmul.bf16.gmra.mxu1 %v7534_v15  ;;  %2786 = vmatmul.bf16.gmra.mxu2 %v7536_v20 }
 0x2b1   : > { %2835 = vmatmul.bf16.gmra.mxu3 %v7543_v25  ;;  %v7551_v36 = vpop.permute.xlu0 %1847 }
 0x2b2   : > { %8851 = vst [vmem:[#allocation41_spill] sm:$0xff] %v7551_v36 }
 0x2b5   : > { %v7553_v37 = vpop.permute.xlu2 %1802 }
 0x2b9   : > { %v7564_v49 = vpop.permute.xlu0 %1812 }
 0x2ba   : > { %8852 = vst [vmem:[#allocation42_spill] sm:$0xff] %v7564_v49 }
 0x2bd   : > { %v7581_v59 = vpop.permute.xlu1 %1832  ;;  %v7594_v5 = vpop.permute.xlu2 %1797 }
 0x2be   : > { %8853 = vst [vmem:[#allocation43_spill] sm:$0xff] %v7581_v59 }
 0x2bf   : > { %2693 = vmatmul.bf16.gmra.mxu0 %v7583_v61  ;;  %8858 = vst [vmem:[#allocation48_spill] sm:$0xff] %v7594_v5 }
 0x2c0   : > { %2742 = vmatmul.bf16.gmra.mxu1 %v7585_v62  ;;  %2791 = vmatmul.bf16.gmra.mxu2 %v7587_v2 }
 0x2c1   : > { %2840 = vmatmul.bf16.gmra.mxu3 %v7589_v4  ;;  %v7597_v6 = vpop.permute.xlu0 %1807 }
 0x2c2   : > { %8859 = vst [vmem:[#allocation49_spill] sm:$0xff] %v7597_v6 }
 0x2c5   : > { %v7599_v7 = vpop.permute.xlu1 %1837  ;;  %v7603_v10 = vpop.permute.xlu2 %1772 }
 0x2c6   : > { %8860 = vst [vmem:[#allocation50_spill] sm:$0xff] %v7599_v7 }
 0x2c9   : > { %v7601_v8 = vpop.permute.xlu0 %1782 }
 0x2cc   : > { %v2659_v12 = vpop.f32.mrf.mxu0 }
 0x2cd   : > { %v2708_v13 = vpop.f32.mrf.mxu1  ;;  %v2660_v14 = vadd.f32 %v2659_v12, %v7603_v10  ;;  %v7606_v22 = vpop.permute.xlu1 %1817 }
 0x2ce   : > { %8861 = vst [vmem:[#allocation51_spill] sm:$0xff] %v7606_v22 }
 0x2cf   : > { %2854 = vmatmul.bf16.vlgmr.msrb.gmra.mxu0 %v7220_v45  ;;  %v2709_v23 = vadd.f32 %v2708_v13, %v2660_v14 }
 0x2d0   : > { %2903 = vmatmul.bf16.vlgmr.msrb.gmra.mxu1 %v7222_v46  ;;  %2952 = vmatmul.bf16.vlgmr.msrb.gmra.mxu2 %v7224_v48 }
 0x2d1   : > { %3001 = vmatmul.bf16.vlgmr.msrb.gmra.mxu3 %v7229_v50  ;;  %v7612_v24 = vpop.permute.xlu0 %1777 }
 0x2d3   : > { %v2757_v26 = vpop.f32.mrf.mxu2 }
 0x2d4   : > { %v2758_v27 = vadd.f32 %v2757_v26, %v2709_v23  ;;  %v2806_v32 = vpop.f32.mrf.mxu3  ;;  %v2661_v33 = vpop.f32.mrf.mxu0 }
 0x2d5   : > { %v2662_v34 = vadd.f32 %v2661_v33, %v7612_v24  ;;  %v2710_v35 = vpop.f32.mrf.mxu1  ;;  %v7615_v44 = vpop.permute.xlu1 %1792 }
 0x2d6   : > { %v2807_v38 = vadd.f32 %v2806_v32, %v2758_v27 }
 0x2d7   : > { %v2711_v39 = vadd.f32 %v2710_v35, %v2662_v34 }
 0x2d8   : > { %v3434_v23 = vmax.f32 %v2807_v38, 0.0 }
 0x2db   : > { %v2759_v51 = vpop.f32.mrf.mxu2 }
 0x2dc   : > { %v2760_v53 = vadd.f32 %v2759_v51, %v2711_v39  ;;  %v2808_v54 = vpop.f32.mrf.mxu3  ;;  %v2664_v55 = vpop.f32.mrf.mxu0 }
 0x2dd   : > { %v2665_v58 = vadd.f32 %v2664_v55, %v7601_v8  ;;  %v2713_v12 = vpop.f32.mrf.mxu1  ;;  %v7622_v27 = vpop.permute.xlu1 %1787 }
 0x2de   : > { %v2809_v13 = vadd.f32 %v2808_v54, %v2760_v53 }
 0x2df   : > { %v2714_v14 = vadd.f32 %v2713_v12, %v2665_v58  ;;  %2859 = vmatmul.bf16.gmra.mxu0 %v7274_v63 }
 0x2e0   : > { %v3438_v26 = vmax.f32 %v2809_v13, 0.0  ;;  %2908 = vmatmul.bf16.gmra.mxu1 %v7276_v0  ;;  %2957 = vmatmul.bf16.gmra.mxu2 %v7278_v1 }
 0x2e1   : > { %3006 = vmatmul.bf16.gmra.mxu3 %v7283_v3 }
 0x2e2   : > { %v7624_v32 = vpack.c.bf16 %v3438_v26, %v3434_v23 }
 0x2e3   : > { %v2762_v33 = vpop.f32.mrf.mxu2 }
 0x2e4   : > { %8862 = vst [vmem:[#allocation52_spill] sm:$0xff] %v7624_v32  ;;  %v2763_v34 = vadd.f32 %v2762_v33, %v2714_v14  ;;  %v2811_v35 = vpop.f32.mrf.mxu3  ;;  %v2666_v39 = vpop.f32.mrf.mxu0 }
 0x2e5   : > { %v2667_v51 = vadd.f32 %v2666_v39, %v7622_v27  ;;  %v2715_v53 = vpop.f32.mrf.mxu1 }
 0x2e6   : > { %v2812_v54 = vadd.f32 %v2811_v35, %v2763_v34 }
 0x2e7   : > { %v2716_v38 = vadd.f32 %v2715_v53, %v2667_v51 }
 0x2e8   : > { %v3442_v14 = vmax.f32 %v2812_v54, 0.0  ;;  %v5684_v54 = vld [vmem:[%s6502_s2 + $0xf4] sm:$0xf0] }
 0x2eb   : > { %v2764_v55 = vpop.f32.mrf.mxu2 }
 0x2ec   : > { %v2765_v58 = vadd.f32 %v2764_v55, %v2716_v38  ;;  %v2813_v12 = vpop.f32.mrf.mxu3  ;;  %v2669_v13 = vpop.f32.mrf.mxu0 }
 0x2ed   : > { %v2670_v1 = vadd.f32 %v2669_v13, %v7615_v44  ;;  %v2718_v3 = vpop.f32.mrf.mxu1 }
 0x2ee   : > { %v2814_v0 = vadd.f32 %v2813_v12, %v2765_v58 }
 0x2ef   : > { %v2719_v63 = vadd.f32 %v2718_v3, %v2670_v1  ;;  %2864 = vmatmul.bf16.gmra.mxu0 %v7325_v16 }
 0x2f0   : > { %v3446_v23 = vmax.f32 %v2814_v0, 0.0  ;;  %2913 = vmatmul.bf16.gmra.mxu1 %v7327_v17  ;;  %2962 = vmatmul.bf16.gmra.mxu2 %v7329_v18  ;;  %v5122_v0 = vld [vmem:[%s6502_s2 + $0xe8] sm:$0xf] }
 0x2f1   : > { %3011 = vmatmul.bf16.gmra.mxu3 %v7331_v19  ;;  %v5123_v38 = vor.u32 %v5684_v54, %v5122_v0 }
 0x2f2   : > { %v7632_v26 = vpack.c.bf16 %v3446_v23, %v3442_v14  ;;  %v5106_v14 = vld [vmem:[%s6502_s2 + $0xc8] sm:$0xf] }
 0x2f3   : > { %v2767_v33 = vpop.f32.mrf.mxu2  ;;  %3042 = vmatpush.bf16.msra.mxu0 %v5123_v38 }
 0x2f4   : > { %v2768_v34 = vadd.f32 %v2767_v33, %v2719_v63  ;;  %v2816_v35 = vpop.f32.mrf.mxu3  ;;  %v2671_v1 = vpop.f32.mrf.mxu0  ;;  %v5680_v63 = vld [vmem:[%s6502_s2 + $0xd4] sm:$0xf0] }
 0x2f5   : > { %v2672_v3 = vadd.f32 %v2671_v1, %v7594_v5  ;;  %v2720_v39 = vpop.f32.mrf.mxu1  ;;  %v5107_v32 = vor.u32 %v5680_v63, %v5106_v14 }
 0x2f6   : > { %v2817_v51 = vadd.f32 %v2816_v35, %v2768_v34 }
 0x2f7   : > { %v2721_v53 = vadd.f32 %v2720_v39, %v2672_v3  ;;  %v5090_v3 = vld [vmem:[%s6502_s2 + $0xa8] sm:$0xf]  ;;  %v5676_v39 = vld [vmem:[%s6502_s2 + $0xb4] sm:$0xf0]  ;;  %3043 = vmatpush.bf16.msra.mxu0 %v5107_v32 }
 0x2f8   : > { %v3450_v34 = vmax.f32 %v2817_v51, 0.0  ;;  %v5074_v51 = vld [vmem:[%s6502_s2 + $0x88] sm:$0xf] }
 0x2f9   : > { %v5058_v32 = vld [vmem:[%s6502_s2 + $0x68] sm:$0xf] }
 0x2fb   : > { %v2769_v55 = vpop.f32.mrf.mxu2 }
 0x2fc   : > { %v2770_v58 = vadd.f32 %v2769_v55, %v2721_v53  ;;  %v2818_v12 = vpop.f32.mrf.mxu3  ;;  %v2674_v13 = vpop.f32.mrf.mxu0  ;;  %v5091_v53 = vor.u32 %v5676_v39, %v5090_v3 }
 0x2fd   : > { %v2675_v23 = vadd.f32 %v2674_v13, %v7553_v37  ;;  %v2723_v33 = vpop.f32.mrf.mxu1 }
 0x2fe   : > { %v2819_v1 = vadd.f32 %v2818_v12, %v2770_v58  ;;  %v5672_v12 = vld [vmem:[%s6502_s2 + $0x94] sm:$0xf0]  ;;  %3044 = vmatpush.bf16.msra.mxu0 %v5091_v53 }
 0x2ff   : > { %v2724_v5 = vadd.f32 %v2723_v33, %v2675_v23  ;;  %2869 = vmatmul.bf16.gmra.mxu0 %v7361_v28  ;;  %v5075_v63 = vor.u32 %v5672_v12, %v5074_v51  ;;  %v5250_v12 = vld [vmem:[%s6502_s2 + $0x1e8] sm:$0xf] }
 0x300   : > { %v3454_v35 = vmax.f32 %v2819_v1, 0.0  ;;  %2918 = vmatmul.bf16.gmra.mxu1 %v7363_v29  ;;  %2967 = vmatmul.bf16.gmra.mxu2 %v7365_v30  ;;  %v5668_v1 = vld [vmem:[%s6502_s2 + $0x74] sm:$0xf0] }
 0x301   : > { %3016 = vmatmul.bf16.gmra.mxu3 %v7367_v31  ;;  %v5664_v31 = vld [vmem:[%s6502_s2 + $0x54] sm:$0xf0] }
 0x302   : > { %v7646_v0 = vpack.c.bf16 %v3454_v35, %v3450_v34  ;;  %3045 = vmatpush.bf16.msra.mxu0 %v5075_v63  ;;  %v5059_v34 = vor.u32 %v5668_v1, %v5058_v32  ;;  %v5506_v1 = vld [vmem:[%s6502_s2 + $0x3e8] sm:$0xf] }
 0x303   : > { %v2772_v54 = vpop.f32.mrf.mxu2 }
 0x304   : > { %v2773_v38 = vadd.f32 %v2772_v54, %v2724_v5  ;;  %v2821_v55 = vpop.f32.mrf.mxu3  ;;  %v2676_v58 = vpop.f32.mrf.mxu0  ;;  %v5042_v54 = vld [vmem:[%s6502_s2 + $0x48] sm:$0xf] }
 0x305   : > { %v2677_v13 = vadd.f32 %v2676_v58, %v7597_v6  ;;  %v2725_v14 = vpop.f32.mrf.mxu1 }
 0x306   : > { %v2822_v23 = vadd.f32 %v2821_v55, %v2773_v38  ;;  %3046 = vmatpush.bf16.msra.mxu0 %v5059_v34  ;;  %v5043_v38 = vor.u32 %v5664_v31, %v5042_v54  ;;  %v5748_v31 = vld [vmem:[%s6502_s2 + $0x2f4] sm:$0xf0] }
 0x307   : > { %v2726_v33 = vadd.f32 %v2725_v14, %v2677_v13  ;;  %v5716_v13 = vld [vmem:[%s6502_s2 + $0x1f4] sm:$0xf0]  ;;  %v5378_v14 = vld [vmem:[%s6502_s2 + $0x2e8] sm:$0xf] }
 0x308   : > { %v3458_v63 = vmax.f32 %v2822_v23, 0.0  ;;  %v5251_v32 = vor.u32 %v5716_v13, %v5250_v12  ;;  %v5379_v34 = vor.u32 %v5748_v31, %v5378_v14  ;;  %v5362_v12 = vld [vmem:[%s6502_s2 + $0x2c8] sm:$0xf] }
 0x30a   : > { %3047 = vmatpush.bf16.msra.mxu0 %v5043_v38  ;;  %3091 = vmatpush.bf16.msra.mxu1 %v5251_v32  ;;  %v5744_v32 = vld [vmem:[%s6502_s2 + $0x2d4] sm:$0xf0] }
 0x30b   : > { %v2774_v5 = vpop.f32.mrf.mxu2  ;;  %3140 = vmatpush.bf16.msra.mxu2 %v5379_v34  ;;  %v5363_v34 = vor.u32 %v5744_v32, %v5362_v12  ;;  %v5346_v12 = vld [vmem:[%s6502_s2 + $0x2a8] sm:$0xf]  ;;  %v5740_v32 = vld [vmem:[%s6502_s2 + $0x2b4] sm:$0xf0] }
 0x30c   : > { %v2775_v35 = vadd.f32 %v2774_v5, %v2726_v33  ;;  %v2823_v3 = vpop.f32.mrf.mxu3  ;;  %v2679_v39 = vpop.f32.mrf.mxu0  ;;  %v5780_v5 = vld [vmem:[%s6502_s2 + $0x3f4] sm:$0xf0] }
 0x30d   : > { %v2680_v58 = vadd.f32 %v2679_v39, %v7564_v49  ;;  %v2728_v53 = vpop.f32.mrf.mxu1  ;;  %v5507_v23 = vor.u32 %v5780_v5, %v5506_v1  ;;  %v5776_v1 = vld [vmem:[%s6502_s2 + $0x3d4] sm:$0xf0] }
 0x30e   : > { %v2824_v55 = vadd.f32 %v2823_v3, %v2775_v35  ;;  %v5026_v35 = vld [vmem:[%s6502_s2 + $0x28] sm:$0xf]  ;;  %v5660_v3 = vld [vmem:[%s6502_s2 + $0x34] sm:$0xf0] }
 0x30f   : > { %v2729_v51 = vadd.f32 %v2728_v53, %v2680_v58  ;;  %2874 = vmatmul.bf16.gmra.mxu0 %v7397_v40  ;;  %v5027_v39 = vor.u32 %v5660_v3, %v5026_v35  ;;  %v5234_v53 = vld [vmem:[%s6502_s2 + $0x1c8] sm:$0xf]  ;;  %3189 = vmatpush.bf16.msra.mxu3 %v5507_v23  ;;  %v5682_v3 = vld [vmem:[%s6502_s2 + $0xec] sm:$0xf] }
 0x310   : > { %v3462_v33 = vmax.f32 %v2824_v55, 0.0  ;;  %2923 = vmatmul.bf16.gmra.mxu1 %v7399_v41  ;;  %2972 = vmatmul.bf16.gmra.mxu2 %v7401_v42  ;;  %v5712_v55 = vld [vmem:[%s6502_s2 + $0x1d4] sm:$0xf0]  ;;  %v5010_v35 = vld [vmem:[%s6502_s2 + $0x8] sm:$0xf] }
 0x311   : > { %3021 = vmatmul.bf16.gmra.mxu3 %v7403_v43  ;;  %v5235_v31 = vor.u32 %v5712_v55, %v5234_v53  ;;  %v5490_v43 = vld [vmem:[%s6502_s2 + $0x3c8] sm:$0xf]  ;;  %3048 = vmatpush.bf16.msra.mxu0 %v5027_v39  ;;  %v5124_v53 = vld [vmem:[%s6502_s2 + $0xf8] sm:$0xf0]  ;;  %v5708_v39 = vld [vmem:[%s6502_s2 + $0x1b4] sm:$0xf0] }
 0x312   : > { %v7668_v54 = vpack.c.bf16 %v3462_v33, %v3458_v63  ;;  %v5491_v5 = vor.u32 %v5776_v1, %v5490_v43  ;;  %3141 = vmatpush.bf16.msra.mxu2 %v5363_v34  ;;  %v5678_v1 = vld [vmem:[%s6502_s2 + $0xcc] sm:$0xf] }
 0x313   : > { %v2777_v58 = vpop.f32.mrf.mxu2  ;;  %3092 = vmatpush.bf16.msra.mxu1 %v5235_v31  ;;  %v5772_v31 = vld [vmem:[%s6502_s2 + $0x3b4] sm:$0xf0]  ;;  %v5662_v42 = vld [vmem:[%s6502_s2 + $0x4c] sm:$0xf] }
 0x314   : > { %v2778_v38 = vadd.f32 %v2777_v58, %v2729_v51  ;;  %v2826_v13 = vpop.f32.mrf.mxu3  ;;  %v2681_v14 = vpop.f32.mrf.mxu0  ;;  %v5656_v51 = vld [vmem:[%s6502_s2 + $0x14] sm:$0xf0]  ;;  %3190 = vmatpush.bf16.msra.mxu3 %v5491_v5 }
 0x315   : > { %v2682_v63 = vadd.f32 %v2681_v14, %v7606_v22  ;;  %v2730_v33 = vpop.f32.mrf.mxu1  ;;  %v5011_v58 = vor.u32 %v5656_v51, %v5010_v35  ;;  %v5127_v14 = vor.u32 %v5682_v3, %v5124_v53  ;;  %v5218_v22 = vld [vmem:[%s6502_s2 + $0x1a8] sm:$0xf]  ;;  %v5108_v35 = vld [vmem:[%s6502_s2 + $0xd8] sm:$0xf0]  ;;  %v5704_v5 = vld [vmem:[%s6502_s2 + $0x194] sm:$0xf0] }
 0x316   : > { %v7680_v23 = vadd.f32 %v2826_v13, %v2778_v38  ;;  %v5219_v43 = vor.u32 %v5708_v39, %v5218_v22  ;;  %v5474_v38 = vld [vmem:[%s6502_s2 + $0x3a8] sm:$0xf]  ;;  %v5347_v13 = vor.u32 %v5740_v32, %v5346_v12 }
 0x317   : > { %v2731_v55 = vadd.f32 %v2730_v33, %v2682_v63  ;;  %3049 = vmatpush.bf16.msra.mxu0 %v5011_v58  ;;  %v5475_v63 = vor.u32 %v5772_v31, %v5474_v38  ;;  %v5111_v33 = vor.u32 %v5678_v1, %v5108_v35  ;;  %v5202_v22 = vld [vmem:[%s6502_s2 + $0x188] sm:$0xf]  ;;  %v5674_v31 = vld [vmem:[%s6502_s2 + $0xac] sm:$0xf] }
 0x318   : > { %3093 = vmatpush.bf16.msra.mxu1 %v5219_v43  ;;  %3142 = vmatpush.bf16.msra.mxu2 %v5347_v13  ;;  %v5330_v51 = vld [vmem:[%s6502_s2 + $0x288] sm:$0xf]  ;;  %v5203_v39 = vor.u32 %v5704_v5, %v5202_v22  ;;  %v5768_v43 = vld [vmem:[%s6502_s2 + $0x394] sm:$0xf0]  ;;  %v5092_v13 = vld [vmem:[%s6502_s2 + $0xb8] sm:$0xf0] }
 0x319   : > { %3191 = vmatpush.bf16.msra.mxu3 %v5475_v63  ;;  %v5458_v12 = vld [vmem:[%s6502_s2 + $0x388] sm:$0xf]  ;;  %v5095_v35 = vor.u32 %v5674_v31, %v5092_v13  ;;  %v3466_v5 = vmax.f32 %v7680_v23, 0.0 }
 0x31a   : > { %v5186_v63 = vld [vmem:[%s6502_s2 + $0x168] sm:$0xf] }
 0x31b   : > { %3238 = vmatpush.bf16.msrb.mxu0 %v5127_v14  ;;  %v2779_v34 = vpop.f32.mrf.mxu2  ;;  %v5736_v14 = vld [vmem:[%s6502_s2 + $0x294] sm:$0xf0]  ;;  %v5314_v22 = vld [vmem:[%s6502_s2 + $0x268] sm:$0xf] }
 0x31c   : > { %v2780_v3 = vadd.f32 %v2779_v34, %v2731_v55  ;;  %v2828_v58 = vpop.f32.mrf.mxu3  ;;  %v7694_v53 = vpop.f32.mrf.mxu0  ;;  %v5331_v38 = vor.u32 %v5736_v14, %v5330_v51  ;;  %3094 = vmatpush.bf16.msra.mxu1 %v5203_v39  ;;  %v5459_v55 = vor.u32 %v5768_v43, %v5458_v12  ;;  %v5700_v34 = vld [vmem:[%s6502_s2 + $0x174] sm:$0xf0]  ;;  %v5670_v12 = vld [vmem:[%s6502_s2 + $0x8c] sm:$0xf]  ;;  %v5076_v43 = vld [vmem:[%s6502_s2 + $0x98] sm:$0xf0] }
 0x31d   : > { %v7699_v32 = vpop.f32.mrf.mxu1  ;;  %v5764_v14 = vld [vmem:[%s6502_s2 + $0x374] sm:$0xf0] }
 0x31e   : > { %v2829_v1 = vadd.f32 %v2828_v58, %v2780_v3  ;;  %3143 = vmatpush.bf16.msra.mxu2 %v5331_v38  ;;  %v5732_v3 = vld [vmem:[%s6502_s2 + $0x274] sm:$0xf0]  ;;  %v5442_v58 = vld [vmem:[%s6502_s2 + $0x368] sm:$0xf]  ;;  %3192 = vmatpush.bf16.msra.mxu3 %v5459_v55  ;;  %v5079_v38 = vor.u32 %v5670_v12, %v5076_v43 }
 0x31f   : > { %3239 = vmatpush.bf16.msrb.mxu0 %v5111_v33  ;;  %v5187_v33 = vor.u32 %v5700_v34, %v5186_v63  ;;  %v5315_v39 = vor.u32 %v5732_v3, %v5314_v22  ;;  %v5443_v23 = vor.u32 %v5764_v14, %v5442_v58  ;;  %v5696_v63 = vld [vmem:[%s6502_s2 + $0x154] sm:$0xf0]  ;;  %v5298_v34 = vld [vmem:[%s6502_s2 + $0x248] sm:$0xf]  ;;  %v5060_v14 = vld [vmem:[%s6502_s2 + $0x78] sm:$0xf0] }
 0x320   : > { %2879 = vmatmul.bf16.gmra.mxu0 %v7460_v52  ;;  %v3470_v51 = vmax.f32 %v2829_v1, 0.0  ;;  %2928 = vmatmul.bf16.gmra.mxu1 %v7465_v56  ;;  %v5170_v1 = vld [vmem:[%s6502_s2 + $0x148] sm:$0xf]  ;;  %v5724_v56 = vld [vmem:[%s6502_s2 + $0x234] sm:$0xf0] }
 0x321   : > { %2977 = vmatmul.bf16.gmra.mxu2 %v7467_v57  ;;  %3026 = vmatmul.bf16.gmra.mxu3 %v7471_v47  ;;  %v5171_v55 = vor.u32 %v5696_v63, %v5170_v1  ;;  %v5426_v58 = vld [vmem:[%s6502_s2 + $0x348] sm:$0xf]  ;;  %v5692_v63 = vld [vmem:[%s6502_s2 + $0x134] sm:$0xf0] }
 0x322   : > { %v7716_v31 = vpack.c.bf16 %v3470_v51, %v3466_v5  ;;  %3095 = vmatpush.bf16.msra.mxu1 %v5187_v33  ;;  %3144 = vmatpush.bf16.msra.mxu2 %v5315_v39  ;;  %v5760_v5 = vld [vmem:[%s6502_s2 + $0x354] sm:$0xf0]  ;;  %v5666_v39 = vld [vmem:[%s6502_s2 + $0x6c] sm:$0xf]  ;;  %v5154_v1 = vld [vmem:[%s6502_s2 + $0x128] sm:$0xf] }
 0x323   : > { %3240 = vmatpush.bf16.msrb.mxu0 %v5095_v35  ;;  %v7718_v13 = vpop.f32.mrf.mxu2  ;;  %v5728_v35 = vld [vmem:[%s6502_s2 + $0x254] sm:$0xf0]  ;;  %3193 = vmatpush.bf16.msra.mxu3 %v5443_v23  ;;  %v5427_v12 = vor.u32 %v5760_v5, %v5426_v58  ;;  %v5063_v43 = vor.u32 %v5666_v39, %v5060_v14  ;;  %v5282_v47 = vld [vmem:[%s6502_s2 + $0x228] sm:$0xf]  ;;  %v5155_v57 = vor.u32 %v5692_v63, %v5154_v1  ;;  %v5044_v23 = vld [vmem:[%s6502_s2 + $0x58] sm:$0xf0] }
 0x324   : > { %v7723_v22 = vpop.f32.mrf.mxu3  ;;  %v7725_v3 = vpop.f32.mrf.mxu0  ;;  %v5299_v33 = vor.u32 %v5728_v35, %v5298_v34  ;;  %v5410_v34 = vld [vmem:[%s6502_s2 + $0x328] sm:$0xf]  ;;  %v5283_v35 = vor.u32 %v5724_v56, %v5282_v47  ;;  %v5756_v52 = vld [vmem:[%s6502_s2 + $0x334] sm:$0xf0] }
 0x325   : > { %v7730_v51 = vpop.f32.mrf.mxu1  ;;  %v5138_v5 = vld [vmem:[%s6502_s2 + $0x108] sm:$0xf]  ;;  %v5720_v1 = vld [vmem:[%s6502_s2 + $0x214] sm:$0xf0] }
 0x326   : > { %3096 = vmatpush.bf16.msra.mxu1 %v5171_v55  ;;  %3145 = vmatpush.bf16.msra.mxu2 %v5299_v33  ;;  %v5047_v55 = vor.u32 %v5662_v42, %v5044_v23  ;;  %v5688_v33 = vld [vmem:[%s6502_s2 + $0x114] sm:$0xf0]  ;;  %v5266_v39 = vld [vmem:[%s6502_s2 + $0x208] sm:$0xf]  ;;  %v5658_v42 = vld [vmem:[%s6502_s2 + $0x2c] sm:$0xf] }
 0x327   : > { %3241 = vmatpush.bf16.msrb.mxu0 %v5079_v38  ;;  %3194 = vmatpush.bf16.msra.mxu3 %v5427_v12  ;;  %v5411_v38 = vor.u32 %v5756_v52, %v5410_v34  ;;  %v5139_v14 = vor.u32 %v5688_v33, %v5138_v5  ;;  %v5394_v63 = vld [vmem:[%s6502_s2 + $0x308] sm:$0xf]  ;;  %v5752_v12 = vld [vmem:[%s6502_s2 + $0x314] sm:$0xf0]  ;;  %v5028_v34 = vld [vmem:[%s6502_s2 + $0x38] sm:$0xf0] }
 0x328   : > { %v5654_v23 = vld [vmem:[%s6502_s2 + $0xc] sm:$0xf]  ;;  %v5012_v5 = vld [vmem:[%s6502_s2 + $0x18] sm:$0xf0] }
 0x329   : > { %v5015_v33 = vor.u32 %v5654_v23, %v5012_v5 }
 0x32a   : > { %3097 = vmatpush.bf16.msra.mxu1 %v5155_v57  ;;  %3146 = vmatpush.bf16.msra.mxu2 %v5283_v35  ;;  %v5395_v57 = vor.u32 %v5752_v12, %v5394_v63  ;;  %v5031_v35 = vor.u32 %v5658_v42, %v5028_v34 }
 0x32b   : > { %3242 = vmatpush.bf16.msrb.mxu0 %v5063_v43  ;;  %v7742_v58 = vpop.f32.mrf.mxu2  ;;  %v5267_v43 = vor.u32 %v5720_v1, %v5266_v39  ;;  %3195 = vmatpush.bf16.msra.mxu3 %v5411_v38 }
 0x32c   : > { %v7747_v56 = vpop.f32.mrf.mxu3  ;;  %v2689_v47 = vpop.f32.mrf.mxu0 }
 0x32d   : > { %v2738_v52 = vpop.f32.mrf.mxu1 }
 0x32e   : > { %3098 = vmatpush.bf16.msra.mxu1 %v5139_v14  ;;  %3147 = vmatpush.bf16.msra.mxu2 %v5267_v43 }
 0x32f   : > { %3243 = vmatpush.bf16.msrb.mxu0 %v5047_v55  ;;  %3196 = vmatpush.bf16.msra.mxu3 %v5395_v57  ;;  %v2690_v57 = vadd.f32 %v2689_v47, %v7581_v59 }
 0x330   : > { %2884 = vmatmul.bf16.gmra.mxu0 %v7529_v9  ;;  %2933 = vmatmul.bf16.gmra.mxu1 %v7534_v15 }
 0x331   : > { %2982 = vmatmul.bf16.gmra.mxu2 %v7536_v20  ;;  %3031 = vmatmul.bf16.gmra.mxu3 %v7543_v25 }
 0x333   : > { %3244 = vmatpush.bf16.msrb.mxu0 %v5031_v35  ;;  %v2787_v39 = vpop.f32.mrf.mxu2 }
 0x334   : > { %v2836_v38 = vpop.f32.mrf.mxu3  ;;  %v2691_v55 = vpop.f32.mrf.mxu0 }
 0x335   : > { %v2740_v1 = vpop.f32.mrf.mxu1  ;;  %v2692_v35 = vadd.f32 %v2691_v55, %v7599_v7 }
 0x337   : > { %3245 = vmatpush.bf16.msrb.mxu0 %v5015_v33 }
 0x33b   : > { %v2789_v63 = vpop.f32.mrf.mxu2 }
 0x33c   : > { %v2838_v12 = vpop.f32.mrf.mxu3  ;;  %v2694_v14 = vpop.f32.mrf.mxu0 }
 0x33d   : > { %v2743_v42 = vpop.f32.mrf.mxu1  ;;  %v2695_v34 = vadd.f32 %v2694_v14, %v7512_v60  ;;  %v2685_v14 = vadd.f32 %v7694_v53, %v7483_v11  ;;  %v2741_v60 = vadd.f32 %v2740_v1, %v2692_v35 }
 0x33f   : > { %v2744_v23 = vadd.f32 %v2743_v42, %v2695_v34  ;;  %v2734_v47 = vadd.f32 %v7699_v32, %v2685_v14 }
 0x340   : > { %2889 = vmatmul.bf16.gmra.mxu0 %v7583_v61  ;;  %2938 = vmatmul.bf16.gmra.mxu1 %v7585_v62  ;;  %v2687_v62 = vadd.f32 %v7725_v3, %v7538_v21  ;;  %v2790_v61 = vadd.f32 %v2789_v63, %v2741_v60 }
 0x341   : > { %2987 = vmatmul.bf16.gmra.mxu2 %v7587_v2  ;;  %3036 = vmatmul.bf16.gmra.mxu3 %v7589_v4  ;;  %v2739_v2 = vadd.f32 %v2738_v52, %v2690_v57  ;;  %v2783_v60 = vadd.f32 %v7718_v13, %v2734_v47 }
 0x342   : > { %v2736_v42 = vadd.f32 %v7730_v51, %v2687_v62  ;;  %v2839_v52 = vadd.f32 %v2838_v12, %v2790_v61 }
 0x343   : > { %v2792_v43 = vpop.f32.mrf.mxu2  ;;  %v2788_v34 = vadd.f32 %v2787_v39, %v2739_v2 }
 0x344   : > { %v2841_v5 = vpop.f32.mrf.mxu3  ;;  %v2696_v33 = vpop.f32.mrf.mxu0  ;;  %v2793_v4 = vadd.f32 %v2792_v43, %v2744_v23  ;;  %v2785_v3 = vadd.f32 %v7742_v58, %v2736_v42  ;;  %v8863_v42 = vld [vmem:[#allocation20_spill] sm:$0xff] }
 0x345   : > { %v2745_v25 = vpop.f32.mrf.mxu1  ;;  %v2697_v20 = vadd.f32 %v2696_v33, %v7551_v36 }
 0x346   : > { %v2842_v7 = vadd.f32 %v2841_v5, %v2793_v4 }
 0x347   : > { %v2746_v15 = vadd.f32 %v2745_v25, %v2697_v20  ;;  %v2837_v20 = vadd.f32 %v2836_v38, %v2788_v34 }
 0x348   : > { %v3490_v25 = vmax.f32 %v2842_v7, 0.0 }
 0x34b   : > { %v2794_v55 = vpop.f32.mrf.mxu2 }
 0x34c   : > { %v2795_v59 = vadd.f32 %v2794_v55, %v2746_v15  ;;  %v2843_v33 = vpop.f32.mrf.mxu3  ;;  %v2855_v36 = vpop.f32.mrf.mxu0  ;;  %v2834_v15 = vadd.f32 %v7747_v56, %v2785_v3  ;;  %v8865_v3 = vld [vmem:[#allocation22_spill] sm:$0xff] }
 0x34d   : > { %v2856_v53 = vadd.f32 %v2855_v36, %v7603_v10  ;;  %v2904_v11 = vpop.f32.mrf.mxu1  ;;  %v3486_v36 = vmax.f32 %v2839_v52, 0.0  ;;  %v8866_v52 = vld [vmem:[#allocation23_spill] sm:$0xff] }
 0x34e   : > { %v2844_v1 = vadd.f32 %v2843_v33, %v2795_v59  ;;  %v3482_v59 = vmax.f32 %v2837_v20, 0.0  ;;  %v3478_v58 = vmax.f32 %v2834_v15, 0.0 }
 0x34f   : > { %v2905_v43 = vadd.f32 %v2904_v11, %v2856_v53  ;;  %v2832_v11 = vadd.f32 %v7723_v22, %v2783_v60  ;;  %v8864_v53 = vld [vmem:[#allocation21_spill] sm:$0xff] }
 0x350   : > { %3050 = vmatmul.bf16.vlgmr.msra.gmra.mxu0 %v7220_v45  ;;  %v3494_v62 = vmax.f32 %v2844_v1, 0.0  ;;  %3099 = vmatmul.bf16.vlgmr.msra.gmra.mxu1 %v7222_v46  ;;  %v3538_v38 = vpack.c.bf16 %v3486_v36, %v3482_v59 }
 0x351   : > { %3148 = vmatmul.bf16.vlgmr.msra.gmra.mxu2 %v7224_v48  ;;  %3197 = vmatmul.bf16.vlgmr.msra.gmra.mxu3 %v7229_v50  ;;  %v3474_v12 = vmax.f32 %v2832_v11, 0.0 }
 0x352   : > { %v3542_v2 = vpack.c.bf16 %v3494_v62, %v3490_v25 }
 0x353   : > { %v2953_v61 = vpop.f32.mrf.mxu2  ;;  %v3534_v56 = vpack.c.bf16 %v3478_v58, %v3474_v12  ;;  %v8868_v12 = vld [vmem:[#allocation48_spill] sm:$0xff] }
 0x354   : > { %v2954_v4 = vadd.f32 %v2953_v61, %v2905_v43  ;;  %v3002_v32 = vpop.f32.mrf.mxu3  ;;  %3690 = vmatpush.bf16.msra.mxu0 %v3542_v2  ;;  %v2857_v13 = vpop.f32.mrf.mxu0 }
 0x355   : > { %v2858_v7 = vadd.f32 %v2857_v13, %v7612_v24  ;;  %v2906_v51 = vpop.f32.mrf.mxu1 }
 0x356   : > { %v3003_v39 = vadd.f32 %v3002_v32, %v2954_v4 }
 0x357   : > { %v2907_v63 = vadd.f32 %v2906_v51, %v2858_v7 }
 0x358   : > { %3691 = vmatpush.bf16.msra.mxu0 %v3538_v38  ;;  %v3435_v34 = vmax.f32 %v3003_v39, 0.0 }
 0x35b   : > { %v2955_v57 = vpop.f32.mrf.mxu2 }
 0x35c   : > { %v2956_v35 = vadd.f32 %v2955_v57, %v2907_v63  ;;  %v3004_v23 = vpop.f32.mrf.mxu3  ;;  %3692 = vmatpush.bf16.msra.mxu0 %v3534_v56  ;;  %v2860_v22 = vpop.f32.mrf.mxu0 }
 0x35d   : > { %v2861_v5 = vadd.f32 %v2860_v22, %v7601_v8  ;;  %v2909_v14 = vpop.f32.mrf.mxu1 }
 0x35e   : > { %v3005_v47 = vadd.f32 %v3004_v23, %v2956_v35 }
 0x35f   : > { %v2910_v55 = vadd.f32 %v2909_v14, %v2861_v5 }
 0x360   : > { %3055 = vmatmul.bf16.gmra.mxu0 %v8863_v42  ;;  %v3439_v33 = vmax.f32 %v3005_v47, 0.0  ;;  %3104 = vmatmul.bf16.gmra.mxu1 %v8864_v53 }
 0x361   : > { %3153 = vmatmul.bf16.gmra.mxu2 %v8865_v3  ;;  %3202 = vmatmul.bf16.gmra.mxu3 %v8866_v52 }
 0x362   : > { %3693 = vmatpush.bf16.msra.mxu0 %v7716_v31  ;;  %v7790_v1 = vpack.c.bf16 %v3439_v33, %v3435_v34 }
 0x363   : > { %v2958_v43 = vpop.f32.mrf.mxu2 }
 0x364   : > { %v2959_v60 = vadd.f32 %v2958_v43, %v2910_v55  ;;  %v3007_v20 = vpop.f32.mrf.mxu3  ;;  %v2862_v25 = vpop.f32.mrf.mxu0 }
 0x365   : > { %v2863_v62 = vadd.f32 %v2862_v25, %v7622_v27  ;;  %v2911_v15 = vpop.f32.mrf.mxu1  ;;  %v8869_v25 = vld [vmem:[#allocation26_spill] sm:$0xff] }
 0x366   : > { %3694 = vmatpush.bf16.msra.mxu0 %v7668_v54  ;;  %v3008_v36 = vadd.f32 %v3007_v20, %v2959_v60 }
 0x367   : > { %v2912_v2 = vadd.f32 %v2911_v15, %v2863_v62 }
 0x368   : > { %v3443_v54 = vmax.f32 %v3008_v36, 0.0 }
 0x36a   : > { %3695 = vmatpush.bf16.msra.mxu0 %v7646_v0  ;;  %v8867_v0 = vld [vmem:[#allocation52_spill] sm:$0xff] }
 0x36b   : > { %v2960_v61 = vpop.f32.mrf.mxu2 }
 0x36c   : > { %v2961_v11 = vadd.f32 %v2960_v61, %v2912_v2  ;;  %v3009_v59 = vpop.f32.mrf.mxu3  ;;  %v2865_v4 = vpop.f32.mrf.mxu0 }
 0x36d   : > { %v2866_v31 = vadd.f32 %v2865_v4, %v7615_v44  ;;  %v2914_v32 = vpop.f32.mrf.mxu1 }
 0x36e   : > { %3696 = vmatpush.bf16.msra.mxu0 %v7632_v26  ;;  %v3010_v13 = vadd.f32 %v3009_v59, %v2961_v11 }
 0x36f   : > { %v2915_v7 = vadd.f32 %v2914_v32, %v2866_v31 }
 0x370   : > { %3060 = vmatmul.bf16.gmra.mxu0 %v7325_v16  ;;  %v3447_v51 = vmax.f32 %v3010_v13, 0.0  ;;  %3109 = vmatmul.bf16.gmra.mxu1 %v7327_v17 }
 0x371   : > { %3158 = vmatmul.bf16.gmra.mxu2 %v7329_v18  ;;  %3207 = vmatmul.bf16.gmra.mxu3 %v7331_v19 }
 0x372   : > { %3697 = vmatpush.bf16.msra.mxu0 %v8867_v0  ;;  %v7802_v58 = vpack.c.bf16 %v3447_v51, %v3443_v54 }
 0x373   : > { %v2963_v26 = vpop.f32.mrf.mxu2 }
 0x374   : > { %v2964_v39 = vadd.f32 %v2963_v26, %v2915_v7  ;;  %v3012_v38 = vpop.f32.mrf.mxu3  ;;  %v2867_v63 = vpop.f32.mrf.mxu0 }
 0x375   : > { %v2868_v56 = vadd.f32 %v2867_v63, %v8868_v12  ;;  %v2916_v57 = vpop.f32.mrf.mxu1  ;;  %v5252_v63 = vld [vmem:[%s6502_s2 + $0x1f8] sm:$0xf0] }
 0x376   : > { %v3013_v35 = vadd.f32 %v3012_v38, %v2964_v39  ;;  %v5714_v38 = vld [vmem:[%s6502_s2 + $0x1ec] sm:$0xf] }
 0x377   : > { %v2917_v23 = vadd.f32 %v2916_v57, %v2868_v56  ;;  %v5746_v56 = vld [vmem:[%s6502_s2 + $0x2ec] sm:$0xf] }
 0x378   : > { %v3451_v60 = vmax.f32 %v3013_v35, 0.0 }
 0x37b   : > { %v2965_v22 = vpop.f32.mrf.mxu2 }
 0x37c   : > { %v2966_v5 = vadd.f32 %v2965_v22, %v2917_v23  ;;  %v3014_v14 = vpop.f32.mrf.mxu3  ;;  %v2870_v47 = vpop.f32.mrf.mxu0  ;;  %v8870_v23 = vld [vmem:[#allocation29_spill] sm:$0xff]  ;;  %v5255_v22 = vor.u32 %v5714_v38, %v5252_v63  ;;  %v5220_v63 = vld [vmem:[%s6502_s2 + $0x1b8] sm:$0xf0] }
 0x37d   : > { %v2871_v55 = vadd.f32 %v2870_v47, %v7553_v37  ;;  %v2919_v34 = vpop.f32.mrf.mxu1  ;;  %v8871_v47 = vld [vmem:[#allocation30_spill] sm:$0xff]  ;;  %v5706_v38 = vld [vmem:[%s6502_s2 + $0x1ac] sm:$0xf] }
 0x37e   : > { %v3015_v33 = vadd.f32 %v3014_v14, %v2966_v5  ;;  %v5380_v5 = vld [vmem:[%s6502_s2 + $0x2f8] sm:$0xf0]  ;;  %v5778_v14 = vld [vmem:[%s6502_s2 + $0x3ec] sm:$0xf]  ;;  %3287 = vmatpush.bf16.msrb.mxu1 %v5255_v22 }
 0x37f   : > { %v2920_v43 = vadd.f32 %v2919_v34, %v2871_v55  ;;  %v5383_v55 = vor.u32 %v5746_v56, %v5380_v5  ;;  %v5508_v34 = vld [vmem:[%s6502_s2 + $0x3f8] sm:$0xf0]  ;;  %v5738_v56 = vld [vmem:[%s6502_s2 + $0x2ac] sm:$0xf] }
 0x380   : > { %3065 = vmatmul.bf16.gmra.mxu0 %v7361_v28  ;;  %v3455_v20 = vmax.f32 %v3015_v33, 0.0  ;;  %3114 = vmatmul.bf16.gmra.mxu1 %v7363_v29  ;;  %v5511_v33 = vor.u32 %v5778_v14, %v5508_v34  ;;  %v5770_v22 = vld [vmem:[%s6502_s2 + $0x3ac] sm:$0xf]  ;;  %v5476_v14 = vld [vmem:[%s6502_s2 + $0x3b8] sm:$0xf0] }
 0x381   : > { %3163 = vmatmul.bf16.gmra.mxu2 %v7365_v30  ;;  %3212 = vmatmul.bf16.gmra.mxu3 %v8869_v25 }
 0x382   : > { %v7810_v62 = vpack.c.bf16 %v3455_v20, %v3451_v60  ;;  %3336 = vmatpush.bf16.msrb.mxu2 %v5383_v55  ;;  %v5710_v20 = vld [vmem:[%s6502_s2 + $0x1cc] sm:$0xf]  ;;  %3385 = vmatpush.bf16.msrb.mxu3 %v5511_v33  ;;  %v5479_v55 = vor.u32 %v5770_v22, %v5476_v14 }
 0x383   : > { %v2968_v15 = vpop.f32.mrf.mxu2  ;;  %v5702_v33 = vld [vmem:[%s6502_s2 + $0x18c] sm:$0xf] }
 0x384   : > { %v2969_v36 = vadd.f32 %v2968_v15, %v2920_v43  ;;  %v3017_v2 = vpop.f32.mrf.mxu3  ;;  %v2872_v61 = vpop.f32.mrf.mxu0  ;;  %v5236_v15 = vld [vmem:[%s6502_s2 + $0x1d8] sm:$0xf0]  ;;  %v5762_v14 = vld [vmem:[%s6502_s2 + $0x36c] sm:$0xf] }
 0x385   : > { %v2873_v11 = vadd.f32 %v2872_v61, %v7597_v6  ;;  %v2921_v59 = vpop.f32.mrf.mxu1 }
 0x386   : > { %v3018_v4 = vadd.f32 %v3017_v2, %v2969_v36  ;;  %v5742_v36 = vld [vmem:[%s6502_s2 + $0x2cc] sm:$0xf] }
 0x387   : > { %v2922_v31 = vadd.f32 %v2921_v59, %v2873_v11  ;;  %v5239_v59 = vor.u32 %v5710_v20, %v5236_v15  ;;  %v5734_v20 = vld [vmem:[%s6502_s2 + $0x28c] sm:$0xf] }
 0x388   : > { %v3459_v57 = vmax.f32 %v3018_v4, 0.0  ;;  %v5364_v4 = vld [vmem:[%s6502_s2 + $0x2d8] sm:$0xf0] }
 0x389   : > { %3288 = vmatpush.bf16.msrb.mxu1 %v5239_v59  ;;  %v5766_v59 = vld [vmem:[%s6502_s2 + $0x38c] sm:$0xf] }
 0x38b   : > { %v2970_v32 = vpop.f32.mrf.mxu2 }
 0x38c   : > { %v2971_v13 = vadd.f32 %v2970_v32, %v2922_v31  ;;  %v3019_v7 = vpop.f32.mrf.mxu3  ;;  %v2875_v54 = vpop.f32.mrf.mxu0  ;;  %v5774_v31 = vld [vmem:[%s6502_s2 + $0x3cc] sm:$0xf]  ;;  %v5492_v32 = vld [vmem:[%s6502_s2 + $0x3d8] sm:$0xf0] }
 0x38d   : > { %v2876_v51 = vadd.f32 %v2875_v54, %v7564_v49  ;;  %v2924_v0 = vpop.f32.mrf.mxu1  ;;  %v8887_v49 = vld [vmem:[#allocation41_spill] sm:$0xff] }
 0x38e   : > { %v3020_v26 = vadd.f32 %v3019_v7, %v2971_v13  ;;  %v8872_v13 = vld [vmem:[#allocation51_spill] sm:$0xff] }
 0x38f   : > { %v2925_v39 = vadd.f32 %v2924_v0, %v2876_v51  ;;  %v5367_v51 = vor.u32 %v5742_v36, %v5364_v4  ;;  %v5495_v0 = vor.u32 %v5774_v31, %v5492_v32  ;;  %v5460_v4 = vld [vmem:[%s6502_s2 + $0x398] sm:$0xf0] }
 0x390   : > { %3070 = vmatmul.bf16.gmra.mxu0 %v7397_v40  ;;  %v3463_v35 = vmax.f32 %v3020_v26, 0.0  ;;  %3119 = vmatmul.bf16.gmra.mxu1 %v7399_v41 }
 0x391   : > { %3168 = vmatmul.bf16.gmra.mxu2 %v8870_v23  ;;  %3217 = vmatmul.bf16.gmra.mxu3 %v8871_v47 }
 0x392   : > { %v7824_v43 = vpack.c.bf16 %v3463_v35, %v3459_v57  ;;  %3337 = vmatpush.bf16.msrb.mxu2 %v5367_v51  ;;  %3386 = vmatpush.bf16.msrb.mxu3 %v5495_v0  ;;  %v5223_v57 = vor.u32 %v5706_v38, %v5220_v63  ;;  %v5348_v35 = vld [vmem:[%s6502_s2 + $0x2b8] sm:$0xf0]  ;;  %v5698_v0 = vld [vmem:[%s6502_s2 + $0x16c] sm:$0xf] }
 0x393   : > { %v2973_v60 = vpop.f32.mrf.mxu2  ;;  %v5351_v5 = vor.u32 %v5738_v56, %v5348_v35  ;;  %v8873_v51 = vld [vmem:[#allocation31_spill] sm:$0xff]  ;;  %v5730_v38 = vld [vmem:[%s6502_s2 + $0x26c] sm:$0xf] }
 0x394   : > { %v2974_v2 = vadd.f32 %v2973_v60, %v2925_v39  ;;  %v3022_v61 = vpop.f32.mrf.mxu3  ;;  %v2877_v11 = vpop.f32.mrf.mxu0  ;;  %3289 = vmatpush.bf16.msrb.mxu1 %v5223_v57  ;;  %v5204_v60 = vld [vmem:[%s6502_s2 + $0x198] sm:$0xf0]  ;;  %v8874_v57 = vld [vmem:[#allocation32_spill] sm:$0xff]  ;;  %v8875_v35 = vld [vmem:[#allocation33_spill] sm:$0xff] }
 0x395   : > { %v2878_v7 = vadd.f32 %v2877_v11, %v8872_v13  ;;  %v2926_v54 = vpop.f32.mrf.mxu1  ;;  %v5332_v11 = vld [vmem:[%s6502_s2 + $0x298] sm:$0xf0] }
 0x396   : > { %v3023_v26 = vadd.f32 %v3022_v61, %v2974_v2  ;;  %3338 = vmatpush.bf16.msrb.mxu2 %v5351_v5  ;;  %3387 = vmatpush.bf16.msrb.mxu3 %v5479_v55  ;;  %v5207_v61 = vor.u32 %v5702_v33, %v5204_v60  ;;  %v5335_v32 = vor.u32 %v5734_v20, %v5332_v11  ;;  %v5316_v5 = vld [vmem:[%s6502_s2 + $0x278] sm:$0xf0]  ;;  %v8876_v55 = vld [vmem:[#allocation34_spill] sm:$0xff] }
 0x397   : > { %v2927_v39 = vadd.f32 %v2926_v54, %v2878_v7  ;;  %v5463_v54 = vor.u32 %v5766_v59, %v5460_v4  ;;  %v5444_v33 = vld [vmem:[%s6502_s2 + $0x378] sm:$0xf0] }
 0x398   : > { %3290 = vmatpush.bf16.msrb.mxu1 %v5207_v61  ;;  %v3467_v63 = vmax.f32 %v3023_v26, 0.0  ;;  %v5447_v26 = vor.u32 %v5762_v14, %v5444_v33  ;;  %v5726_v61 = vld [vmem:[%s6502_s2 + $0x24c] sm:$0xf]  ;;  %v5284_v14 = vld [vmem:[%s6502_s2 + $0x238] sm:$0xf0] }
 0x39a   : > { %3339 = vmatpush.bf16.msrb.mxu2 %v5335_v32  ;;  %3388 = vmatpush.bf16.msrb.mxu3 %v5463_v54  ;;  %v5300_v32 = vld [vmem:[%s6502_s2 + $0x258] sm:$0xf0] }
 0x39b   : > { %v2975_v34 = vpop.f32.mrf.mxu2  ;;  %v5428_v54 = vld [vmem:[%s6502_s2 + $0x358] sm:$0xf0] }
 0x39c   : > { %v2976_v15 = vadd.f32 %v2975_v34, %v2927_v39  ;;  %v3024_v36 = vpop.f32.mrf.mxu3  ;;  %v5188_v39 = vld [vmem:[%s6502_s2 + $0x178] sm:$0xf0]  ;;  %v5319_v34 = vor.u32 %v5730_v38, %v5316_v5 }
 0x39d   : > { %v7842_v2 = vpop.f32.mrf.mxu0  ;;  %v7847_v31 = vpop.f32.mrf.mxu1  ;;  %v5191_v22 = vor.u32 %v5698_v0, %v5188_v39  ;;  %v5303_v39 = vor.u32 %v5726_v61, %v5300_v32  ;;  %v5686_v61 = vld [vmem:[%s6502_s2 + $0x10c] sm:$0xf] }
 0x39e   : > { %v3025_v7 = vadd.f32 %v3024_v36, %v2976_v15  ;;  %3340 = vmatpush.bf16.msrb.mxu2 %v5319_v34  ;;  %v5694_v15 = vld [vmem:[%s6502_s2 + $0x14c] sm:$0xf]  ;;  %v5172_v36 = vld [vmem:[%s6502_s2 + $0x158] sm:$0xf0]  ;;  %3389 = vmatpush.bf16.msrb.mxu3 %v5447_v26 }
 0x39f   : > { %3291 = vmatpush.bf16.msrb.mxu1 %v5191_v22  ;;  %v5175_v4 = vor.u32 %v5694_v15, %v5172_v36  ;;  %v5722_v22 = vld [vmem:[%s6502_s2 + $0x22c] sm:$0xf]  ;;  %v5412_v15 = vld [vmem:[%s6502_s2 + $0x338] sm:$0xf0] }
 0x3a0   : > { %3075 = vmatmul.bf16.gmra.mxu0 %v8873_v51  ;;  %v3471_v56 = vmax.f32 %v3025_v7, 0.0  ;;  %3124 = vmatmul.bf16.gmra.mxu1 %v8874_v57  ;;  %v5758_v7 = vld [vmem:[%s6502_s2 + $0x34c] sm:$0xf]  ;;  %v5287_v33 = vor.u32 %v5722_v22, %v5284_v14  ;;  %v8879_v14 = vld [vmem:[#allocation40_spill] sm:$0xff] }
 0x3a1   : > { %3173 = vmatmul.bf16.gmra.mxu2 %v8875_v35  ;;  %3222 = vmatmul.bf16.gmra.mxu3 %v8876_v55  ;;  %v5431_v38 = vor.u32 %v5758_v7, %v5428_v54  ;;  %v5754_v34 = vld [vmem:[%s6502_s2 + $0x32c] sm:$0xf]  ;;  %v5396_v55 = vld [vmem:[%s6502_s2 + $0x318] sm:$0xf0] }
 0x3a2   : > { %v7859_v60 = vpack.c.bf16 %v3471_v56, %v3467_v63  ;;  %3341 = vmatpush.bf16.msrb.mxu2 %v5303_v39  ;;  %v5690_v63 = vld [vmem:[%s6502_s2 + $0x12c] sm:$0xf]  ;;  %v5156_v56 = vld [vmem:[%s6502_s2 + $0x138] sm:$0xf0]  ;;  %v5415_v26 = vor.u32 %v5754_v34, %v5412_v15 }
 0x3a3   : > { %3292 = vmatpush.bf16.msrb.mxu1 %v5175_v4  ;;  %v5159_v5 = vor.u32 %v5690_v63, %v5156_v56  ;;  %3390 = vmatpush.bf16.msrb.mxu3 %v5431_v38  ;;  %v5140_v4 = vld [vmem:[%s6502_s2 + $0x118] sm:$0xf0]  ;;  %v5718_v32 = vld [vmem:[%s6502_s2 + $0x20c] sm:$0xf]  ;;  %v8877_v38 = vld [vmem:[#allocation38_spill] sm:$0xff] }
 0x3a4   : > { %v7861_v20 = vpop.f32.mrf.mxu2  ;;  %v7866_v11 = vpop.f32.mrf.mxu3  ;;  %v5143_v39 = vor.u32 %v5686_v61, %v5140_v4  ;;  %v5268_v63 = vld [vmem:[%s6502_s2 + $0x218] sm:$0xf0]  ;;  %v5750_v56 = vld [vmem:[%s6502_s2 + $0x30c] sm:$0xf] }
 0x3a5   : > { %v7868_v59 = vpop.f32.mrf.mxu0  ;;  %v7873_v0 = vpop.f32.mrf.mxu1  ;;  %v5271_v57 = vor.u32 %v5718_v32, %v5268_v63  ;;  %v5399_v22 = vor.u32 %v5750_v56, %v5396_v55  ;;  %v8881_v55 = vld [vmem:[#allocation36_spill] sm:$0xff]  ;;  %v8883_v56 = vld [vmem:[#allocation46_spill] sm:$0xff] }
 0x3a6   : > { %3342 = vmatpush.bf16.msrb.mxu2 %v5287_v33 }
 0x3a7   : > { %3293 = vmatpush.bf16.msrb.mxu1 %v5159_v5  ;;  %3391 = vmatpush.bf16.msrb.mxu3 %v5415_v26  ;;  %v8878_v5 = vld [vmem:[#allocation39_spill] sm:$0xff] }
 0x3aa   : > { %3343 = vmatpush.bf16.msrb.mxu2 %v5271_v57  ;;  %v8882_v57 = vld [vmem:[#allocation45_spill] sm:$0xff] }
 0x3ab   : > { %3294 = vmatpush.bf16.msrb.mxu1 %v5143_v39  ;;  %3392 = vmatpush.bf16.msrb.mxu3 %v5399_v22  ;;  %v8880_v39 = vld [vmem:[#allocation44_spill] sm:$0xff]  ;;  %v8885_v22 = vld [vmem:[#allocation43_spill] sm:$0xff] }
 0x3ac   : > { %v2980_v36 = vpop.f32.mrf.mxu2  ;;  %v7884_v7 = vpop.f32.mrf.mxu3 }
 0x3ad   : > { %v2885_v54 = vpop.f32.mrf.mxu0  ;;  %v2934_v35 = vpop.f32.mrf.mxu1 }
 0x3b0   : > { %3080 = vmatmul.bf16.gmra.mxu0 %v7529_v9  ;;  %3129 = vmatmul.bf16.gmra.mxu1 %v8877_v38  ;;  %v2886_v38 = vadd.f32 %v2885_v54, %v8885_v22  ;;  %v8886_v9 = vld [vmem:[#allocation50_spill] sm:$0xff] }
 0x3b1   : > { %3178 = vmatmul.bf16.gmra.mxu2 %v8878_v5  ;;  %3227 = vmatmul.bf16.gmra.mxu3 %v8879_v14  ;;  %v8884_v5 = vld [vmem:[#allocation47_spill] sm:$0xff] }
 0x3b4   : > { %v2983_v34 = vpop.f32.mrf.mxu2  ;;  %v3032_v33 = vpop.f32.mrf.mxu3 }
 0x3b5   : > { %v2887_v15 = vpop.f32.mrf.mxu0  ;;  %v2936_v61 = vpop.f32.mrf.mxu1 }
 0x3b6   : > { %v2888_v13 = vadd.f32 %v2887_v15, %v8886_v9 }
 0x3bc   : > { %v2985_v4 = vpop.f32.mrf.mxu2  ;;  %v3034_v51 = vpop.f32.mrf.mxu3 }
 0x3bd   : > { %v2890_v32 = vpop.f32.mrf.mxu0  ;;  %v2939_v26 = vpop.f32.mrf.mxu1 }
 0x3be   : > { %v2891_v63 = vadd.f32 %v2890_v32, %v8881_v55  ;;  %v2937_v55 = vadd.f32 %v2936_v61, %v2888_v13 }
 0x3c0   : > { %3085 = vmatmul.bf16.gmra.mxu0 %v8880_v39  ;;  %3134 = vmatmul.bf16.gmra.mxu1 %v8882_v57  ;;  %v2940_v47 = vadd.f32 %v2939_v26, %v2891_v63  ;;  %v8888_v39 = vld [vmem:[#allocation35_spill] sm:$0xff]  ;;  %v2883_v57 = vadd.f32 %v7868_v59, %v7538_v21  ;;  %v2986_v25 = vadd.f32 %v2985_v4, %v2937_v55 }
 0x3c1   : > { %3183 = vmatmul.bf16.gmra.mxu2 %v8883_v56  ;;  %3232 = vmatmul.bf16.gmra.mxu3 %v8884_v5  ;;  %v2881_v32 = vadd.f32 %v7842_v2, %v8888_v39  ;;  %v2935_v56 = vadd.f32 %v2934_v35, %v2886_v38 }
 0x3c2   : > { %v2932_v26 = vadd.f32 %v7873_v0, %v2883_v57  ;;  %v3035_v59 = vadd.f32 %v3034_v51, %v2986_v25 }
 0x3c3   : > { %v2930_v54 = vadd.f32 %v7847_v31, %v2881_v32  ;;  %v2984_v63 = vadd.f32 %v2983_v34, %v2935_v56 }
 0x3c4   : > { %v2988_v14 = vpop.f32.mrf.mxu2  ;;  %v3037_v23 = vpop.f32.mrf.mxu3  ;;  %v2981_v29 = vadd.f32 %v2980_v36, %v2932_v26 }
 0x3c5   : > { %v2892_v41 = vpop.f32.mrf.mxu0  ;;  %v2941_v40 = vpop.f32.mrf.mxu1  ;;  %v2989_v5 = vadd.f32 %v2988_v14, %v2940_v47 }
 0x3c6   : > { %v2893_v6 = vadd.f32 %v2892_v41, %v8887_v49 }
 0x3c7   : > { %v3038_v9 = vadd.f32 %v3037_v23, %v2989_v5 }
 0x3c8   : > { %v2942_v30 = vadd.f32 %v2941_v40, %v2893_v6  ;;  %v2979_v40 = vadd.f32 %v7861_v20, %v2930_v54  ;;  %v3033_v6 = vadd.f32 %v3032_v33, %v2984_v63 }
 0x3c9   : > { %v3491_v47 = vmax.f32 %v3038_v9, 0.0 }
 0x3ca   : > { %v3028_v51 = vadd.f32 %v7866_v11, %v2979_v40  ;;  %v3483_v0 = vmax.f32 %v3033_v6, 0.0 }
 0x3cc   : > { %v2990_v15 = vpop.f32.mrf.mxu2  ;;  %v3039_v41 = vpop.f32.mrf.mxu3 }
 0x3cd   : > { %v2991_v22 = vadd.f32 %v2990_v15, %v2942_v30  ;;  %v3051_v49 = vpop.f32.mrf.mxu0  ;;  %v3100_v39 = vpop.f32.mrf.mxu1  ;;  %v3030_v30 = vadd.f32 %v7884_v7, %v2981_v29 }
 0x3ce   : > { %v3052_v2 = vadd.f32 %v3051_v49, %v7603_v10  ;;  %v3487_v49 = vmax.f32 %v3035_v59, 0.0 }
 0x3cf   : > { %v3040_v35 = vadd.f32 %v3039_v41, %v2991_v22 }
 0x3d0   : > { %v3101_v13 = vadd.f32 %v3100_v39, %v3052_v2  ;;  %3246 = vmatmul.bf16.vlgmr.msrb.gmra.mxu0 %v7220_v45  ;;  %3295 = vmatmul.bf16.vlgmr.msrb.gmra.mxu1 %v7222_v46  ;;  %v3479_v46 = vmax.f32 %v3030_v30, 0.0 }
 0x3d1   : > { %v3495_v31 = vmax.f32 %v3040_v35, 0.0  ;;  %3344 = vmatmul.bf16.vlgmr.msrb.gmra.mxu2 %v7224_v48  ;;  %3393 = vmatmul.bf16.vlgmr.msrb.gmra.mxu3 %v7229_v50  ;;  %v3539_v48 = vpack.c.bf16 %v3487_v49, %v3483_v0  ;;  %v3475_v50 = vmax.f32 %v3028_v51, 0.0 }
 0x3d3   : > { %v3543_v23 = vpack.c.bf16 %v3495_v31, %v3491_v47  ;;  %v3535_v29 = vpack.c.bf16 %v3479_v46, %v3475_v50  ;;  %v8890_v46 = vld [vmem:[#allocation25_spill] sm:$0xff] }
 0x3d4   : > { %v3149_v25 = vpop.f32.mrf.mxu2  ;;  %v3198_v36 = vpop.f32.mrf.mxu3 }
 0x3d5   : > { %v3150_v45 = vadd.f32 %v3149_v25, %v3101_v13  ;;  %3739 = vmatpush.bf16.msra.mxu1 %v3543_v23  ;;  %v3053_v20 = vpop.f32.mrf.mxu0  ;;  %v3102_v38 = vpop.f32.mrf.mxu1 }
 0x3d6   : > { %v3054_v9 = vadd.f32 %v3053_v20, %v7612_v24 }
 0x3d7   : > { %v3199_v5 = vadd.f32 %v3198_v36, %v3150_v45 }
 0x3d8   : > { %v3103_v14 = vadd.f32 %v3102_v38, %v3054_v9  ;;  %v8889_v38 = vld [vmem:[#allocation24_spill] sm:$0xff] }
 0x3d9   : > { %3740 = vmatpush.bf16.msra.mxu1 %v3539_v48  ;;  %v3436_v57 = vmax.f32 %v3199_v5, 0.0  ;;  %v8891_v5 = vld [vmem:[#allocation26_spill] sm:$0xff] }
 0x3dc   : > { %v3151_v7 = vpop.f32.mrf.mxu2  ;;  %v3200_v33 = vpop.f32.mrf.mxu3 }
 0x3dd   : > { %v3152_v34 = vadd.f32 %v3151_v7, %v3103_v14  ;;  %3741 = vmatpush.bf16.msra.mxu1 %v3535_v29  ;;  %v3056_v11 = vpop.f32.mrf.mxu0  ;;  %v3105_v4 = vpop.f32.mrf.mxu1 }
 0x3de   : > { %v3057_v61 = vadd.f32 %v3056_v11, %v7601_v8 }
 0x3df   : > { %v3201_v39 = vadd.f32 %v3200_v33, %v3152_v34  ;;  %v8892_v34 = vld [vmem:[#allocation49_spill] sm:$0xff] }
 0x3e0   : > { %v3106_v55 = vadd.f32 %v3105_v4, %v3057_v61  ;;  %3251 = vmatmul.bf16.gmra.mxu0 %v8863_v42  ;;  %3300 = vmatmul.bf16.gmra.mxu1 %v8864_v53 }
 0x3e1   : > { %v3440_v56 = vmax.f32 %v3201_v39, 0.0  ;;  %3349 = vmatmul.bf16.gmra.mxu2 %v8865_v3  ;;  %3398 = vmatmul.bf16.gmra.mxu3 %v8866_v52  ;;  %v3558_v39 = vld [vmem:[%s8894_s19 + $0x60] sm:$0xff] }
 0x3e2   : > { %3742 = vmatpush.bf16.msra.mxu1 %v7859_v60  ;;  %3624 = vperm.xlu0 %5910, %v3558_v39  }
 0x3e3   : > { %v7922_v22 = vpack.c.bf16 %v3440_v56, %v3436_v57 }
 0x3e4   : > { %v3154_v32 = vpop.f32.mrf.mxu2  ;;  %v3203_v15 = vpop.f32.mrf.mxu3 }
 0x3e5   : > { %v3155_v54 = vadd.f32 %v3154_v32, %v3106_v55  ;;  %v3058_v26 = vpop.f32.mrf.mxu0  ;;  %v3107_v63 = vpop.f32.mrf.mxu1 }
 0x3e6   : > { %3743 = vmatpush.bf16.msra.mxu1 %v7824_v43  ;;  %v3059_v42 = vadd.f32 %v3058_v26, %v7622_v27 }
 0x3e7   : > { %v3204_v41 = vadd.f32 %v3203_v15, %v3155_v54  ;;  %v8895_v54 = vld [vmem:[#allocation42_spill] sm:$0xff] }
 0x3e8   : > { %v3108_v2 = vadd.f32 %v3107_v63, %v3059_v42  ;;  %v3559_v42 = vld [vmem:[%s8894_s19 + $0x68] sm:$0xff] }
 0x3e9   : > { %v3444_v43 = vmax.f32 %v3204_v41, 0.0 }
 0x3ea   : > { %3744 = vmatpush.bf16.msra.mxu1 %v7810_v62 }
 0x3ec   : > { %v3156_v53 = vpop.f32.mrf.mxu2  ;;  %v3205_v52 = vpop.f32.mrf.mxu3 }
 0x3ed   : > { %v3157_v3 = vadd.f32 %v3156_v53, %v3108_v2  ;;  %v3061_v59 = vpop.f32.mrf.mxu0  ;;  %v3110_v35 = vpop.f32.mrf.mxu1  ;;  %v8896_v2 = vld [vmem:[#allocation27_spill] sm:$0xff] }
 0x3ee   : > { %3745 = vmatpush.bf16.msra.mxu1 %v7802_v58  ;;  %v3062_v60 = vadd.f32 %v3061_v59, %v7615_v44  ;;  %v8898_v59 = vld [vmem:[#allocation29_spill] sm:$0xff] }
 0x3ef   : > { %v3206_v13 = vadd.f32 %v3205_v52, %v3157_v3  ;;  %v8897_v52 = vld [vmem:[#allocation28_spill] sm:$0xff] }
 0x3f0   : > { %v3111_v40 = vadd.f32 %v3110_v35, %v3062_v60  ;;  %3256 = vmatmul.bf16.gmra.mxu0 %v7325_v16  ;;  %3305 = vmatmul.bf16.gmra.mxu1 %v7327_v17  ;;  %v8899_v60 = vld [vmem:[#allocation30_spill] sm:$0xff] }
 0x3f1   : > { %v3448_v6 = vmax.f32 %v3206_v13, 0.0  ;;  %3354 = vmatmul.bf16.gmra.mxu2 %v7329_v18  ;;  %3403 = vmatmul.bf16.gmra.mxu3 %v7331_v19  ;;  %v3557_v35 = vld [vmem:[%s8894_s19 + $0x58] sm:$0xff] }
 0x3f2   : > { %3746 = vmatpush.bf16.msra.mxu1 %v7790_v1  ;;  %3619 = vperm.xlu0 %5910, %v3557_v35  }
 0x3f3   : > { %v7934_v62 = vpack.c.bf16 %v3448_v6, %v3444_v43 }
 0x3f4   : > { %v3159_v58 = vpop.f32.mrf.mxu2  ;;  %v3208_v31 = vpop.f32.mrf.mxu3 }
 0x3f5   : > { %v3160_v47 = vadd.f32 %v3159_v58, %v3111_v40  ;;  %v3063_v30 = vpop.f32.mrf.mxu0  ;;  %v3112_v23 = vpop.f32.mrf.mxu1 }
 0x3f6   : > { %v3064_v49 = vadd.f32 %v3063_v30, %v8868_v12 }
 0x3f7   : > { %v3209_v16 = vadd.f32 %v3208_v31, %v3160_v47  ;;  %v3554_v31 = vld [vmem:[%s8894_s19 + $0x40] sm:$0xff] }
 0x3f8   : > { %v3113_v25 = vadd.f32 %v3112_v23, %v3064_v49  ;;  %v8900_v49 = vld [vmem:[#allocation51_spill] sm:$0xff] }
 0x3f9   : > { %v3452_v20 = vmax.f32 %v3209_v16, 0.0  ;;  %v3552_v16 = vld [vmem:[%s8894_s19 + $0x30] sm:$0xff] }
 0x3fa   : > { %3594 = vperm.xlu0 %5910, %v3552_v16   ;;  %v8913_v16 = vld [vmem:[#allocation47_spill] sm:$0xff] }
 0x3fc   : > { %v3161_v51 = vpop.f32.mrf.mxu2  ;;  %v3210_v17 = vpop.f32.mrf.mxu3 }
 0x3fd   : > { %v3162_v0 = vadd.f32 %v3161_v51, %v3113_v25  ;;  %v3066_v45 = vpop.f32.mrf.mxu0  ;;  %v3115_v19 = vpop.f32.mrf.mxu1 }
 0x3fe   : > { %v3067_v18 = vadd.f32 %v3066_v45, %v7553_v37 }
 0x3ff   : > { %v3211_v36 = vadd.f32 %v3210_v17, %v3162_v0 }
 0x400   : > { %v3116_v1 = vadd.f32 %v3115_v19, %v3067_v18  ;;  %3261 = vmatmul.bf16.gmra.mxu0 %v7361_v28  ;;  %3310 = vmatmul.bf16.gmra.mxu1 %v8889_v38  ;;  %v3560_v28 = vld [vmem:[%s8893_s18 + $0x70] sm:$0xff]  ;;  %v3553_v19 = vld [vmem:[%s8894_s19 + $0x38] sm:$0xff]  ;;  %v8902_v38 = vld [vmem:[#allocation32_spill] sm:$0xff] }
 0x401   : > { %v3456_v9 = vmax.f32 %v3211_v36, 0.0  ;;  %3359 = vmatmul.bf16.gmra.mxu2 %v8890_v46  ;;  %3408 = vmatmul.bf16.gmra.mxu3 %v8891_v5  ;;  %v8903_v46 = vld [vmem:[#allocation33_spill] sm:$0xff]  ;;  %v8904_v5 = vld [vmem:[#allocation34_spill] sm:$0xff] }
 0x402   : > { %3634 = vperm.xlu1 %5911, %v3560_v28   ;;  %v3548_v28 = vld [vmem:[%s8894_s19 + $0x10] sm:$0xff] }
 0x403   : > { %v7942_v48 = vpack.c.bf16 %v3456_v9, %v3452_v20 }
 0x404   : > { %v3164_v14 = vpop.f32.mrf.mxu2  ;;  %v3213_v29 = vpop.f32.mrf.mxu3 }
 0x405   : > { %v3165_v50 = vadd.f32 %v3164_v14, %v3116_v1  ;;  %v3068_v7 = vpop.f32.mrf.mxu0  ;;  %v3117_v11 = vpop.f32.mrf.mxu1  ;;  %v8901_v1 = vld [vmem:[#allocation31_spill] sm:$0xff]  ;;  %v3551_v14 = vld [vmem:[%s8894_s19 + $0x28] sm:$0xff] }
 0x406   : > { %v3069_v33 = vadd.f32 %v3068_v7, %v8892_v34  ;;  %3589 = vperm.xlu0 %5910, %v3551_v14  }
 0x407   : > { %v3214_v61 = vadd.f32 %v3213_v29, %v3165_v50 }
 0x408   : > { %v3118_v4 = vadd.f32 %v3117_v11, %v3069_v33 }
 0x409   : > { %v3460_v53 = vmax.f32 %v3214_v61, 0.0  ;;  %v3546_v61 = vld [vmem:[%s8894_s19] sm:$0xff] }
 0x40a   : > { %3629 = vperm.xlu1 %5911, %v3559_v42   ;;  %v8907_v42 = vld [vmem:[#allocation39_spill] sm:$0xff] }
 0x40c   : > { %v3166_v55 = vpop.f32.mrf.mxu2  ;;  %v3215_v56 = vpop.f32.mrf.mxu3 }
 0x40d   : > { %v3167_v57 = vadd.f32 %v3166_v55, %v3118_v4  ;;  %v3071_v32 = vpop.f32.mrf.mxu0  ;;  %v3120_v26 = vpop.f32.mrf.mxu1  ;;  %v3561_v4 = vld [vmem:[%s8894_s19 + $0x78] sm:$0xff] }
 0x40e   : > { %v3072_v15 = vadd.f32 %v3071_v32, %v8895_v54  ;;  %3639 = vperm.xlu2 %5912, %v3561_v4   ;;  %3564 = vperm.xlu0 %5910, %v3546_v61   ;;  %v3547_v32 = vld [vmem:[%s8894_s19 + $0x8] sm:$0xff] }
 0x40f   : > { %v3216_v63 = vadd.f32 %v3215_v56, %v3167_v57 }
 0x410   : > { %v3121_v41 = vadd.f32 %v3120_v26, %v3072_v15  ;;  %3266 = vmatmul.bf16.gmra.mxu0 %v8896_v2  ;;  %3315 = vmatmul.bf16.gmra.mxu1 %v8897_v52  ;;  %v8905_v15 = vld [vmem:[#allocation37_spill] sm:$0xff]  ;;  %v8906_v26 = vld [vmem:[#allocation38_spill] sm:$0xff] }
 0x411   : > { %v3464_v3 = vmax.f32 %v3216_v63, 0.0  ;;  %3364 = vmatmul.bf16.gmra.mxu2 %v8898_v59  ;;  %3413 = vmatmul.bf16.gmra.mxu3 %v8899_v60  ;;  %v8908_v63 = vld [vmem:[#allocation40_spill] sm:$0xff] }
 0x412   : > { %3604 = vperm.xlu1 %5911, %v3554_v31   ;;  %v3555_v59 = vld [vmem:[%s8894_s19 + $0x48] sm:$0xff] }
 0x413   : > { %v7962_v13 = vpack.c.bf16 %v3464_v3, %v3460_v53  ;;  %v8911_v31 = vld [vmem:[#allocation45_spill] sm:$0xff] }
 0x414   : > { %v3169_v40 = vpop.f32.mrf.mxu2  ;;  %v3218_v6 = vpop.f32.mrf.mxu3 }
 0x415   : > { %v3170_v43 = vadd.f32 %v3169_v40, %v3121_v41  ;;  %v3073_v58 = vpop.f32.mrf.mxu0  ;;  %v3122_v47 = vpop.f32.mrf.mxu1  ;;  %v3556_v41 = vld [vmem:[%s8894_s19 + $0x50] sm:$0xff] }
 0x416   : > { %v3074_v23 = vadd.f32 %v3073_v58, %v8900_v49  ;;  %3614 = vperm.xlu2 %5912, %v3556_v41   ;;  %v8910_v58 = vld [vmem:[#allocation36_spill] sm:$0xff] }
 0x417   : > { %v3219_v30 = vadd.f32 %v3218_v6, %v3170_v43  ;;  %v8909_v6 = vld [vmem:[#allocation44_spill] sm:$0xff] }
 0x418   : > { %v3123_v25 = vadd.f32 %v3122_v47, %v3074_v23  ;;  %v3550_v23 = vld [vmem:[%s8894_s19 + $0x20] sm:$0xff] }
 0x419   : > { %v3468_v20 = vmax.f32 %v3219_v30, 0.0  ;;  %v8912_v30 = vld [vmem:[#allocation46_spill] sm:$0xff]  ;;  %v8033_v41 = vld [vmem:[%s8918_s4] sm:$0xff] }
 0x41a   : > { %3599 = vperm.xlu1 %5911, %v3553_v19  }
 0x41c   : > { %v3171_v51 = vpop.f32.mrf.mxu2  ;;  %v3220_v17 = vpop.f32.mrf.mxu3 }
 0x41d   : > { %v3172_v0 = vadd.f32 %v3171_v51, %v3123_v25  ;;  %v3076_v45 = vpop.f32.mrf.mxu0  ;;  %v7971_v18 = vpop.f32.mrf.mxu1  ;;  %v8914_v51 = vld [vmem:[#allocation43_spill] sm:$0xff] }
 0x41e   : > { %3609 = vperm.xlu2 %5912, %v3555_v59  }
 0x41f   : > { %v3221_v36 = vadd.f32 %v3220_v17, %v3172_v0  ;;  %v8915_v17 = vld [vmem:[#allocation50_spill] sm:$0xff] }
 0x420   : > { %3271 = vmatmul.bf16.gmra.mxu0 %v8901_v1  ;;  %3320 = vmatmul.bf16.gmra.mxu1 %v8902_v38  ;;  %v8916_v38 = vld [vmem:[#allocation41_spill] sm:$0xff] }
 0x421   : > { %v3472_v9 = vmax.f32 %v3221_v36, 0.0  ;;  %3369 = vmatmul.bf16.gmra.mxu2 %v8903_v46  ;;  %3418 = vmatmul.bf16.gmra.mxu3 %v8904_v5  ;;  %v8917_v5 = vld [vmem:[#allocation35_spill] sm:$0xff] }
 0x422   : > { %3574 = vperm.xlu1 %5911, %v3548_v28   ;;  %v3077_v14 = vadd.f32 %v3076_v45, %v8917_v5 }
 0x423   : > { %v7983_v50 = vpack.c.bf16 %v3472_v9, %v3468_v20 }
 0x424   : > { %v7985_v29 = vpop.f32.mrf.mxu2  ;;  %v7987_v7 = vpop.f32.mrf.mxu3 }
 0x425   : > { %v3078_v33 = vpop.f32.mrf.mxu0  ;;  %v3127_v11 = vpop.f32.mrf.mxu1 }
 0x426   : > { %3584 = vperm.xlu2 %5912, %v3550_v23   ;;  %v3079_v28 = vadd.f32 %v3078_v33, %v7538_v21 }
 0x428   : > { %v3128_v45 = vadd.f32 %v3127_v11, %v3079_v28 }
 0x42a   : > { %3569 = vperm.xlu1 %5911, %v3547_v32  }
 0x42c   : > { %v3176_v39 = vpop.f32.mrf.mxu2  ;;  %v7998_v55 = vpop.f32.mrf.mxu3 }
 0x42d   : > { %v3081_v57 = vpop.f32.mrf.mxu0  ;;  %v3130_v56 = vpop.f32.mrf.mxu1 }
 0x42e   : > { %v3082_v0 = vadd.f32 %v3081_v57, %v8914_v51 }
 0x430   : > { %3276 = vmatmul.bf16.gmra.mxu0 %v8905_v15  ;;  %3325 = vmatmul.bf16.gmra.mxu1 %v8906_v26  ;;  %v3131_v61 = vadd.f32 %v3130_v56, %v3082_v0  ;;  %v3549_v15 = vld [vmem:[%s8894_s19 + $0x18] sm:$0xff] }
 0x431   : > { %3374 = vmatmul.bf16.gmra.mxu2 %v8907_v42  ;;  %3423 = vmatmul.bf16.gmra.mxu3 %v8908_v63  ;;  %v3126_v42 = vadd.f32 %v7971_v18, %v3077_v14 }
 0x432   : > { %3579 = vperm.xlu2 %5912, %v3549_v15  }
 0x433   : > { %v3175_v18 = vadd.f32 %v7985_v29, %v3126_v42 }
 0x434   : > { %v3179_v2 = vpop.f32.mrf.mxu2  ;;  %v3228_v53 = vpop.f32.mrf.mxu3 }
 0x435   : > { %v3083_v3 = vpop.f32.mrf.mxu0  ;;  %v3132_v52 = vpop.f32.mrf.mxu1  ;;  %v3180_v33 = vadd.f32 %v3179_v2, %v3131_v61 }
 0x436   : > { %v3084_v19 = vadd.f32 %v3083_v3, %v8915_v17 }
 0x438   : > { %v3133_v4 = vadd.f32 %v3132_v52, %v3084_v19 }
 0x43c   : > { %v3181_v60 = vpop.f32.mrf.mxu2  ;;  %v3230_v35 = vpop.f32.mrf.mxu3 }
 0x43d   : > { %v3086_v40 = vpop.f32.mrf.mxu0  ;;  %v3135_v43 = vpop.f32.mrf.mxu1  ;;  %v3182_v57 = vadd.f32 %v3181_v60, %v3133_v4  ;;  %v3177_v60 = vadd.f32 %v3176_v39, %v3128_v45 }
 0x43e   : > { %v3087_v47 = vadd.f32 %v3086_v40, %v8910_v58 }
 0x43f   : > { %v3226_v11 = vadd.f32 %v7998_v55, %v3177_v60 }
 0x440   : > { %3281 = vmatmul.bf16.gmra.mxu0 %v8909_v6  ;;  %3330 = vmatmul.bf16.gmra.mxu1 %v8911_v31  ;;  %v3136_v36 = vadd.f32 %v3135_v43, %v3087_v47  ;;  %v3231_v6 = vadd.f32 %v3230_v35, %v3182_v57 }
 0x441   : > { %3379 = vmatmul.bf16.gmra.mxu2 %v8912_v30  ;;  %3428 = vmatmul.bf16.gmra.mxu3 %v8913_v16  ;;  %v3229_v30 = vadd.f32 %v3228_v53, %v3180_v33  ;;  %v3480_v53 = vmax.f32 %v3226_v11, 0.0 }
 0x442   : > { %v3488_v2 = vmax.f32 %v3231_v6, 0.0 }
 0x443   : > { %v3484_v39 = vmax.f32 %v3229_v30, 0.0 }
 0x444   : > { %v3184_v25 = vpop.f32.mrf.mxu2  ;;  %v3233_v1 = vpop.f32.mrf.mxu3 }
 0x445   : > { %v3088_v20 = vpop.f32.mrf.mxu0  ;;  %v3137_v9 = vpop.f32.mrf.mxu1  ;;  %v3185_v32 = vadd.f32 %v3184_v25, %v3136_v36 }
 0x446   : > { %v3089_v46 = vadd.f32 %v3088_v20, %v8916_v38 }
 0x447   : > { %v3234_v56 = vadd.f32 %v3233_v1, %v3185_v32 }
 0x448   : > { %v3138_v26 = vadd.f32 %v3137_v9, %v3089_v46  ;;  %v3540_v9 = vpack.c.bf16 %v3488_v2, %v3484_v39 }
 0x449   : > { %v3492_v23 = vmax.f32 %v3234_v56, 0.0 }
 0x44c   : > { %v3186_v63 = vpop.f32.mrf.mxu2  ;;  %v3235_v52 = vpop.f32.mrf.mxu3 }
 0x44d   : > { %v3187_v3 = vadd.f32 %v3186_v63, %v3138_v26  ;;  %v3247_v59 = vpop.f32.mrf.mxu0  ;;  %v3296_v43 = vpop.f32.mrf.mxu1 }
 0x44e   : > { %v3248_v40 = vadd.f32 %v3247_v59, %v7603_v10  ;;  %v3224_v10 = vadd.f32 %v7987_v7, %v3175_v18  ;;  %v8045_v7 = vld [vmem:[%s8918_s4 + $0x8] sm:$0xff] }
 0x44f   : > { %v3236_v47 = vadd.f32 %v3235_v52, %v3187_v3 }
 0x450   : > { %v3297_v31 = vadd.f32 %v3296_v43, %v3248_v40  ;;  %3698 = vmatmul.bf16.vlgmr.msra.gmra.mxu0 %v8033_v41  ;;  %3747 = vmatmul.bf16.vlgmr.msra.gmra.mxu1 %v8033_v41  ;;  %v3476_v14 = vmax.f32 %v3224_v10, 0.0 }
 0x451   : > { %v3496_v16 = vmax.f32 %v3236_v47, 0.0 }
 0x452   : > { %v3536_v55 = vpack.c.bf16 %v3480_v53, %v3476_v14 }
 0x453   : > { %v3544_v25 = vpack.c.bf16 %v3496_v16, %v3492_v23 }
 0x454   : > { %v3345_v0 = vpop.f32.mrf.mxu2  ;;  %v3394_v19 = vpop.f32.mrf.mxu3 }
 0x455   : > { %v3346_v35 = vadd.f32 %v3345_v0, %v3297_v31  ;;  %3788 = vmatpush.bf16.msra.mxu2 %v3544_v25  ;;  %v3249_v36 = vpop.f32.mrf.mxu0  ;;  %v3298_v29 = vpop.f32.mrf.mxu1 }
 0x456   : > { %v3250_v1 = vadd.f32 %v3249_v36, %v7612_v24 }
 0x457   : > { %v3395_v20 = vadd.f32 %v3394_v19, %v3346_v35  ;;  %v8073_v19 = vld [vmem:[%s8918_s4 + $0x18] sm:$0xff] }
 0x458   : > { %v3299_v46 = vadd.f32 %v3298_v29, %v3250_v1 }
 0x459   : > { %3789 = vmatpush.bf16.msra.mxu2 %v3540_v9  ;;  %v3437_v42 = vmax.f32 %v3395_v20, 0.0 }
 0x45c   : > { %v3347_v28 = vpop.f32.mrf.mxu2  ;;  %v3396_v4 = vpop.f32.mrf.mxu3 }
 0x45d   : > { %v3348_v61 = vadd.f32 %v3347_v28, %v3299_v46  ;;  %3790 = vmatpush.bf16.msra.mxu2 %v3536_v55  ;;  %v3252_v32 = vpop.f32.mrf.mxu0  ;;  %v3301_v15 = vpop.f32.mrf.mxu1 }
 0x45e   : > { %v3253_v24 = vadd.f32 %v3252_v32, %v7601_v8 }
 0x45f   : > { %v3397_v57 = vadd.f32 %v3396_v4, %v3348_v61 }
 0x460   : > { %v3302_v26 = vadd.f32 %v3301_v15, %v3253_v24  ;;  %3703 = vmatmul.bf16.gmra.mxu0 %v8045_v7  ;;  %3752 = vmatmul.bf16.gmra.mxu1 %v8045_v7 }
 0x461   : > { %v3441_v63 = vmax.f32 %v3397_v57, 0.0  ;;  %3791 = vmatpush.bf16.msra.mxu2 %v7983_v50  ;;  %v8059_v50 = vld [vmem:[%s8918_s4 + $0x10] sm:$0xff] }
 0x463   : > { %v8051_v45 = vpack.c.bf16 %v3441_v63, %v3437_v42 }
 0x464   : > { %v3350_v33 = vpop.f32.mrf.mxu2  ;;  %v3399_v3 = vpop.f32.mrf.mxu3 }
 0x465   : > { %v3351_v56 = vadd.f32 %v3350_v33, %v3302_v26  ;;  %3792 = vmatpush.bf16.msra.mxu2 %v7962_v13  ;;  %v3254_v52 = vpop.f32.mrf.mxu0  ;;  %v3303_v59 = vpop.f32.mrf.mxu1  ;;  %v8085_v26 = vld [vmem:[%s8918_s4 + $0x20] sm:$0xff] }
 0x466   : > { %v3255_v8 = vadd.f32 %v3254_v52, %v7622_v27 }
 0x467   : > { %v3400_v40 = vadd.f32 %v3399_v3, %v3351_v56 }
 0x468   : > { %v3304_v43 = vadd.f32 %v3303_v59, %v3255_v8 }
 0x469   : > { %3793 = vmatpush.bf16.msra.mxu2 %v7942_v48  ;;  %v3445_v23 = vmax.f32 %v3400_v40, 0.0 }
 0x46c   : > { %v3352_v60 = vpop.f32.mrf.mxu2  ;;  %v3401_v47 = vpop.f32.mrf.mxu3 }
 0x46d   : > { %v3353_v6 = vadd.f32 %v3352_v60, %v3304_v43  ;;  %3794 = vmatpush.bf16.msra.mxu2 %v7934_v62  ;;  %v3257_v31 = vpop.f32.mrf.mxu0  ;;  %v3306_v18 = vpop.f32.mrf.mxu1 }
 0x46e   : > { %v3258_v13 = vadd.f32 %v3257_v31, %v7615_v44 }
 0x46f   : > { %v3402_v27 = vadd.f32 %v3401_v47, %v3353_v6 }
 0x470   : > { %v3307_v30 = vadd.f32 %v3306_v18, %v3258_v13  ;;  %3708 = vmatmul.bf16.gmra.mxu0 %v8059_v50  ;;  %3757 = vmatmul.bf16.gmra.mxu1 %v8059_v50  ;;  %v8102_v18 = vld [vmem:[%s8918_s4 + $0x28] sm:$0xff] }
 0x471   : > { %v3449_v48 = vmax.f32 %v3402_v27, 0.0  ;;  %3795 = vmatpush.bf16.msra.mxu2 %v7922_v22  ;;  %8919 = vst [vmem:[#allocation20_spill] sm:$0xff] %v8102_v18 }
 0x473   : > { %v8066_v16 = vpack.c.bf16 %v3449_v48, %v3445_v23 }
 0x474   : > { %v3355_v11 = vpop.f32.mrf.mxu2  ;;  %3796 = vmatmul.bf16.vlgmr.msra.gmra.mxu2 %v8033_v41  ;;  %v3404_v2 = vpop.f32.mrf.mxu3 }
 0x475   : > { %v3356_v62 = vadd.f32 %v3355_v11, %v3307_v30  ;;  %v3259_v25 = vpop.f32.mrf.mxu0  ;;  %v3308_v0 = vpop.f32.mrf.mxu1 }
 0x476   : > { %v3260_v44 = vadd.f32 %v3259_v25, %v8868_v12  ;;  %v8108_v48 = vpop.permute.xlu1 %3634  ;;  %v8110_v11 = vpop.permute.xlu0 %3624 }
 0x477   : > { %v3405_v10 = vadd.f32 %v3404_v2, %v3356_v62  ;;  %8920 = vst [vmem:[#allocation21_spill] sm:$0xff] %v8108_v48 }
 0x478   : > { %v3309_v39 = vadd.f32 %v3308_v0, %v3260_v44 }
 0x479   : > { %v3453_v12 = vmax.f32 %v3405_v10, 0.0 }
 0x47c   : > { %v3357_v35 = vpop.f32.mrf.mxu2  ;;  %v3406_v36 = vpop.f32.mrf.mxu3 }
 0x47d   : > { %v3358_v22 = vadd.f32 %v3357_v35, %v3309_v39  ;;  %v3262_v1 = vpop.f32.mrf.mxu0  ;;  %v3311_v53 = vpop.f32.mrf.mxu1  ;;  %v8122_v39 = vld [vmem:[%s8918_s4 + $0x30] sm:$0xff] }
 0x47e   : > { %v3263_v29 = vadd.f32 %v3262_v1, %v7553_v37  ;;  %v8117_v0 = vpop.permute.xlu1 %3629  ;;  %v8126_v1 = vpop.permute.xlu0 %3619 }
 0x47f   : > { %v3407_v20 = vadd.f32 %v3406_v36, %v3358_v22 }
 0x480   : > { %v3312_v9 = vadd.f32 %v3311_v53, %v3263_v29  ;;  %3713 = vmatmul.bf16.gmra.mxu0 %v8073_v19  ;;  %3762 = vmatmul.bf16.gmra.mxu1 %v8073_v19 }
 0x481   : > { %v3457_v46 = vmax.f32 %v3407_v20, 0.0 }
 0x483   : > { %v8078_v14 = vpack.c.bf16 %v3457_v46, %v3453_v12 }
 0x484   : > { %v3360_v55 = vpop.f32.mrf.mxu2  ;;  %3801 = vmatmul.bf16.gmra.mxu2 %v8045_v7  ;;  %v3409_v61 = vpop.f32.mrf.mxu3 }
 0x485   : > { %v3361_v28 = vadd.f32 %v3360_v55, %v3312_v9  ;;  %v3264_v4 = vpop.f32.mrf.mxu0  ;;  %v3313_v37 = vpop.f32.mrf.mxu1 }
 0x486   : > { %v3265_v32 = vadd.f32 %v3264_v4, %v8892_v34  ;;  %v8131_v12 = vpop.permute.xlu1 %3604  ;;  %v8133_v46 = vpop.permute.xlu0 %3594 }
 0x487   : > { %v3410_v24 = vadd.f32 %v3409_v61, %v3361_v28  ;;  %8921 = vst [vmem:[#allocation22_spill] sm:$0xff] %v8131_v12  ;;  %v8135_v55 = vpop.permute.xlu2 %3639  ;;  %v8140_v61 = vld [vmem:[%s8918_s4 + $0x38] sm:$0xff] }
 0x488   : > { %v3314_v15 = vadd.f32 %v3313_v37, %v3265_v32  ;;  %8922 = vst [vmem:[#allocation23_spill] sm:$0xff] %v8133_v46 }
 0x489   : > { %v3461_v34 = vmax.f32 %v3410_v24, 0.0  ;;  %8923 = vst [vmem:[#allocation52_spill] sm:$0xff] %v8135_v55 }
 0x48c   : > { %v3362_v57 = vpop.f32.mrf.mxu2  ;;  %v3411_v63 = vpop.f32.mrf.mxu3 }
 0x48d   : > { %v3363_v42 = vadd.f32 %v3362_v57, %v3314_v15  ;;  %v3267_v33 = vpop.f32.mrf.mxu0  ;;  %v3316_v3 = vpop.f32.mrf.mxu1 }
 0x48e   : > { %v3268_v56 = vadd.f32 %v3267_v33, %v8895_v54  ;;  %v8143_v24 = vpop.permute.xlu1 %3599  ;;  %v8146_v15 = vpop.permute.xlu0 %3589 }
 0x48f   : > { %v3412_v52 = vadd.f32 %v3411_v63, %v3363_v42  ;;  %8924 = vst [vmem:[#allocation48_spill] sm:$0xff] %v8143_v24 }
 0x490   : > { %v3317_v8 = vadd.f32 %v3316_v3, %v3268_v56  ;;  %3718 = vmatmul.bf16.gmra.mxu0 %v8085_v26  ;;  %3767 = vmatmul.bf16.gmra.mxu1 %v8085_v26  ;;  %8925 = vst [vmem:[#allocation24_spill] sm:$0xff] %v8146_v15 }
 0x491   : > { %v3465_v59 = vmax.f32 %v3412_v52, 0.0 }
 0x493   : > { %v8090_v40 = vpack.c.bf16 %v3465_v59, %v3461_v34 }
 0x494   : > { %v3365_v43 = vpop.f32.mrf.mxu2  ;;  %3806 = vmatmul.bf16.gmra.mxu2 %v8059_v50  ;;  %v3414_v6 = vpop.f32.mrf.mxu3 }
 0x495   : > { %v3366_v60 = vadd.f32 %v3365_v43, %v3317_v8  ;;  %v3269_v47 = vpop.f32.mrf.mxu0  ;;  %v8093_v31 = vpop.f32.mrf.mxu1 }
 0x496   : > { %v8152_v8 = vpop.permute.xlu2 %3614  ;;  %v8157_v55 = vpop.permute.xlu1 %3574 }
 0x497   : > { %v8095_v54 = vadd.f32 %v3414_v6, %v3366_v60 }
 0x49c   : > { %v8097_v13 = vpop.f32.mrf.mxu2  ;;  %v8104_v27 = vpop.f32.mrf.mxu3 }
 0x49d   : > { %v3272_v30 = vpop.f32.mrf.mxu0  ;;  %v3321_v23 = vpop.f32.mrf.mxu1 }
 0x49e   : > { %v3273_v43 = vadd.f32 %v3272_v30, %v8917_v5 }
 0x4a0   : > { %3723 = vmatmul.bf16.gmra.mxu0 %v8102_v18  ;;  %3772 = vmatmul.bf16.gmra.mxu1 %v8102_v18 }
 0x4a4   : > { %v8112_v62 = vpop.f32.mrf.mxu2  ;;  %3811 = vmatmul.bf16.gmra.mxu2 %v8073_v19  ;;  %v8115_v2 = vpop.f32.mrf.mxu3 }
 0x4a5   : > { %v3274_v25 = vpop.f32.mrf.mxu0  ;;  %v3323_v44 = vpop.f32.mrf.mxu1 }
 0x4a6   : > { %v3275_v60 = vadd.f32 %v3274_v25, %v7538_v21 }
 0x4a8   : > { %v3324_v48 = vadd.f32 %v3323_v44, %v3275_v60 }
 0x4ac   : > { %v3372_v10 = vpop.f32.mrf.mxu2  ;;  %v8124_v35 = vpop.f32.mrf.mxu3 }
 0x4ad   : > { %v3277_v22 = vpop.f32.mrf.mxu0  ;;  %v3326_v36 = vpop.f32.mrf.mxu1 }
 0x4ae   : > { %v3278_v63 = vadd.f32 %v3277_v22, %v8914_v51 }
 0x4b0   : > { %3728 = vmatmul.bf16.gmra.mxu0 %v8122_v39  ;;  %3777 = vmatmul.bf16.gmra.mxu1 %v8122_v39 }
 0x4b4   : > { %v3375_v29 = vpop.f32.mrf.mxu2  ;;  %3816 = vmatmul.bf16.gmra.mxu2 %v8085_v26  ;;  %v3424_v53 = vpop.f32.mrf.mxu3 }
 0x4b5   : > { %v3279_v20 = vpop.f32.mrf.mxu0  ;;  %v3328_v9 = vpop.f32.mrf.mxu1 }
 0x4b6   : > { %v3280_v33 = vadd.f32 %v3279_v20, %v8915_v17  ;;  %v3270_v17 = vadd.f32 %v3269_v47, %v8900_v49  ;;  %v3322_v20 = vadd.f32 %v3321_v23, %v3273_v43 }
 0x4b8   : > { %v3329_v6 = vadd.f32 %v3328_v9, %v3280_v33  ;;  %v3373_v9 = vadd.f32 %v3372_v10, %v3324_v48  ;;  %v3319_v47 = vadd.f32 %v8093_v31, %v3270_v17  ;;  %v3371_v23 = vadd.f32 %v8112_v62, %v3322_v20 }
 0x4ba   : > { %v3368_v48 = vadd.f32 %v8097_v13, %v3319_v47  ;;  %v3422_v10 = vadd.f32 %v8124_v35, %v3373_v9  ;;  %v3420_v31 = vadd.f32 %v8115_v2, %v3371_v23  ;;  %v8928_v9 = vld [vmem:[#allocation21_spill] sm:$0xff] }
 0x4bc   : > { %v3377_v28 = vpop.f32.mrf.mxu2  ;;  %v3426_v4 = vpop.f32.mrf.mxu3  ;;  %v3417_v13 = vadd.f32 %v8104_v27, %v3368_v48  ;;  %v3477_v43 = vmax.f32 %v3420_v31, 0.0 }
 0x4bd   : > { %v3282_v32 = vpop.f32.mrf.mxu0  ;;  %v3331_v37 = vpop.f32.mrf.mxu1  ;;  %v3378_v51 = vadd.f32 %v3377_v28, %v3329_v6 }
 0x4be   : > { %v3283_v57 = vadd.f32 %v3282_v32, %v8910_v58  ;;  %v3327_v58 = vadd.f32 %v3326_v36, %v3278_v63  ;;  %v3473_v27 = vmax.f32 %v3417_v13, 0.0 }
 0x4bf   : > { %v3427_v28 = vadd.f32 %v3426_v4, %v3378_v51 }
 0x4c0   : > { %3733 = vmatmul.bf16.gmra.mxu0 %v8140_v61  ;;  %3782 = vmatmul.bf16.gmra.mxu1 %v8140_v61  ;;  %v3332_v34 = vadd.f32 %v3331_v37, %v3283_v57  ;;  %v3376_v37 = vadd.f32 %v3375_v29, %v3327_v58  ;;  %v8160_v57 = vpop.permute.xlu0 %3564 }
 0x4c1   : > { %v3489_v4 = vmax.f32 %v3427_v28, 0.0 }
 0x4c2   : > { %v3425_v44 = vadd.f32 %v3424_v53, %v3376_v37 }
 0x4c4   : > { %v3380_v42 = vpop.f32.mrf.mxu2  ;;  %3821 = vmatmul.bf16.gmra.mxu2 %v8102_v18  ;;  %v3429_v56 = vpop.f32.mrf.mxu3  ;;  %v3485_v62 = vmax.f32 %v3425_v44, 0.0 }
 0x4c5   : > { %v3284_v3 = vpop.f32.mrf.mxu0  ;;  %v3333_v52 = vpop.f32.mrf.mxu1  ;;  %v3381_v32 = vadd.f32 %v3380_v42, %v3332_v34  ;;  %v3481_v34 = vmax.f32 %v3422_v10, 0.0 }
 0x4c6   : > { %v3285_v59 = vadd.f32 %v3284_v3, %v8916_v38  ;;  %v3541_v35 = vpack.c.bf16 %v3489_v4, %v3485_v62 }
 0x4c7   : > { %v3430_v38 = vadd.f32 %v3429_v56, %v3381_v32  ;;  %v8180_v56 = vpop.permute.xlu1 %3569  ;;  %v3537_v58 = vpack.c.bf16 %v3481_v34, %v3477_v43  ;;  %v3469_v32 = vmax.f32 %v8095_v54, 0.0 }
 0x4c8   : > { %v3334_v22 = vadd.f32 %v3333_v52, %v3285_v59 }
 0x4c9   : > { %v3493_v29 = vmax.f32 %v3430_v38, 0.0  ;;  %v3533_v37 = vpack.c.bf16 %v3473_v27, %v3469_v32 }
 0x4cc   : > { %v3382_v18 = vpop.f32.mrf.mxu2  ;;  %v3431_v30 = vpop.f32.mrf.mxu3 }
 0x4cd   : > { %v3383_v5 = vadd.f32 %v3382_v18, %v3334_v22  ;;  %v3699_v21 = vpop.f32.mrf.mxu0  ;;  %v3748_v36 = vpop.f32.mrf.mxu1 }
 0x4ce   : > { %v8163_v25 = vadd.f32 %v3699_v21, %v8160_v57  ;;  %v8166_v49 = vadd.f32 %v3748_v36, %v8160_v57  ;;  %v8172_v18 = vpop.permute.xlu2 %3609 }
 0x4cf   : > { %v3432_v42 = vadd.f32 %v3431_v30, %v3383_v5  ;;  %8926 = vst [vmem:[#allocation25_spill] sm:$0xff] %v8172_v18 }
 0x4d0   : > { %3886 = vst [vmem:[%s6504_s27] sm:$0xff] %v8163_v25 }
 0x4d1   : > { %v3497_v63 = vmax.f32 %v3432_v42, 0.0  ;;  %3887 = vst [vmem:[%s6504_s27 + $0x8] sm:$0xff] %v8166_v49 }
 0x4d3   : > { %v3545_v33 = vpack.c.bf16 %v3497_v63, %v3493_v29 }
 0x4d4   : > { %3826 = vmatmul.bf16.gmra.mxu2 %v8122_v39 }
 0x4d5   : > { %3837 = vmatpush.bf16.msra.mxu3 %v3545_v33  ;;  %v3701_v53 = vpop.f32.mrf.mxu0  ;;  %v3750_v52 = vpop.f32.mrf.mxu1 }
 0x4d6   : > { %v8183_v3 = vadd.f32 %v3701_v53, %v8180_v56  ;;  %v8187_v59 = vadd.f32 %v3750_v52, %v8180_v56  ;;  %v8197_v6 = vpop.permute.xlu2 %3584 }
 0x4d7   : > { %8927 = vst [vmem:[#allocation26_spill] sm:$0xff] %v8197_v6 }
 0x4d8   : > { %3890 = vst [vmem:[%s6504_s27 + $0x20] sm:$0xff] %v8183_v3 }
 0x4d9   : > { %3891 = vst [vmem:[%s6504_s27 + $0x28] sm:$0xff] %v8187_v59  ;;  %3838 = vmatpush.bf16.msra.mxu3 %v3541_v35 }
 0x4dd   : > { %3839 = vmatpush.bf16.msra.mxu3 %v3537_v58  ;;  %v3704_v51 = vpop.f32.mrf.mxu0  ;;  %v3753_v17 = vpop.f32.mrf.mxu1 }
 0x4de   : > { %v8201_v22 = vadd.f32 %v3704_v51, %v8157_v55  ;;  %v8204_v20 = vadd.f32 %v3753_v17, %v8157_v55  ;;  %v8211_v54 = vpop.permute.xlu2 %3579 }
 0x4e0   : > { %3894 = vst [vmem:[%s6504_s27 + $0x40] sm:$0xff] %v8201_v22 }
 0x4e1   : > { %3895 = vst [vmem:[%s6504_s27 + $0x48] sm:$0xff] %v8204_v20  ;;  %3840 = vmatpush.bf16.msra.mxu3 %v3533_v37 }
 0x4e4   : > { %3831 = vmatmul.bf16.gmra.mxu2 %v8140_v61 }
 0x4e5   : > { %3841 = vmatpush.bf16.msra.mxu3 %v8090_v40  ;;  %v3706_v38 = vpop.f32.mrf.mxu0  ;;  %v3755_v21 = vpop.f32.mrf.mxu1 }
 0x4e6   : > { %v8215_v5 = vadd.f32 %v3706_v38, %v8211_v54  ;;  %v8218_v30 = vadd.f32 %v3755_v21, %v8211_v54 }
 0x4e8   : > { %3898 = vst [vmem:[%s6504_s27 + $0x60] sm:$0xff] %v8215_v5 }
 0x4e9   : > { %3899 = vst [vmem:[%s6504_s27 + $0x68] sm:$0xff] %v8218_v30  ;;  %3842 = vmatpush.bf16.msra.mxu3 %v8078_v14 }
 0x4ed   : > { %3843 = vmatpush.bf16.msra.mxu3 %v8066_v16  ;;  %v3709_v40 = vpop.f32.mrf.mxu0  ;;  %v3758_v42 = vpop.f32.mrf.mxu1 }
 0x4ee   : > { %v8231_v28 = vadd.f32 %v3709_v40, %v8197_v6  ;;  %v8234_v47 = vadd.f32 %v3758_v42, %v8197_v6 }
 0x4f0   : > { %3902 = vst [vmem:[%s6504_s27 + $0x80] sm:$0xff] %v8231_v28 }
 0x4f1   : > { %3903 = vst [vmem:[%s6504_s27 + $0x88] sm:$0xff] %v8234_v47  ;;  %3844 = vmatpush.bf16.msra.mxu3 %v8051_v45 }
 0x4f4   : > { %3845 = vmatmul.bf16.vlgmr.msra.gmra.mxu3 %v8033_v41 }
 0x4f5   : > { %v3711_v14 = vpop.f32.mrf.mxu0  ;;  %v3760_v23 = vpop.f32.mrf.mxu1 }
 0x4f6   : > { %v8243_v16 = vadd.f32 %v3711_v14, %v8146_v15  ;;  %v8246_v44 = vadd.f32 %v3760_v23, %v8146_v15 }
 0x4f7   : > { %v3797_v29 = vpop.f32.mrf.mxu2 }
 0x4f8   : > { %3906 = vst [vmem:[%s6504_s27 + $0xa0] sm:$0xff] %v8243_v16  ;;  %v8253_v45 = vadd.f32 %v3797_v29, %v8160_v57 }
 0x4f9   : > { %3907 = vst [vmem:[%s6504_s27 + $0xa8] sm:$0xff] %v8246_v44 }
 0x4fa   : > { %3888 = vst [vmem:[%s6504_s27 + $0x10] sm:$0xff] %v8253_v45 }
 0x4fd   : > { %v3714_v48 = vpop.f32.mrf.mxu0  ;;  %v3763_v4 = vpop.f32.mrf.mxu1 }
 0x4fe   : > { %v8262_v10 = vadd.f32 %v3714_v48, %v8133_v46  ;;  %v8265_v33 = vadd.f32 %v3763_v4, %v8133_v46 }
 0x4ff   : > { %v3799_v31 = vpop.f32.mrf.mxu2 }
 0x500   : > { %3910 = vst [vmem:[%s6504_s27 + $0xc0] sm:$0xff] %v8262_v10  ;;  %v8270_v62 = vadd.f32 %v3799_v31, %v8180_v56 }
 0x501   : > { %3911 = vst [vmem:[%s6504_s27 + $0xc8] sm:$0xff] %v8265_v33 }
 0x502   : > { %3892 = vst [vmem:[%s6504_s27 + $0x30] sm:$0xff] %v8270_v62 }
 0x504   : > { %3850 = vmatmul.bf16.gmra.mxu3 %v8045_v7  ;;  %v8930_v7 = vld [vmem:[#allocation52_spill] sm:$0xff] }
 0x505   : > { %v3716_v52 = vpop.f32.mrf.mxu0  ;;  %v3765_v34 = vpop.f32.mrf.mxu1 }
 0x506   : > { %v8280_v13 = vadd.f32 %v3716_v52, %v8143_v24  ;;  %v8283_v35 = vadd.f32 %v3765_v34, %v8143_v24 }
 0x507   : > { %v3802_v43 = vpop.f32.mrf.mxu2 }
 0x508   : > { %3914 = vst [vmem:[%s6504_s27 + $0xe0] sm:$0xff] %v8280_v13  ;;  %v8290_v58 = vadd.f32 %v3802_v43, %v8157_v55 }
 0x509   : > { %3915 = vst [vmem:[%s6504_s27 + $0xe8] sm:$0xff] %v8283_v35 }
 0x50a   : > { %3896 = vst [vmem:[%s6504_s27 + $0x50] sm:$0xff] %v8290_v58 }
 0x50d   : > { %v3719_v32 = vpop.f32.mrf.mxu0  ;;  %v3768_v17 = vpop.f32.mrf.mxu1 }
 0x50e   : > { %v8299_v51 = vadd.f32 %v3719_v32, %v8131_v12  ;;  %v8302_v37 = vadd.f32 %v3768_v17, %v8131_v12 }
 0x50f   : > { %v3804_v38 = vpop.f32.mrf.mxu2 }
 0x510   : > { %3918 = vst [vmem:[%s6504_s27 + $0x100] sm:$0xff] %v8299_v51  ;;  %v8307_v21 = vadd.f32 %v3804_v38, %v8211_v54 }
 0x511   : > { %3919 = vst [vmem:[%s6504_s27 + $0x108] sm:$0xff] %v8302_v37 }
 0x512   : > { %3900 = vst [vmem:[%s6504_s27 + $0x70] sm:$0xff] %v8307_v21 }
 0x514   : > { %3855 = vmatmul.bf16.gmra.mxu3 %v8059_v50 }
 0x515   : > { %v3721_v42 = vpop.f32.mrf.mxu0  ;;  %v3770_v23 = vpop.f32.mrf.mxu1 }
 0x516   : > { %v8317_v14 = vadd.f32 %v3721_v42, %v8172_v18  ;;  %v8320_v29 = vadd.f32 %v3770_v23, %v8172_v18 }
 0x517   : > { %v3807_v48 = vpop.f32.mrf.mxu2 }
 0x518   : > { %3922 = vst [vmem:[%s6504_s27 + $0x120] sm:$0xff] %v8317_v14  ;;  %v8325_v4 = vadd.f32 %v3807_v48, %v8197_v6 }
 0x519   : > { %3923 = vst [vmem:[%s6504_s27 + $0x128] sm:$0xff] %v8320_v29 }
 0x51a   : > { %3904 = vst [vmem:[%s6504_s27 + $0x90] sm:$0xff] %v8325_v4 }
 0x51d   : > { %v3724_v50 = vpop.f32.mrf.mxu0  ;;  %v3773_v52 = vpop.f32.mrf.mxu1 }
 0x51e   : > { %v8332_v31 = vadd.f32 %v3724_v50, %v8152_v8  ;;  %v8335_v34 = vadd.f32 %v3773_v52, %v8152_v8 }
 0x51f   : > { %v3809_v43 = vpop.f32.mrf.mxu2 }
 0x520   : > { %3926 = vst [vmem:[%s6504_s27 + $0x140] sm:$0xff] %v8332_v31  ;;  %v8340_v32 = vadd.f32 %v3809_v43, %v8146_v15 }
 0x521   : > { %3927 = vst [vmem:[%s6504_s27 + $0x148] sm:$0xff] %v8335_v34 }
 0x522   : > { %3908 = vst [vmem:[%s6504_s27 + $0xb0] sm:$0xff] %v8340_v32 }
 0x524   : > { %3860 = vmatmul.bf16.gmra.mxu3 %v8073_v19 }
 0x525   : > { %v3726_v38 = vpop.f32.mrf.mxu0  ;;  %v3775_v23 = vpop.f32.mrf.mxu1 }
 0x526   : > { %v3727_v42 = vadd.f32 %v3726_v38, %v8126_v1  ;;  %v3776_v48 = vadd.f32 %v3775_v23, %v8126_v1 }
 0x527   : > { %v3812_v50 = vpop.f32.mrf.mxu2 }
 0x528   : > { %3930 = vst [vmem:[%s6504_s27 + $0x160] sm:$0xff] %v3727_v42  ;;  %v8353_v52 = vadd.f32 %v3812_v50, %v8133_v46  ;;  %v3972_v6 = vpack.c.bf16 %v3776_v48, %v8335_v34 }
 0x529   : > { %3931 = vst [vmem:[%s6504_s27 + $0x168] sm:$0xff] %v3776_v48 }
 0x52a   : > { %3912 = vst [vmem:[%s6504_s27 + $0xd0] sm:$0xff] %v8353_v52 }
 0x52d   : > { %v3729_v43 = vpop.f32.mrf.mxu0  ;;  %v3778_v53 = vpop.f32.mrf.mxu1 }
 0x52e   : > { %v3730_v19 = vadd.f32 %v3729_v43, %v8110_v11  ;;  %v3779_v38 = vadd.f32 %v3778_v53, %v8110_v11 }
 0x52f   : > { %v3814_v40 = vpop.f32.mrf.mxu2 }
 0x530   : > { %3934 = vst [vmem:[%s6504_s27 + $0x180] sm:$0xff] %v3730_v19  ;;  %v8362_v23 = vadd.f32 %v3814_v40, %v8143_v24 }
 0x531   : > { %3935 = vst [vmem:[%s6504_s27 + $0x188] sm:$0xff] %v3779_v38 }
 0x532   : > { %3916 = vst [vmem:[%s6504_s27 + $0xf0] sm:$0xff] %v8362_v23 }
 0x534   : > { %3865 = vmatmul.bf16.gmra.mxu3 %v8085_v26 }
 0x535   : > { %v3731_v43 = vpop.f32.mrf.mxu0  ;;  %v3780_v53 = vpop.f32.mrf.mxu1 }
 0x536   : > { %v3732_v17 = vadd.f32 %v3731_v43, %v8117_v0  ;;  %v3781_v60 = vadd.f32 %v3780_v53, %v8117_v0 }
 0x537   : > { %v3817_v2 = vpop.f32.mrf.mxu2 }
 0x538   : > { %3938 = vst [vmem:[%s6504_s27 + $0x1a0] sm:$0xff] %v3732_v17  ;;  %v8374_v40 = vadd.f32 %v3817_v2, %v8131_v12  ;;  %v8929_v2 = vld [vmem:[#allocation20_spill] sm:$0xff]  ;;  %v3976_v15 = vpack.c.bf16 %v3781_v60, %v3779_v38  ;;  %v8945_v38 = vld [vmem:[#allocation23_spill] sm:$0xff] }
 0x539   : > { %3939 = vst [vmem:[%s6504_s27 + $0x1a8] sm:$0xff] %v3781_v60 }
 0x53a   : > { %3920 = vst [vmem:[%s6504_s27 + $0x110] sm:$0xff] %v8374_v40 }
 0x53d   : > { %v3734_v50 = vpop.f32.mrf.mxu0  ;;  %v3783_v36 = vpop.f32.mrf.mxu1 }
 0x53e   : > { %v3735_v26 = vadd.f32 %v3734_v50, %v8928_v9  ;;  %v3784_v43 = vadd.f32 %v3783_v36, %v8928_v9 }
 0x53f   : > { %v3819_v41 = vpop.f32.mrf.mxu2 }
 0x540   : > { %3942 = vst [vmem:[%s6504_s27 + $0x1c0] sm:$0xff] %v3735_v26  ;;  %v8383_v53 = vadd.f32 %v3819_v41, %v8172_v18  ;;  %v3975_v18 = vpack.c.bf16 %v3732_v17, %v3730_v19  ;;  %v8944_v19 = vld [vmem:[#allocation24_spill] sm:$0xff] }
 0x541   : > { %3943 = vst [vmem:[%s6504_s27 + $0x1c8] sm:$0xff] %v3784_v43 }
 0x542   : > { %3924 = vst [vmem:[%s6504_s27 + $0x130] sm:$0xff] %v8383_v53 }
 0x544   : > { %3870 = vmatmul.bf16.gmra.mxu3 %v8929_v2 }
 0x545   : > { %v3736_v63 = vpop.f32.mrf.mxu0  ;;  %v3785_v12 = vpop.f32.mrf.mxu1 }
 0x546   : > { %v3737_v27 = vadd.f32 %v3736_v63, %v8930_v7  ;;  %v3786_v50 = vadd.f32 %v3785_v12, %v8930_v7  ;;  %v3971_v63 = vpack.c.bf16 %v3727_v42, %v8332_v31  ;;  %v8940_v31 = vpack.c.bf16 %v8340_v32, %v8325_v4 }
 0x547   : > { %v3822_v24 = vpop.f32.mrf.mxu2  ;;  %v8942_v42 = vpack.c.bf16 %v8270_v62, %v8253_v45  ;;  %v8946_v62 = vld [vmem:[#allocation48_spill] sm:$0xff] }
 0x548   : > { %3946 = vst [vmem:[%s6504_s27 + $0x1e0] sm:$0xff] %v3737_v27  ;;  %v3979_v36 = vpack.c.bf16 %v3737_v27, %v3735_v26  ;;  %v3823_v46 = vadd.f32 %v3822_v24, %v8152_v8  ;;  %v3980_v41 = vpack.c.bf16 %v3786_v50, %v3784_v43  ;;  %v3967_v24 = vpack.c.bf16 %v8317_v14, %v8299_v51 }
 0x549   : > { %3947 = vst [vmem:[%s6504_s27 + $0x1e8] sm:$0xff] %v3786_v50  ;;  %v8931_v27 = vpack.c.bf16 %v8280_v13, %v8262_v10  ;;  %v8935_v10 = vpack.c.bf16 %v8215_v5, %v8201_v22 }
 0x54a   : > { %3928 = vst [vmem:[%s6504_s27 + $0x150] sm:$0xff] %v3823_v46  ;;  %3983 = vmatpush.bf16.msrb.mxu0 %v3979_v36  ;;  %3996 = vmatpush.bf16.msrb.mxu1 %v3980_v41  ;;  %v8948_v41 = vld [vmem:[#allocation25_spill] sm:$0xff] }
 0x54e   : > { %3984 = vmatpush.bf16.msrb.mxu0 %v3975_v18  ;;  %3997 = vmatpush.bf16.msrb.mxu1 %v3976_v15  ;;  %v3968_v18 = vpack.c.bf16 %v8320_v29, %v8302_v37  ;;  %v8934_v37 = vpack.c.bf16 %v8246_v44, %v8234_v47 }
 0x54f   : > { %v3824_v2 = vpop.f32.mrf.mxu2 }
 0x550   : > { %v3825_v12 = vadd.f32 %v3824_v2, %v8126_v1 }
 0x552   : > { %3932 = vst [vmem:[%s6504_s27 + $0x170] sm:$0xff] %v3825_v12  ;;  %3985 = vmatpush.bf16.msrb.mxu0 %v3971_v63  ;;  %3998 = vmatpush.bf16.msrb.mxu1 %v3972_v6  ;;  %v8932_v6 = vpack.c.bf16 %v8283_v35, %v8265_v33  ;;  %v8936_v33 = vpack.c.bf16 %v8218_v30, %v8204_v20 }
 0x554   : > { %3875 = vmatmul.bf16.gmra.mxu3 %v8122_v39  ;;  %v8933_v39 = vpack.c.bf16 %v8243_v16, %v8231_v28  ;;  %v8937_v28 = vpack.c.bf16 %v8183_v3, %v8163_v25  ;;  %v8938_v16 = vpack.c.bf16 %v8187_v59, %v8166_v49  ;;  %v3973_v3 = vpack.c.bf16 %v3825_v12, %v3823_v46 }
 0x555   : > { %v3969_v49 = vpack.c.bf16 %v8383_v53, %v8374_v40  ;;  %v8939_v46 = vpack.c.bf16 %v8362_v23, %v8353_v52  ;;  %v8943_v52 = vld [vmem:[#allocation26_spill] sm:$0xff] }
 0x556   : > { %3986 = vmatpush.bf16.msrb.mxu0 %v3967_v24  ;;  %3999 = vmatpush.bf16.msrb.mxu1 %v3968_v18  ;;  %v8947_v53 = vld [vmem:[#allocation22_spill] sm:$0xff] }
 0x557   : > { %v3827_v15 = vpop.f32.mrf.mxu2 }
 0x558   : > { %v3828_v60 = vadd.f32 %v3827_v15, %v8110_v11 }
 0x55a   : > { %3936 = vst [vmem:[%s6504_s27 + $0x190] sm:$0xff] %v3828_v60  ;;  %3987 = vmatpush.bf16.msrb.mxu0 %v8931_v27  ;;  %4000 = vmatpush.bf16.msrb.mxu1 %v8932_v6 }
 0x55e   : > { %3988 = vmatpush.bf16.msrb.mxu0 %v8933_v39  ;;  %4001 = vmatpush.bf16.msrb.mxu1 %v8934_v37  ;;  %v3950_v39 = vld [vmem:[#allocation2] sm:$0x1] }
 0x55f   : > { %v3829_v51 = vpop.f32.mrf.mxu2 }
 0x560   : > { %v3830_v14 = vadd.f32 %v3829_v51, %v8117_v0 }
 0x562   : > { %3940 = vst [vmem:[%s6504_s27 + $0x1b0] sm:$0xff] %v3830_v14  ;;  %3989 = vmatpush.bf16.msrb.mxu0 %v8935_v10  ;;  %4002 = vmatpush.bf16.msrb.mxu1 %v8936_v33 }
 0x564   : > { %3880 = vmatmul.bf16.gmra.mxu3 %v8140_v61  ;;  %v3977_v61 = vpack.c.bf16 %v3830_v14, %v3828_v60 }
 0x566   : > { %3990 = vmatpush.bf16.msrb.mxu0 %v8937_v28  ;;  %4003 = vmatpush.bf16.msrb.mxu1 %v8938_v16 }
 0x567   : > { %v3832_v47 = vpop.f32.mrf.mxu2 }
 0x568   : > { %v3833_v44 = vadd.f32 %v3832_v47, %v8928_v9 }
 0x569   : > { %4004 = vmatmul.bf16.vlgmr.msrb.gmra.mxu1 %v3950_v39  ;;  %3991 = vmatmul.bf16.vlgmr.msrb.gmra.mxu0 %v3950_v39 }
 0x56a   : > { %3944 = vst [vmem:[%s6504_s27 + $0x1d0] sm:$0xff] %v3833_v44 }
 0x56f   : > { %v3834_v22 = vpop.f32.mrf.mxu2 }
 0x570   : > { %v3835_v20 = vadd.f32 %v3834_v22, %v8930_v7 }
 0x572   : > { %3948 = vst [vmem:[%s6504_s27 + $0x1f0] sm:$0xff] %v3835_v20  ;;  %v3981_v5 = vpack.c.bf16 %v3835_v20, %v3833_v44 }
 0x574   : > { %4009 = vmatpush.bf16.msrb.mxu2 %v3981_v5 }
 0x577   : > { %v3846_v30 = vpop.f32.mrf.mxu3 }
 0x578   : > { %v8438_v25 = vadd.f32 %v3846_v30, %v8160_v57  ;;  %4010 = vmatpush.bf16.msrb.mxu2 %v3977_v61 }
 0x57a   : > { %3889 = vst [vmem:[%s6504_s27 + $0x18] sm:$0xff] %v8438_v25 }
 0x57c   : > { %4011 = vmatpush.bf16.msrb.mxu2 %v3973_v3 }
 0x57f   : > { %v3848_v59 = vpop.f32.mrf.mxu3 }
 0x580   : > { %v8445_v13 = vadd.f32 %v3848_v59, %v8180_v56  ;;  %4012 = vmatpush.bf16.msrb.mxu2 %v3969_v49  ;;  %v8941_v56 = vpack.c.bf16 %v8307_v21, %v8290_v58 }
 0x582   : > { %3893 = vst [vmem:[%s6504_s27 + $0x38] sm:$0xff] %v8445_v13  ;;  %v3954_v57 = vpack.c.bf16 %v8445_v13, %v8438_v25 }
 0x584   : > { %4013 = vmatpush.bf16.msrb.mxu2 %v8939_v46 }
 0x587   : > { %v3851_v35 = vpop.f32.mrf.mxu3 }
 0x588   : > { %v3852_v29 = vadd.f32 %v3851_v35, %v8157_v55  ;;  %4014 = vmatpush.bf16.msrb.mxu2 %v8940_v31 }
 0x58a   : > { %3897 = vst [vmem:[%s6504_s27 + $0x58] sm:$0xff] %v3852_v29 }
 0x58c   : > { %4015 = vmatpush.bf16.msrb.mxu2 %v8941_v56 }
 0x58f   : > { %v3853_v34 = vpop.f32.mrf.mxu3 }
 0x590   : > { %v3854_v17 = vadd.f32 %v3853_v34, %v8211_v54  ;;  %4016 = vmatpush.bf16.msrb.mxu2 %v8942_v42 }
 0x592   : > { %3901 = vst [vmem:[%s6504_s27 + $0x78] sm:$0xff] %v3854_v17  ;;  %v3958_v55 = vpack.c.bf16 %v3854_v17, %v3852_v29 }
 0x593   : > { %4017 = vmatmul.bf16.vlgmr.msrb.gmra.mxu2 %v3950_v39 }
 0x597   : > { %v3856_v48 = vpop.f32.mrf.mxu3 }
 0x598   : > { %v3857_v4 = vadd.f32 %v3856_v48, %v8943_v52 }
 0x59a   : > { %3905 = vst [vmem:[%s6504_s27 + $0x98] sm:$0xff] %v3857_v4 }
 0x59f   : > { %v3858_v32 = vpop.f32.mrf.mxu3 }
 0x5a0   : > { %v3859_v58 = vadd.f32 %v3858_v32, %v8944_v19 }
 0x5a2   : > { %3909 = vst [vmem:[%s6504_s27 + $0xb8] sm:$0xff] %v3859_v58  ;;  %v3962_v21 = vpack.c.bf16 %v3859_v58, %v3857_v4 }
 0x5a7   : > { %v3861_v54 = vpop.f32.mrf.mxu3 }
 0x5a8   : > { %v3862_v23 = vadd.f32 %v3861_v54, %v8945_v38 }
 0x5aa   : > { %3913 = vst [vmem:[%s6504_s27 + $0xd8] sm:$0xff] %v3862_v23 }
 0x5af   : > { %v3863_v45 = vpop.f32.mrf.mxu3 }
 0x5b0   : > { %v3864_v40 = vadd.f32 %v3863_v45, %v8946_v62 }
 0x5b2   : > { %3917 = vst [vmem:[%s6504_s27 + $0xf8] sm:$0xff] %v3864_v40  ;;  %v3966_v26 = vpack.c.bf16 %v3864_v40, %v3862_v23  ;;  %v4224_v23 = vld [vmem:[%s6504_s27 + $0xf0] sm:$0xff] (%p6188_p7) }
 0x5b7   : > { %v3866_v43 = vpop.f32.mrf.mxu3 }
 0x5b8   : > { %v3867_v50 = vadd.f32 %v3866_v43, %v8947_v53 }
 0x5ba   : > { %3921 = vst [vmem:[%s6504_s27 + $0x118] sm:$0xff] %v3867_v50 }
 0x5bf   : > { %v3868_v36 = vpop.f32.mrf.mxu3 }
 0x5c0   : > { %v3869_v2 = vadd.f32 %v3868_v36, %v8948_v41 }
 0x5c1   : > { %v4234_v43 = vld [vmem:[%s6504_s27 + $0x118] sm:$0xff] (%p6188_p7) }
 0x5c2   : > { %3925 = vst [vmem:[%s6504_s27 + $0x138] sm:$0xff] %v3869_v2 }
 0x5c7   : > { %v3871_v63 = vpop.f32.mrf.mxu3 }
 0x5c8   : > { %v3872_v12 = vadd.f32 %v3871_v63, %v8152_v8 }
 0x5ca   : > { %3929 = vst [vmem:[%s6504_s27 + $0x158] sm:$0xff] %v3872_v12 }
 0x5cf   : > { %v3873_v24 = vpop.f32.mrf.mxu3 }
 0x5d0   : > { %v3874_v18 = vadd.f32 %v3873_v24, %v8126_v1 }
 0x5d2   : > { %3933 = vst [vmem:[%s6504_s27 + $0x178] sm:$0xff] %v3874_v18  ;;  %v3974_v10 = vpack.c.bf16 %v3874_v18, %v3872_v12 }
 0x5d7   : > { %v3876_v15 = vpop.f32.mrf.mxu3 }
 0x5d8   : > { %v3877_v60 = vadd.f32 %v3876_v15, %v8110_v11  ;;  %v4254_v15 = vld [vmem:[%s6504_s27 + $0x168] sm:$0xff] (%p6188_p7) }
 0x5da   : > { %3937 = vst [vmem:[%s6504_s27 + $0x198] sm:$0xff] %v3877_v60 }
 0x5df   : > { %v3878_v27 = vpop.f32.mrf.mxu3 }
 0x5e0   : > { %v3879_v6 = vadd.f32 %v3878_v27, %v8117_v0  ;;  %v3970_v0 = vpack.c.bf16 %v3869_v2, %v3867_v50  ;;  %v4238_v50 = vld [vmem:[%s6504_s27 + $0x128] sm:$0xff] (%p6188_p7) }
 0x5e2   : > { %3941 = vst [vmem:[%s6504_s27 + $0x1b8] sm:$0xff] %v3879_v6  ;;  %v3978_v11 = vpack.c.bf16 %v3879_v6, %v3877_v60 }
 0x5e7   : > { %v3881_v51 = vpop.f32.mrf.mxu3 }
 0x5e8   : > { %v3882_v8 = vadd.f32 %v3881_v51, %v8928_v9  ;;  %v4005_v9 = vpop.f32.mrf.mxu1 }
 0x5e9   : > { %v5545_v44 = vmul.f32 -1.442695, %v4005_v9 }
 0x5ea   : > { %3945 = vst [vmem:[%s6504_s27 + $0x1d8] sm:$0xff] %v3882_v8 }
 0x5eb   : > { %5913 = vpow2.f32 %v5545_v44  ;;  %v4164_v44 = vld [vmem:[%s6504_s27] sm:$0xff] (%p6188_p7) }
 0x5ef   : > { %v3883_v37 = vpop.f32.mrf.mxu3 }
 0x5f0   : > { %v3884_v1 = vadd.f32 %v3883_v37, %v8930_v7  ;;  %v3992_v7 = vpop.f32.mrf.mxu0  ;;  %v4007_v28 = vpop.f32.mrf.mxu1 }
 0x5f1   : > { %v5544_v20 = vmul.f32 -1.442695, %v3992_v7  ;;  %v5914_v5 = vpop.eup %5913 }
 0x5f2   : > { %3949 = vst [vmem:[%s6504_s27 + $0x1f8] sm:$0xff] %v3884_v1  ;;  %v3982_v14 = vpack.c.bf16 %v3884_v1, %v3882_v8  ;;  %v4048_v30 = vadd.f32 1.0, %v5914_v5  ;;  %v4170_v5 = vld [vmem:[%s6504_s27 + $0x18] sm:$0xff] (%p6188_p7) }
 0x5f4   : > { %4022 = vmatpush.bf16.msrb.mxu3 %v3982_v14  ;;  %vm4071_vm1 = vweird.f32 %v4048_v30  ;;  %v4075_v19 = vand.u32 2147483647, %v4048_v30  ;;  %v4077_v58 = vand.u32 2147483648, %v4048_v30 }
 0x5f6   : > { %vm8498_vm8 = vcmp.eq.f32.partialorder %v4075_v19, 8.507059e+37  ;;  %v4078_v53 = vor.u32 1.1754944e-38, %v4077_v58  ;;  %v4214_v19 = vld [vmem:[%s6504_s27 + $0xc8] sm:$0xff] (%p6188_p7)  ;;  %v4216_v58 = vld [vmem:[%s6504_s27 + $0xd0] sm:$0xff] (%p6188_p7) }
 0x5f8   : > { %4023 = vmatpush.bf16.msrb.mxu3 %v3978_v11  ;;  %v3994_v16 = vpop.f32.mrf.mxu0 }
 0x5fc   : > { %4024 = vmatpush.bf16.msrb.mxu3 %v3974_v10 }
 0x600   : > { %4025 = vmatpush.bf16.msrb.mxu3 %v3970_v0 }
 0x604   : > { %4026 = vmatpush.bf16.msrb.mxu3 %v3966_v26 }
 0x608   : > { %4027 = vmatpush.bf16.msrb.mxu3 %v3962_v21 }
 0x60c   : > { %4028 = vmatpush.bf16.msrb.mxu3 %v3958_v55 }
 0x610   : > { %4029 = vmatpush.bf16.msrb.mxu3 %v3954_v57 }
 0x613   : > { %4030 = vmatmul.bf16.vlgmr.msrb.gmra.mxu3 %v3950_v39 }
 0x616   : > { %v4018_v33 = vpop.f32.mrf.mxu2 }
 0x617   : > { %v5546_v22 = vmul.f32 -1.442695, %v4018_v33 }
 0x619   : > { %5915 = vpow2.f32 %v5546_v22  ;;  %v4166_v22 = vld [vmem:[%s6504_s27 + $0x8] sm:$0xff] (%p6188_p7) }
 0x61a   : > { %5917 = vpow2.f32 %v5544_v20  ;;  %v4168_v20 = vld [vmem:[%s6504_s27 + $0x10] sm:$0xff] (%p6188_p7) }
 0x61b   : > { %5919 = vrcp.f32 %v4048_v30 }
 0x61e   : > { %v4020_v47 = vpop.f32.mrf.mxu2 }
 0x61f   : > { %v5916_v61 = vpop.eup %5915 }
 0x620   : > { %v5918_v3 = vpop.eup %5917  ;;  %v4049_v49 = vadd.f32 1.0, %v5916_v61  ;;  %v4172_v61 = vld [vmem:[%s6504_s27 + $0x20] sm:$0xff] (%p6188_p7) }
 0x621   : > { %v4047_v25 = vadd.f32 1.0, %v5918_v3  ;;  %v5920_v57 = vpop.eup %5919  ;;  %v4176_v3 = vld [vmem:[%s6504_s27 + $0x30] sm:$0xff] (%p6188_p7) }
 0x622   : > { %5921 = vrcp.f32 %v4049_v49  ;;  %v4067_v35 = vmul.f32 %v5920_v57, %v4048_v30  ;;  %vm4072_vm2 = vweird.f32 %v5920_v57  ;;  %vm4086_vm3 = vweird.f32 %v4049_v49  ;;  %v4174_v30 = vld [vmem:[%s6504_s27 + $0x28] sm:$0xff] (%p6188_p7) }
 0x623   : > { %5923 = vrcp.f32 %v4047_v25  ;;  %vm8494_vm5 = vmor %vm4071_vm1, %vm4072_vm2  ;;  %v4090_v45 = vand.u32 2147483647, %v4049_v49  ;;  %v4092_v62 = vand.u32 2147483648, %v4049_v49  ;;  %vm4056_vm6 = vweird.f32 %v4047_v25 }
 0x624   : > { %v4068_v17 = vsub.f32 1.0, %v4067_v35  ;;  %v4062_v36 = vand.u32 2147483648, %v4047_v25  ;;  %v4060_v12 = vand.u32 2147483647, %v4047_v25  ;;  %vm4120_vm1 = vcmask 1045508   ;;  %v4190_v35 = vld [vmem:[%s6504_s27 + $0x68] sm:$0xff] (%p6188_p7) }
 0x625   : > { %vm4091_vm10 = vcmp.eq.f32.partialorder %v4090_v45, 8.507059e+37  ;;  %v4093_v24 = vor.u32 1.1754944e-38, %v4092_v62  ;;  %vm4118_vm2 = vcmask 1041408   ;;  %v4226_v45 = vld [vmem:[%s6504_s27 + $0xf8] sm:$0xff] (%p6188_p7)  ;;  %v4228_v62 = vld [vmem:[%s6504_s27 + $0x100] sm:$0xff] (%p6188_p7) }
 0x626   : > { %v4069_v52 = vmul.f32 %v5920_v57, %v4068_v17  ;;  %v4063_v51 = vor.u32 1.1754944e-38, %v4062_v36  ;;  %vm4061_vm14 = vcmp.eq.f32.partialorder %v4060_v12, 8.507059e+37  ;;  %v4200_v17 = vld [vmem:[%s6504_s27 + $0x90] sm:$0xff] (%p6188_p7) }
 0x627   : > { %v4240_v36 = vld [vmem:[%s6504_s27 + $0x130] sm:$0xff] (%p6188_p7) }
 0x628   : > { %v5922_v46 = vpop.eup %5921  ;;  %v4070_v21 = vadd.f32 %v5920_v57, %v4069_v52  ;;  %v4208_v52 = vld [vmem:[%s6504_s27 + $0xb0] sm:$0xff] (%p6188_p7) }
 0x629   : > { %v5924_v29 = vpop.eup %5923  ;;  %v4082_v31 = vmul.f32 %v5922_v46, %v4049_v49  ;;  %vm4087_vm4 = vweird.f32 %v5922_v46  ;;  %v4178_v49 = vld [vmem:[%s6504_s27 + $0x38] sm:$0xff] (%p6188_p7)  ;;  %v4248_v12 = vld [vmem:[%s6504_s27 + $0x150] sm:$0xff] (%p6188_p7) }
 0x62a   : > { %v4052_v42 = vmul.f32 %v5924_v29, %v4047_v25  ;;  %vm4057_vm7 = vweird.f32 %v5924_v29  ;;  %vm8502_vm9 = vmor %vm4086_vm3, %vm4087_vm4  ;;  %v4074_v41 = vsel %vm8494_vm5, %v5920_v57, %v4070_v21  ;;  %vm4122_vm3 = vcmask 1043456   ;;  %v4180_v25 = vld [vmem:[%s6504_s27 + $0x40] sm:$0xff] (%p6188_p7)  ;;  %v4186_v57 = vld [vmem:[%s6504_s27 + $0x58] sm:$0xff] (%p6188_p7) }
 0x62b   : > { %v4083_v48 = vsub.f32 1.0, %v4082_v31  ;;  %vm8508_vm11 = vmor %vm4056_vm6, %vm4057_vm7  ;;  %v4079_v39 = vsel %vm8498_vm8, %v4078_v53, %v4074_v41  ;;  %v4194_v31 = vld [vmem:[%s6504_s27 + $0x78] sm:$0xff] (%p6188_p7)  ;;  %v4236_v53 = vld [vmem:[%s6504_s27 + $0x120] sm:$0xff] (%p6188_p7) }
 0x62c   : > { %v4053_v4 = vsub.f32 1.0, %v4052_v42  ;;  %v4115_v11 = vrot.slane %v4079_v39, 6  ;;  %v4202_v42 = vld [vmem:[%s6504_s27 + $0x98] sm:$0xff] (%p6188_p7)  ;;  %v4262_v39 = vld [vmem:[%s6504_s27 + $0x188] sm:$0xff] (%p6188_p7) }
 0x62d   : > { %v4084_v32 = vmul.f32 %v5922_v46, %v4083_v48  ;;  %v4206_v48 = vld [vmem:[%s6504_s27 + $0xa8] sm:$0xff] (%p6188_p7)  ;;  %v4218_v21 = vld [vmem:[%s6504_s27 + $0xd8] sm:$0xff] (%p6188_p7) }
 0x62e   : > { %v4054_v54 = vmul.f32 %v5924_v29, %v4053_v4  ;;  %v4210_v4 = vld [vmem:[%s6504_s27 + $0xb8] sm:$0xff] (%p6188_p7) }
 0x62f   : > { %v4085_v40 = vadd.f32 %v5922_v46, %v4084_v32  ;;  %v4212_v32 = vld [vmem:[%s6504_s27 + $0xc0] sm:$0xff] (%p6188_p7)  ;;  %v4242_v41 = vld [vmem:[%s6504_s27 + $0x138] sm:$0xff] (%p6188_p7) }
 0x630   : > { %v4055_v63 = vadd.f32 %v5924_v29, %v4054_v54  ;;  %v4220_v54 = vld [vmem:[%s6504_s27 + $0xe0] sm:$0xff] (%p6188_p7) }
 0x631   : > { %v4089_v60 = vsel %vm8502_vm9, %v5922_v46, %v4085_v40  ;;  %v4188_v46 = vld [vmem:[%s6504_s27 + $0x60] sm:$0xff] (%p6188_p7)  ;;  %v4230_v40 = vld [vmem:[%s6504_s27 + $0x108] sm:$0xff] (%p6188_p7) }
 0x632   : > { %v4059_v37 = vsel %vm8508_vm11, %v5924_v29, %v4055_v63  ;;  %v4094_v1 = vsel %vm4091_vm10, %v4093_v24, %v4089_v60  ;;  %v4192_v29 = vld [vmem:[%s6504_s27 + $0x70] sm:$0xff] (%p6188_p7)  ;;  %v4246_v63 = vld [vmem:[%s6504_s27 + $0x148] sm:$0xff] (%p6188_p7)  ;;  %v4250_v24 = vld [vmem:[%s6504_s27 + $0x158] sm:$0xff] (%p6188_p7) }
 0x633   : > { %v4064_v9 = vsel %vm4061_vm14, %v4063_v51, %v4059_v37  ;;  %v4116_v33 = vrot.slane %v4094_v1, 4  ;;  %v4256_v60 = vld [vmem:[%s6504_s27 + $0x170] sm:$0xff] (%p6188_p7)  ;;  %v4268_v37 = vld [vmem:[%s6504_s27 + $0x1a0] sm:$0xff] (%p6188_p7)  ;;  %v4270_v1 = vld [vmem:[%s6504_s27 + $0x1a8] sm:$0xff] (%p6188_p7) }
 0x634   : > { %v4119_v47 = vsel %vm4118_vm2, %v4064_v9, %v4115_v11  ;;  %v4264_v51 = vld [vmem:[%s6504_s27 + $0x190] sm:$0xff] (%p6188_p7)  ;;  %v4274_v11 = vld [vmem:[%s6504_s27 + $0x1b8] sm:$0xff] (%p6188_p7) }
 0x635   : > { %v4280_v9 = vld [vmem:[%s6504_s27 + $0x1d0] sm:$0xff] (%p6188_p7) }
 0x696   : > { %v4031_v59 = vpop.f32.mrf.mxu3 }
 0x697   : > { %v5547_v13 = vmul.f32 -1.442695, %v4031_v59  ;;  %v4182_v59 = vld [vmem:[%s6504_s27 + $0x48] sm:$0xff] (%p6188_p7) }
 0x699   : > { %5925 = vpow2.f32 %v5547_v13  ;;  %v4184_v13 = vld [vmem:[%s6504_s27 + $0x50] sm:$0xff] (%p6188_p7) }
 0x69e   : > { %v4033_v56 = vpop.f32.mrf.mxu3 }
 0x69f   : > { %v5926_v34 = vpop.eup %5925  ;;  %v4196_v56 = vld [vmem:[%s6504_s27 + $0x80] sm:$0xff] (%p6188_p7) }
 0x6a0   : > { %v4050_v55 = vadd.f32 1.0, %v5926_v34  ;;  %v4198_v34 = vld [vmem:[%s6504_s27 + $0x88] sm:$0xff] (%p6188_p7) }
 0x6a2   : > { %5927 = vrcp.f32 %v4050_v55  ;;  %v4107_v18 = vand.u32 2147483648, %v4050_v55  ;;  %v4105_v6 = vand.u32 2147483647, %v4050_v55  ;;  %vm4101_vm13 = vweird.f32 %v4050_v55 }
 0x6a4   : > { %v4108_v14 = vor.u32 1.1754944e-38, %v4107_v18  ;;  %vm4106_vm0 = vcmp.eq.f32.partialorder %v4105_v6, 8.507059e+37  ;;  %v4252_v18 = vld [vmem:[%s6504_s27 + $0x160] sm:$0xff] (%p6188_p7) }
 0x6a5   : > { %v4260_v6 = vld [vmem:[%s6504_s27 + $0x180] sm:$0xff] (%p6188_p7) }
 0x6a8   : > { %v5928_v38 = vpop.eup %5927 }
 0x6a9   : > { %v4097_v26 = vmul.f32 %v5928_v38, %v4050_v55  ;;  %vm4102_vm12 = vweird.f32 %v5928_v38  ;;  %v4204_v55 = vld [vmem:[%s6504_s27 + $0xa0] sm:$0xff] (%p6188_p7) }
 0x6aa   : > { %vm4103_vm15 = vmor %vm4101_vm13, %vm4102_vm12 }
 0x6ab   : > { %v4098_v2 = vsub.f32 1.0, %v4097_v26  ;;  %v4232_v26 = vld [vmem:[%s6504_s27 + $0x110] sm:$0xff] (%p6188_p7) }
 0x6ad   : > { %v4099_v27 = vmul.f32 %v5928_v38, %v4098_v2  ;;  %v4244_v2 = vld [vmem:[%s6504_s27 + $0x140] sm:$0xff] (%p6188_p7) }
 0x6af   : > { %v4100_v8 = vadd.f32 %v5928_v38, %v4099_v27  ;;  %v4258_v27 = vld [vmem:[%s6504_s27 + $0x178] sm:$0xff] (%p6188_p7) }
 0x6b1   : > { %v4104_v10 = vsel %vm4103_vm15, %v5928_v38, %v4100_v8  ;;  %v4222_v38 = vld [vmem:[%s6504_s27 + $0xe8] sm:$0xff] (%p6188_p7)  ;;  %v4266_v8 = vld [vmem:[%s6504_s27 + $0x198] sm:$0xff] (%p6188_p7) }
 0x6b2   : > { %v4109_v0 = vsel %vm4106_vm0, %v4108_v14, %v4104_v10  ;;  %v4272_v14 = vld [vmem:[%s6504_s27 + $0x1b0] sm:$0xff] (%p6188_p7)  ;;  %v4276_v10 = vld [vmem:[%s6504_s27 + $0x1c0] sm:$0xff] (%p6188_p7) }
 0x6b3   : > { %v4117_v7 = vrot.slane %v4109_v0, 2  ;;  %4146 = sbr.rel (!%p6188_p7) target bundleno = 1785 (0x6f9), region = 95  ;;  %v4278_v0 = vld [vmem:[%s6504_s27 + $0x1c8] sm:$0xff] (%p6188_p7) }
 0x6b5   : > { %v4121_v28 = vsel %vm4120_vm1, %v4116_v33, %v4117_v7  ;;  %v4282_v33 = vld [vmem:[%s6504_s27 + $0x1d8] sm:$0xff] (%p6188_p7)  ;;  %v4284_v7 = vld [vmem:[%s6504_s27 + $0x1e0] sm:$0xff] (%p6188_p7) }
 0x6b6   : > { %v4123_v16 = vsel %vm4122_vm3, %v4119_v47, %v4121_v28  ;;  %v4286_v28 = vld [vmem:[%s6504_s27 + $0x1e8] sm:$0xff] (%p6188_p7)  ;;  %v4288_v47 = vld [vmem:[%s6504_s27 + $0x1f0] sm:$0xff] (%p6188_p7) }
 0x6b7   : > { %4125 = vst [vmem:[%s6500_s22] sm:$0xff] %v4123_v16  ;;  %s5552_s22 = sshll.u32 (%p6188_p7), %s4149_s5, 3  ;;  %v4290_v16 = vld [vmem:[%s6504_s27 + $0x1f8] sm:$0xff] (%p6188_p7) }
 0x6b8   : > { %s8532_s23 = scalar_lea.vmem %s8958_s12, %s5552_s22 }
 0x6b9   : > { %4165 = vst [vmem:[%s8532_s23] sm:$0xff] %v4164_v44 }
 0x6ba   : > { %4167 = vst [vmem:[%s8532_s23 + $0x8] sm:$0xff] %v4166_v22 }
 0x6bb   : > { %4169 = vst [vmem:[%s8532_s23 + $0x10] sm:$0xff] %v4168_v20 }
 0x6bc   : > { %4171 = vst [vmem:[%s8532_s23 + $0x18] sm:$0xff] %v4170_v5 }
 0x6bd   : > { %4173 = vst [vmem:[%s8532_s23 + $0x40] sm:$0xff] %v4172_v61 }
 0x6be   : > { %4175 = vst [vmem:[%s8532_s23 + $0x48] sm:$0xff] %v4174_v30 }
 0x6bf   : > { %4177 = vst [vmem:[%s8532_s23 + $0x50] sm:$0xff] %v4176_v3 }
 0x6c0   : > { %4179 = vst [vmem:[%s8532_s23 + $0x58] sm:$0xff] %v4178_v49 }
 0x6c1   : > { %4181 = vst [vmem:[%s8532_s23 + $0x80] sm:$0xff] %v4180_v25 }
 0x6c2   : > { %4183 = vst [vmem:[%s8532_s23 + $0x88] sm:$0xff] %v4182_v59 }
 0x6c3   : > { %4185 = vst [vmem:[%s8532_s23 + $0x90] sm:$0xff] %v4184_v13 }
 0x6c4   : > { %4187 = vst [vmem:[%s8532_s23 + $0x98] sm:$0xff] %v4186_v57 }
 0x6c5   : > { %4189 = vst [vmem:[%s8532_s23 + $0xc0] sm:$0xff] %v4188_v46 }
 0x6c6   : > { %4191 = vst [vmem:[%s8532_s23 + $0xc8] sm:$0xff] %v4190_v35 }
 0x6c7   : > { %4193 = vst [vmem:[%s8532_s23 + $0xd0] sm:$0xff] %v4192_v29 }
 0x6c8   : > { %4195 = vst [vmem:[%s8532_s23 + $0xd8] sm:$0xff] %v4194_v31 }
 0x6c9   : > { %4197 = vst [vmem:[%s8532_s23 + $0x100] sm:$0xff] %v4196_v56 }
 0x6ca   : > { %4199 = vst [vmem:[%s8532_s23 + $0x108] sm:$0xff] %v4198_v34 }
 0x6cb   : > { %4201 = vst [vmem:[%s8532_s23 + $0x110] sm:$0xff] %v4200_v17 }
 0x6cc   : > { %4203 = vst [vmem:[%s8532_s23 + $0x118] sm:$0xff] %v4202_v42 }
 0x6cd   : > { %4205 = vst [vmem:[%s8532_s23 + $0x140] sm:$0xff] %v4204_v55 }
 0x6ce   : > { %4207 = vst [vmem:[%s8532_s23 + $0x148] sm:$0xff] %v4206_v48 }
 0x6cf   : > { %4209 = vst [vmem:[%s8532_s23 + $0x150] sm:$0xff] %v4208_v52 }
 0x6d0   : > { %4211 = vst [vmem:[%s8532_s23 + $0x158] sm:$0xff] %v4210_v4 }
 0x6d1   : > { %4213 = vst [vmem:[%s8532_s23 + $0x180] sm:$0xff] %v4212_v32 }
 0x6d2   : > { %4215 = vst [vmem:[%s8532_s23 + $0x188] sm:$0xff] %v4214_v19 }
 0x6d3   : > { %4217 = vst [vmem:[%s8532_s23 + $0x190] sm:$0xff] %v4216_v58 }
 0x6d4   : > { %4219 = vst [vmem:[%s8532_s23 + $0x198] sm:$0xff] %v4218_v21 }
 0x6d5   : > { %4221 = vst [vmem:[%s8532_s23 + $0x1c0] sm:$0xff] %v4220_v54 }
 0x6d6   : > { %4223 = vst [vmem:[%s8532_s23 + $0x1c8] sm:$0xff] %v4222_v38 }
 0x6d7   : > { %4225 = vst [vmem:[%s8532_s23 + $0x1d0] sm:$0xff] %v4224_v23 }
 0x6d8   : > { %4227 = vst [vmem:[%s8532_s23 + $0x1d8] sm:$0xff] %v4226_v45 }
 0x6d9   : > { %4229 = vst [vmem:[%s8532_s23 + $0x200] sm:$0xff] %v4228_v62 }
 0x6da   : > { %4231 = vst [vmem:[%s8532_s23 + $0x208] sm:$0xff] %v4230_v40 }
 0x6db   : > { %4233 = vst [vmem:[%s8532_s23 + $0x210] sm:$0xff] %v4232_v26 }
 0x6dc   : > { %4235 = vst [vmem:[%s8532_s23 + $0x218] sm:$0xff] %v4234_v43 }
 0x6dd   : > { %4237 = vst [vmem:[%s8532_s23 + $0x240] sm:$0xff] %v4236_v53 }
 0x6de   : > { %4239 = vst [vmem:[%s8532_s23 + $0x248] sm:$0xff] %v4238_v50 }
 0x6df   : > { %4241 = vst [vmem:[%s8532_s23 + $0x250] sm:$0xff] %v4240_v36 }
 0x6e0   : > { %4243 = vst [vmem:[%s8532_s23 + $0x258] sm:$0xff] %v4242_v41 }
 0x6e1   : > { %4245 = vst [vmem:[%s8532_s23 + $0x280] sm:$0xff] %v4244_v2 }
 0x6e2   : > { %4247 = vst [vmem:[%s8532_s23 + $0x288] sm:$0xff] %v4246_v63 }
 0x6e3   : > { %4249 = vst [vmem:[%s8532_s23 + $0x290] sm:$0xff] %v4248_v12 }
 0x6e4   : > { %4251 = vst [vmem:[%s8532_s23 + $0x298] sm:$0xff] %v4250_v24 }
 0x6e5   : > { %4253 = vst [vmem:[%s8532_s23 + $0x2c0] sm:$0xff] %v4252_v18 }
 0x6e6   : > { %4255 = vst [vmem:[%s8532_s23 + $0x2c8] sm:$0xff] %v4254_v15 }
 0x6e7   : > { %4257 = vst [vmem:[%s8532_s23 + $0x2d0] sm:$0xff] %v4256_v60 }
 0x6e8   : > { %4259 = vst [vmem:[%s8532_s23 + $0x2d8] sm:$0xff] %v4258_v27 }
 0x6e9   : > { %4261 = vst [vmem:[%s8532_s23 + $0x300] sm:$0xff] %v4260_v6 }
 0x6ea   : > { %4263 = vst [vmem:[%s8532_s23 + $0x308] sm:$0xff] %v4262_v39 }
 0x6eb   : > { %4265 = vst [vmem:[%s8532_s23 + $0x310] sm:$0xff] %v4264_v51 }
 0x6ec   : > { %4267 = vst [vmem:[%s8532_s23 + $0x318] sm:$0xff] %v4266_v8 }
 0x6ed   : > { %4269 = vst [vmem:[%s8532_s23 + $0x340] sm:$0xff] %v4268_v37 }
 0x6ee   : > { %4271 = vst [vmem:[%s8532_s23 + $0x348] sm:$0xff] %v4270_v1 }
 0x6ef   : > { %4273 = vst [vmem:[%s8532_s23 + $0x350] sm:$0xff] %v4272_v14 }
 0x6f0   : > { %4275 = vst [vmem:[%s8532_s23 + $0x358] sm:$0xff] %v4274_v11 }
 0x6f1   : > { %4277 = vst [vmem:[%s8532_s23 + $0x380] sm:$0xff] %v4276_v10 }
 0x6f2   : > { %4279 = vst [vmem:[%s8532_s23 + $0x388] sm:$0xff] %v4278_v0 }
 0x6f3   : > { %4281 = vst [vmem:[%s8532_s23 + $0x390] sm:$0xff] %v4280_v9 }
 0x6f4   : > { %4283 = vst [vmem:[%s8532_s23 + $0x398] sm:$0xff] %v4282_v33 }
 0x6f5   : > { %4285 = vst [vmem:[%s8532_s23 + $0x3c0] sm:$0xff] %v4284_v7 }
 0x6f6   : > { %4287 = vst [vmem:[%s8532_s23 + $0x3c8] sm:$0xff] %v4286_v28 }
 0x6f7   : > { %4289 = vst [vmem:[%s8532_s23 + $0x3d0] sm:$0xff] %v4288_v47 }
 0x6f8   : > { %4291 = vst [vmem:[%s8532_s23 + $0x3d8] sm:$0xff] %v4290_v16 }
 0x6f9 PF: > { %s5553_s20 = sshll.u32 %s6027_s16, 1  ;;  %s4303_s18 = sshll.u32 %s6506_s10, 4  ;;  %s4304_s18 = int_to_ptr.vmem [resolvable:$true] %s4303_s18 }
 0x6fa   : > { %s8959_s14 = sld [smem:[#allocation58_spill]] }
 0x700   : > { %s8960_s0 = smov %s8959_s14  ;;  %s4301_s15 = scalar_lea.hbm %s8959_s14, %s5553_s20 }
 0x701   : > { %s4305_s24 = sshll.u32 %s4301_s15, 4  ;;  %s5949_s26 = scalar_lea.hbm %s8960_s0, 4  ;;  %s4306_s24 = int_to_ptr.hbm [resolvable:$true] %s4305_s24 }
 0x702   : > { %s5943_s30 = sshra.s32 %s4306_s24, 4  ;;  %s5944_s30 = int_to_ptr.hbm [resolvable:$true] %s5943_s30 }
 0x703   : > { %s5945_s5 = scalar_lea.hbm %s5944_s30, 2  ;;  %p5950_p11 = scmp.lt.s32.totalorder %s5944_s30, %s8960_s0 }
 0x704   : > { %p5946_p7 = scmp.ne.s32.totalorder %s5944_s30, %s5945_s5  ;;  %p5951_p12 = scmp.lt.s32.totalorder %s5949_s26, %s5945_s5 }
 0x706   : > { %p5947_p9 = pnand %p5946_p7, %p6192_p8  ;;  %p5952_p0 = por %p5951_p12, %p5950_p11 }
 0x708   : > { %p5948_p10 = pneg %p5947_p9 }
 0x70a   : > { %p5953_p1 = pnand %p5952_p0, %p5948_p10 }
 0x70c   : > { %5956 = shalt.err (!%p5953_p1)
}
 0x70d   : > { %5821 = dma.vmem_to_hbm [thread:$0]  (%p6192_p8), %s4304_s18, 32, %s4306_s24, %s8521_s25  }
 0x70e PF: > { %s8961_s2 = sld [smem:[#allocation14_spill]] }
 0x70f   : > { %s8962_s12 = sld [smem:[#allocation9_spill]] }
 0x714   : > { %p5827_p2 = scmp.ge.s32.totalorder %s8961_s2, 2 }
 0x715   : > { %s4328_s20 = sand.u32 1, %s8962_s12  }
 0x716   : > { %p5824_p3 = pnand %p5827_p2, %p6206_p13  ;;  %s4329_s17 = scalar_lea.sflag [#allocation7], %s4328_s20 }
 0x718   : > { %p5825_p4 = pneg %p5824_p3 }
 0x71a   : > { %5998 = dma.done.wait (%p5825_p4), %s4329_s17, 32  }
 0x71b   : > { %6000 = vsyncadd (%p5825_p4), %s4329_s17, 4294967264  ;;  %s28_s10 = sadd.s32 1, %s8961_s2   ;;  %s8964_s29 = sld [smem:[#allocation10_spill]] }
 0x71c   : > { %p25_p5 = scmp.ge.s32.totalorder %s28_s10, 6   ;;  %s8965_s11 = sld [smem:[#allocation17_spill]] }
 0x71d   : > { %s8966_s30 = sld [smem:[#allocation11_spill]]  ;;  %s8972_s27 = smov %s6007_s28 }
 0x71e   : > { %s8967_s14 = sld [smem:[#allocation18_spill]]  ;;  %27 = sbr.rel (!%p25_p5) target bundleno = 14 (0xe), region = 182 }
 0x71f   : > { %s8968_s15 = sld [smem:[#allocation12_spill]] }
 0x720   : > { %s8969_s16 = sld [smem:[#allocation13_spill]] }
 0x721   : > { %s8970_s17 = sld [smem:[#allocation15_spill]]  ;;  %s8973_s28 = smov %s8964_s29 }
 0x722   : > { %s8971_s18 = sld [smem:[#allocation16_spill]]  ;;  %s8974_s29 = smov %s8965_s11 }
 0x723   :  { %4347 = vsyncpa [#allocation7], 1 }
 0x724   :  { %4349 = vsyncpa [#allocation7 + $0x1], 1 }

</bundles_post_ra>
